<compile_context>
chip_gen: v6e
topology: v6e:2x2x1
jax: 0.10.0
libtpu: 0.0.40
codegen_flags: <defaults>
</compile_context>

<pallas_src>
import functools

import jax
import jax.numpy as jnp
from jax.experimental import pallas as pl
from jax.experimental.pallas import tpu as pltpu


# ---------------------------------------------------------------------------
# helpers
# ---------------------------------------------------------------------------
def _round_up(x, m):
    return (x + m - 1) // m * m


_VMEM_LIMIT = 32 * 1024 * 1024  # comfortable on v5e/v6e/v7x (our tiles use ~5 MiB)


# ---------------------------------------------------------------------------
# Pallas kernel 1: grouped, M-tiled   out = relu?(X @ W + bias)
#   X:(G,M,K) bf16   W:(G,K,N) bf16 (BN scale pre-folded)   bias:(G,1,N) f32
# ---------------------------------------------------------------------------
def _matmul_bias_kernel(x_ref, w_ref, b_ref, o_ref, *, relu):
    acc = jnp.dot(x_ref[0], w_ref[0], preferred_element_type=jnp.float32)
    acc = acc + b_ref[0]
    if relu:
        acc = jnp.maximum(acc, 0.0)
    o_ref[0] = acc.astype(o_ref.dtype)


def fused_matmul_bias(x, w, bias, *, relu, out_dtype=jnp.float32, tile_m=512):
    """Grouped fused matmul + bias (+ReLU).

    x: (G, M, K), w: (G, K, N), bias: (G, N) -> (G, M, N) in out_dtype.
    M is tiled over the grid (pipelined HBM->VMEM); N/M are padded so stores are
    lane/sublane dense; MXU inputs are bf16, accumulation is f32.
    """
    G, M, K = x.shape
    Gw, Kw, N = w.shape
    assert G == Gw and K == Kw and bias.shape == (G, N)

    n_pad = _round_up(N, 128)          # lane-dense output stores
    m_pad = _round_up(M, 16)           # bf16 sublane packing
    tm = min(tile_m, m_pad)
    m_pad = _round_up(m_pad, tm)

    x_p = jnp.pad(x.astype(jnp.bfloat16), ((0, 0), (0, m_pad - M), (0, 0)))
    w_p = jnp.pad(w.astype(jnp.bfloat16), ((0, 0), (0, 0), (0, n_pad - N)))
    b_p = jnp.pad(bias.astype(jnp.float32), ((0, 0), (0, n_pad - N))).reshape(G, 1, n_pad)

    out = pl.pallas_call(
        functools.partial(_matmul_bias_kernel, relu=relu),
        out_shape=jax.ShapeDtypeStruct((G, m_pad, n_pad), out_dtype),
        grid=(G, m_pad // tm),
        in_specs=[
            pl.BlockSpec((1, tm, K), lambda g, m: (g, m, 0)),
            pl.BlockSpec((1, K, n_pad), lambda g, m: (g, 0, 0)),
            pl.BlockSpec((1, 1, n_pad), lambda g, m: (g, 0, 0)),
        ],
        out_specs=pl.BlockSpec((1, tm, n_pad), lambda g, m: (g, m, 0)),
        compiler_params=pltpu.CompilerParams(
            dimension_semantics=("parallel", "parallel"),
            vmem_limit_bytes=_VMEM_LIMIT,
        ),
    )(x_p, w_p, b_p)
    return out[:, :M, :N]


# ---------------------------------------------------------------------------
# Pallas kernel 2: fused FC head   out = (relu(X @ W1 + b1)) @ W2 + b2
# ---------------------------------------------------------------------------
def _fc_head_kernel(x_ref, w1_ref, b1_ref, w2_ref, b2_ref, o_ref):
    h = jnp.dot(x_ref[...], w1_ref[...], preferred_element_type=jnp.float32)
    h = jnp.maximum(h + b1_ref[...], 0.0)                                   # fc1 + ReLU
    o = jnp.dot(h.astype(jnp.bfloat16), w2_ref[...], preferred_element_type=jnp.float32)
    o_ref[...] = o + b2_ref[...]                                            # fc2 logits


def fc_head(combined, fc1_w, fc1_b, fc2_w, fc2_b):
    """combined: (B, D). fc1_w: (H1, D), fc2_w: (C, H1) in PyTorch (out, in) layout."""
    B, D = combined.shape
    H1 = fc1_w.shape[0]
    C = fc2_w.shape[0]
    b_pad = _round_up(B, 8)            # fill the MXU sublane rows
    c_pad = _round_up(C, 128)          # lane-dense logits store

    x_p = jnp.pad(combined.astype(jnp.bfloat16), ((0, b_pad - B), (0, 0)))
    w1 = fc1_w.T.astype(jnp.bfloat16)                                       # (D, H1)
    b1 = fc1_b.astype(jnp.float32).reshape(1, H1)
    w2 = jnp.pad(fc2_w.T.astype(jnp.bfloat16), ((0, 0), (0, c_pad - C)))    # (H1, c_pad)
    b2 = jnp.pad(fc2_b.astype(jnp.float32), (0, c_pad - C)).reshape(1, c_pad)

    out = pl.pallas_call(
        _fc_head_kernel,
        out_shape=jax.ShapeDtypeStruct((b_pad, c_pad), jnp.float32),
        grid=(1,),
        in_specs=[
            pl.BlockSpec((b_pad, D), lambda i: (0, 0)),
            pl.BlockSpec((D, H1), lambda i: (0, 0)),
            pl.BlockSpec((1, H1), lambda i: (0, 0)),
            pl.BlockSpec((H1, c_pad), lambda i: (0, 0)),
            pl.BlockSpec((1, c_pad), lambda i: (0, 0)),
        ],
        out_specs=pl.BlockSpec((b_pad, c_pad), lambda i: (0, 0)),
        compiler_params=pltpu.CompilerParams(
            dimension_semantics=("arbitrary",),
            vmem_limit_bytes=_VMEM_LIMIT,
        ),
    )(x_p, w1, b1, w2, b2)
    return out[:B, :C]


# ---------------------------------------------------------------------------
# JAX glue: im2col, pooling, BN fold
# ---------------------------------------------------------------------------
def _im2col_3x3(x_nhwc):
    """3x3 / stride 1 / pad 1 patches: (B,H,W,C) -> (B,H,W,9*C), ordered (ky,kx,cin)."""
    B, H, W, C = x_nhwc.shape
    xp = jnp.pad(x_nhwc, ((0, 0), (1, 1), (1, 1), (0, 0)))
    patches = [xp[:, dy:dy + H, dx:dx + W, :] for dy in range(3) for dx in range(3)]
    return jnp.concatenate(patches, axis=-1)


def maxpool2x2(x):
    """x: (G, B, H, W, C) -> (G, B, H//2, W//2, C) (assumes even H, W)."""
    G, B, H, W, C = x.shape
    return x.reshape(G, B, H // 2, 2, W // 2, 2, C).max(axis=(3, 5))


def _fold_conv_bn(p, cin_pad=None, eps=1e-5):
    """Fold conv bias + BatchNorm (inference) into (9*Cin, Cout) weight and (Cout,) shift."""
    w = p["w"]                                           # (Cout, Cin, 3, 3) PyTorch layout
    cout, cin = w.shape[0], w.shape[1]
    if cin_pad is not None and cin_pad > cin:
        w = jnp.pad(w, ((0, 0), (0, cin_pad - cin), (0, 0), (0, 0)))
        cin = cin_pad
    scale = p["gamma"] / jnp.sqrt(p["var"] + eps)        # (Cout,)
    shift = p["beta"] + (p["b"] - p["mean"]) * scale     # (Cout,)
    wm = jnp.transpose(w, (2, 3, 1, 0)).reshape(9 * cin, cout)   # rows ordered (ky, kx, cin)
    return wm * scale[None, :], shift


# ---------------------------------------------------------------------------
# Model forward
# ---------------------------------------------------------------------------
def classifier_forward(x_nchw, params, shape_weight=0.8, texture_weight=0.2):
    x = jnp.transpose(x_nchw, (0, 2, 3, 1)).astype(jnp.float32)      # NHWC
    B, H, W, C = x.shape
    x_gray = x.mean(axis=-1, keepdims=True)                          # x.mean(dim=1, keepdim=True)
    # Zero-pad grayscale to C channels so both branches share one grouped launch per layer
    # (padded channels are zero and their layer-1 weights are zero-padded: numerically exact).
    x_gray = jnp.pad(x_gray, ((0, 0), (0, 0), (0, 0), (0, C - 1)))

    h = jnp.stack([x_gray, x], axis=0).astype(jnp.bfloat16)          # (2, B, H, W, C)

    n_layers = len(params["shape"])
    feats = None
    for li in range(n_layers):
        cin_pad = C if li == 0 else None
        wm_s, sh_s = _fold_conv_bn(params["shape"][li], cin_pad=cin_pad)
        wm_t, sh_t = _fold_conv_bn(params["texture"][li], cin_pad=cin_pad)
        wm = jnp.stack([wm_s, wm_t], axis=0)                         # (2, 9*Cin, Cout)
        sh = jnp.stack([sh_s, sh_t], axis=0)                         # (2, Cout)

        G, Bc, Hc, Wc, Cc = h.shape
        patches = _im2col_3x3(h.reshape(G * Bc, Hc, Wc, Cc))         # bf16 patches
        patches = patches.reshape(G, Bc * Hc * Wc, 9 * Cc)
        out = fused_matmul_bias(patches, wm, sh, relu=True, out_dtype=jnp.bfloat16)
        h = out.reshape(G, Bc, Hc, Wc, wm.shape[-1])

        if li < n_layers - 1:
            h = maxpool2x2(h)                                        # MaxPool2d(2, 2)
        else:
            feats = h.astype(jnp.float32).mean(axis=(2, 3))          # AdaptiveAvgPool2d((1,1)) + flatten

    combined = jnp.concatenate(
        [feats[0] * shape_weight, feats[1] * texture_weight], axis=1)   # (B, 2*feature_dim)

    return fc_head(combined, params["fc1"]["w"], params["fc1"]["b"],
                   params["fc2"]["w"], params["fc2"]["b"])


# ---------------------------------------------------------------------------
# Deterministic parameter initialization (shapes per the PyTorch module)
# ---------------------------------------------------------------------------
def _init_branch(key, in_channels, feature_dim):
    chans = [(in_channels, 64), (64, 128), (128, 128), (128, feature_dim)]
    convs = []
    for cin, cout in chans:
        key, kw, kb, kg, kbe, km, kv = jax.random.split(key, 7)
        convs.append(dict(
            w=0.1 * jax.random.normal(kw, (cout, cin, 3, 3), jnp.float32),
            b=0.05 * jax.random.normal(kb, (cout,), jnp.float32),
            gamma=1.0 + 0.1 * jax.random.normal(kg, (cout,), jnp.float32),
            beta=0.05 * jax.random.normal(kbe, (cout,), jnp.float32),
            mean=0.05 * jax.random.normal(km, (cout,), jnp.float32),
            var=0.5 + 0.2 * jnp.abs(jax.random.normal(kv, (cout,), jnp.float32)),
        ))
    return convs, key


def init_params(key, num_classes=13, feature_dim=256):
    shape_convs, key = _init_branch(key, 1, feature_dim)
    texture_convs, key = _init_branch(key, 3, feature_dim)
    key, k1, k2, k3, k4 = jax.random.split(key, 5)
    return dict(
        shape=shape_convs,
        texture=texture_convs,
        fc1=dict(w=0.05 * jax.random.normal(k1, (512, feature_dim * 2), jnp.float32),
                 b=0.05 * jax.random.normal(k2, (512,), jnp.float32)),
        fc2=dict(w=0.05 * jax.random.normal(k3, (num_classes, 512), jnp.float32),
                 b=0.05 * jax.random.normal(k4, (num_classes,), jnp.float32)),
    )


if __name__ == "__main__":
    key = jax.random.PRNGKey(0)
    key, kx = jax.random.split(key)

    num_classes, feature_dim = 13, 256
    params = init_params(key, num_classes=num_classes, feature_dim=feature_dim)

    # Small NCHW input consistent with the module: (batch=2, channels=3, 16x16 spatial)
    x = jax.random.normal(kx, (2, 3, 16, 16), jnp.float32)

    fwd = jax.jit(classifier_forward)
    out = jax.block_until_ready(fwd(x, params))

    assert out.shape == (2, num_classes), out.shape
    assert out.dtype == jnp.float32
    print("KERNEL_OK")
</pallas_src>

<mosaic_0001>
module attributes {stable_mosaic.version = 11 : i64} {
  func.func @_matmul_bias_kernel(%arg0: i32, %arg1: i32, %arg2: memref<1x512x27xbf16, #tpu.memory_space<vmem>>, %arg3: memref<1x27x128xbf16, #tpu.memory_space<vmem>>, %arg4: memref<1x1x128xf32, #tpu.memory_space<vmem>>, %arg5: memref<1x512x128xbf16, #tpu.memory_space<vmem>>) attributes {dimension_semantics = [#tpu.dimension_semantics<parallel>, #tpu.dimension_semantics<parallel>], iteration_bounds = array<i64: 2, 1>, scalar_prefetch = 0 : i64, scratch_operands = 0 : i64, tpu.core_type = #tpu.core_type<tc>, window_params = [{transform_indices = @transform_0, window_bounds = array<i64: 1, 512, 27>}, {transform_indices = @transform_1, window_bounds = array<i64: 1, 27, 128>}, {transform_indices = @transform_2, window_bounds = array<i64: 1, 1, 128>}, {transform_indices = @transform_3, window_bounds = array<i64: 1, 512, 128>}]} {
    %c0 = arith.constant 0 : index
    %c0_0 = arith.constant 0 : index
    %c0_1 = arith.constant 0 : index
    %0 = vector.load %arg2[%c0, %c0_0, %c0_1] : memref<1x512x27xbf16, #tpu.memory_space<vmem>>, vector<1x512x27xbf16>
    %1 = vector.shape_cast %0 : vector<1x512x27xbf16> to vector<512x27xbf16>
    %c0_2 = arith.constant 0 : index
    %c0_3 = arith.constant 0 : index
    %c0_4 = arith.constant 0 : index
    %2 = vector.load %arg3[%c0_2, %c0_3, %c0_4] : memref<1x27x128xbf16, #tpu.memory_space<vmem>>, vector<1x27x128xbf16>
    %3 = vector.shape_cast %2 : vector<1x27x128xbf16> to vector<27x128xbf16>
    %cst = arith.constant dense<0.000000e+00> : vector<512x128xf32>
    %4 = tpu.matmul %1, %3, %cst {dimension_numbers = #tpu.dot_dimension_numbers<[1], [0], [0], [1], [0, 0, 1, 1], [], []>} : vector<512x27xbf16>, vector<27x128xbf16>, vector<512x128xf32> -> vector<512x128xf32>
    %c0_5 = arith.constant 0 : index
    %c0_6 = arith.constant 0 : index
    %c0_7 = arith.constant 0 : index
    %5 = vector.load %arg4[%c0_5, %c0_6, %c0_7] : memref<1x1x128xf32, #tpu.memory_space<vmem>>, vector<1x1x128xf32>
    %6 = vector.shape_cast %5 : vector<1x1x128xf32> to vector<1x128xf32>
    %7 = vector.broadcast %6 : vector<1x128xf32> to vector<512x128xf32>
    %8 = arith.addf %4, %7 : vector<512x128xf32>
    %cst_8 = arith.constant 0.000000e+00 : f32
    %9 = vector.broadcast %cst_8 : f32 to vector<512x128xf32>
    %10 = arith.maximumf %8, %9 : vector<512x128xf32>
    %11 = arith.truncf %10 : vector<512x128xf32> to vector<512x128xbf16>
    %c0_9 = arith.constant 0 : index
    %c0_10 = arith.constant 0 : index
    %c0_11 = arith.constant 0 : index
    %12 = vector.load %arg5[%c0_9, %c0_10, %c0_11] : memref<1x512x128xbf16, #tpu.memory_space<vmem>>, vector<1x512x128xbf16>
    %13 = vector.shape_cast %12 : vector<1x512x128xbf16> to vector<512x128xbf16>
    %14 = vector.shape_cast %11 : vector<512x128xbf16> to vector<1x512x128xbf16>
    tpu.vector_store %arg5[%c0_9, %c0_10, %c0_11], %14 {strides = array<i32>} : memref<1x512x128xbf16, #tpu.memory_space<vmem>>, vector<1x512x128xbf16>,
    return
  }
  func.func @transform_0(%arg0: i32, %arg1: i32) -> (i32, i32, i32) {
    %c0_i32 = arith.constant 0 : i32
    %c0_i32_0 = arith.constant 0 : i32
    return %arg0, %arg1, %c0_i32 : i32, i32, i32
  }
  func.func @transform_1(%arg0: i32, %arg1: i32) -> (i32, i32, i32) {
    %c0_i32 = arith.constant 0 : i32
    %c0_i32_0 = arith.constant 0 : i32
    %c0_i32_1 = arith.constant 0 : i32
    return %arg0, %c0_i32, %c0_i32_0 : i32, i32, i32
  }
  func.func @transform_2(%arg0: i32, %arg1: i32) -> (i32, i32, i32) {
    %c0_i32 = arith.constant 0 : i32
    %c0_i32_0 = arith.constant 0 : i32
    %c0_i32_1 = arith.constant 0 : i32
    return %arg0, %c0_i32, %c0_i32_0 : i32, i32, i32
  }
  func.func @transform_3(%arg0: i32, %arg1: i32) -> (i32, i32, i32) {
    %c0_i32 = arith.constant 0 : i32
    %c0_i32_0 = arith.constant 0 : i32
    return %arg0, %arg1, %c0_i32 : i32, i32, i32
  }
}

module attributes {stable_mosaic.version = 11 : i64} {
  func.func @_matmul_bias_kernel(%arg0: i32, %arg1: i32, %arg2: memref<1x128x576xbf16, #tpu.memory_space<vmem>>, %arg3: memref<1x576x128xbf16, #tpu.memory_space<vmem>>, %arg4: memref<1x1x128xf32, #tpu.memory_space<vmem>>, %arg5: memref<1x128x128xbf16, #tpu.memory_space<vmem>>) attributes {dimension_semantics = [#tpu.dimension_semantics<parallel>, #tpu.dimension_semantics<parallel>], iteration_bounds = array<i64: 2, 1>, scalar_prefetch = 0 : i64, scratch_operands = 0 : i64, tpu.core_type = #tpu.core_type<tc>, window_params = [{transform_indices = @transform_0, window_bounds = array<i64: 1, 128, 576>}, {transform_indices = @transform_1, window_bounds = array<i64: 1, 576, 128>}, {transform_indices = @transform_2, window_bounds = array<i64: 1, 1, 128>}, {transform_indices = @transform_3, window_bounds = array<i64: 1, 128, 128>}]} {
    %c0 = arith.constant 0 : index
    %c0_0 = arith.constant 0 : index
    %c0_1 = arith.constant 0 : index
    %0 = vector.load %arg2[%c0, %c0_0, %c0_1] : memref<1x128x576xbf16, #tpu.memory_space<vmem>>, vector<1x128x576xbf16>
    %1 = vector.shape_cast %0 : vector<1x128x576xbf16> to vector<128x576xbf16>
    %c0_2 = arith.constant 0 : index
    %c0_3 = arith.constant 0 : index
    %c0_4 = arith.constant 0 : index
    %2 = vector.load %arg3[%c0_2, %c0_3, %c0_4] : memref<1x576x128xbf16, #tpu.memory_space<vmem>>, vector<1x576x128xbf16>
    %3 = vector.shape_cast %2 : vector<1x576x128xbf16> to vector<576x128xbf16>
    %cst = arith.constant dense<0.000000e+00> : vector<128x128xf32>
    %4 = tpu.matmul %1, %3, %cst {dimension_numbers = #tpu.dot_dimension_numbers<[1], [0], [0], [1], [0, 0, 1, 1], [], []>} : vector<128x576xbf16>, vector<576x128xbf16>, vector<128x128xf32> -> vector<128x128xf32>
    %c0_5 = arith.constant 0 : index
    %c0_6 = arith.constant 0 : index
    %c0_7 = arith.constant 0 : index
    %5 = vector.load %arg4[%c0_5, %c0_6, %c0_7] : memref<1x1x128xf32, #tpu.memory_space<vmem>>, vector<1x1x128xf32>
    %6 = vector.shape_cast %5 : vector<1x1x128xf32> to vector<1x128xf32>
    %7 = vector.broadcast %6 : vector<1x128xf32> to vector<128x128xf32>
    %8 = arith.addf %4, %7 : vector<128x128xf32>
    %cst_8 = arith.constant 0.000000e+00 : f32
    %9 = vector.broadcast %cst_8 : f32 to vector<128x128xf32>
    %10 = arith.maximumf %8, %9 : vector<128x128xf32>
    %11 = arith.truncf %10 : vector<128x128xf32> to vector<128x128xbf16>
    %c0_9 = arith.constant 0 : index
    %c0_10 = arith.constant 0 : index
    %c0_11 = arith.constant 0 : index
    %12 = vector.load %arg5[%c0_9, %c0_10, %c0_11] : memref<1x128x128xbf16, #tpu.memory_space<vmem>>, vector<1x128x128xbf16>
    %13 = vector.shape_cast %12 : vector<1x128x128xbf16> to vector<128x128xbf16>
    %14 = vector.shape_cast %11 : vector<128x128xbf16> to vector<1x128x128xbf16>
    tpu.vector_store %arg5[%c0_9, %c0_10, %c0_11], %14 {strides = array<i32>} : memref<1x128x128xbf16, #tpu.memory_space<vmem>>, vector<1x128x128xbf16>,
    return
  }
  func.func @transform_0(%arg0: i32, %arg1: i32) -> (i32, i32, i32) {
    %c0_i32 = arith.constant 0 : i32
    %c0_i32_0 = arith.constant 0 : i32
    return %arg0, %arg1, %c0_i32 : i32, i32, i32
  }
  func.func @transform_1(%arg0: i32, %arg1: i32) -> (i32, i32, i32) {
    %c0_i32 = arith.constant 0 : i32
    %c0_i32_0 = arith.constant 0 : i32
    %c0_i32_1 = arith.constant 0 : i32
    return %arg0, %c0_i32, %c0_i32_0 : i32, i32, i32
  }
  func.func @transform_2(%arg0: i32, %arg1: i32) -> (i32, i32, i32) {
    %c0_i32 = arith.constant 0 : i32
    %c0_i32_0 = arith.constant 0 : i32
    %c0_i32_1 = arith.constant 0 : i32
    return %arg0, %c0_i32, %c0_i32_0 : i32, i32, i32
  }
  func.func @transform_3(%arg0: i32, %arg1: i32) -> (i32, i32, i32) {
    %c0_i32 = arith.constant 0 : i32
    %c0_i32_0 = arith.constant 0 : i32
    return %arg0, %arg1, %c0_i32 : i32, i32, i32
  }
}

module attributes {stable_mosaic.version = 11 : i64} {
  func.func @_matmul_bias_kernel(%arg0: i32, %arg1: i32, %arg2: memref<1x32x1152xbf16, #tpu.memory_space<vmem>>, %arg3: memref<1x1152x128xbf16, #tpu.memory_space<vmem>>, %arg4: memref<1x1x128xf32, #tpu.memory_space<vmem>>, %arg5: memref<1x32x128xbf16, #tpu.memory_space<vmem>>) attributes {dimension_semantics = [#tpu.dimension_semantics<parallel>, #tpu.dimension_semantics<parallel>], iteration_bounds = array<i64: 2, 1>, scalar_prefetch = 0 : i64, scratch_operands = 0 : i64, tpu.core_type = #tpu.core_type<tc>, window_params = [{transform_indices = @transform_0, window_bounds = array<i64: 1, 32, 1152>}, {transform_indices = @transform_1, window_bounds = array<i64: 1, 1152, 128>}, {transform_indices = @transform_2, window_bounds = array<i64: 1, 1, 128>}, {transform_indices = @transform_3, window_bounds = array<i64: 1, 32, 128>}]} {
    %c0 = arith.constant 0 : index
    %c0_0 = arith.constant 0 : index
    %c0_1 = arith.constant 0 : index
    %0 = vector.load %arg2[%c0, %c0_0, %c0_1] : memref<1x32x1152xbf16, #tpu.memory_space<vmem>>, vector<1x32x1152xbf16>
    %1 = vector.shape_cast %0 : vector<1x32x1152xbf16> to vector<32x1152xbf16>
    %c0_2 = arith.constant 0 : index
    %c0_3 = arith.constant 0 : index
    %c0_4 = arith.constant 0 : index
    %2 = vector.load %arg3[%c0_2, %c0_3, %c0_4] : memref<1x1152x128xbf16, #tpu.memory_space<vmem>>, vector<1x1152x128xbf16>
    %3 = vector.shape_cast %2 : vector<1x1152x128xbf16> to vector<1152x128xbf16>
    %cst = arith.constant dense<0.000000e+00> : vector<32x128xf32>
    %4 = tpu.matmul %1, %3, %cst {dimension_numbers = #tpu.dot_dimension_numbers<[1], [0], [0], [1], [0, 0, 1, 1], [], []>} : vector<32x1152xbf16>, vector<1152x128xbf16>, vector<32x128xf32> -> vector<32x128xf32>
    %c0_5 = arith.constant 0 : index
    %c0_6 = arith.constant 0 : index
    %c0_7 = arith.constant 0 : index
    %5 = vector.load %arg4[%c0_5, %c0_6, %c0_7] : memref<1x1x128xf32, #tpu.memory_space<vmem>>, vector<1x1x128xf32>
    %6 = vector.shape_cast %5 : vector<1x1x128xf32> to vector<1x128xf32>
    %7 = vector.broadcast %6 : vector<1x128xf32> to vector<32x128xf32>
    %8 = arith.addf %4, %7 : vector<32x128xf32>
    %cst_8 = arith.constant 0.000000e+00 : f32
    %9 = vector.broadcast %cst_8 : f32 to vector<32x128xf32>
    %10 = arith.maximumf %8, %9 : vector<32x128xf32>
    %11 = arith.truncf %10 : vector<32x128xf32> to vector<32x128xbf16>
    %c0_9 = arith.constant 0 : index
    %c0_10 = arith.constant 0 : index
    %c0_11 = arith.constant 0 : index
    %12 = vector.load %arg5[%c0_9, %c0_10, %c0_11] : memref<1x32x128xbf16, #tpu.memory_space<vmem>>, vector<1x32x128xbf16>
    %13 = vector.shape_cast %12 : vector<1x32x128xbf16> to vector<32x128xbf16>
    %14 = vector.shape_cast %11 : vector<32x128xbf16> to vector<1x32x128xbf16>
    tpu.vector_store %arg5[%c0_9, %c0_10, %c0_11], %14 {strides = array<i32>} : memref<1x32x128xbf16, #tpu.memory_space<vmem>>, vector<1x32x128xbf16>,
    return
  }
  func.func @transform_0(%arg0: i32, %arg1: i32) -> (i32, i32, i32) {
    %c0_i32 = arith.constant 0 : i32
    %c0_i32_0 = arith.constant 0 : i32
    return %arg0, %arg1, %c0_i32 : i32, i32, i32
  }
  func.func @transform_1(%arg0: i32, %arg1: i32) -> (i32, i32, i32) {
    %c0_i32 = arith.constant 0 : i32
    %c0_i32_0 = arith.constant 0 : i32
    %c0_i32_1 = arith.constant 0 : i32
    return %arg0, %c0_i32, %c0_i32_0 : i32, i32, i32
  }
  func.func @transform_2(%arg0: i32, %arg1: i32) -> (i32, i32, i32) {
    %c0_i32 = arith.constant 0 : i32
    %c0_i32_0 = arith.constant 0 : i32
    %c0_i32_1 = arith.constant 0 : i32
    return %arg0, %c0_i32, %c0_i32_0 : i32, i32, i32
  }
  func.func @transform_3(%arg0: i32, %arg1: i32) -> (i32, i32, i32) {
    %c0_i32 = arith.constant 0 : i32
    %c0_i32_0 = arith.constant 0 : i32
    return %arg0, %arg1, %c0_i32 : i32, i32, i32
  }
}

module attributes {stable_mosaic.version = 11 : i64} {
  func.func @_matmul_bias_kernel(%arg0: i32, %arg1: i32, %arg2: memref<1x16x1152xbf16, #tpu.memory_space<vmem>>, %arg3: memref<1x1152x256xbf16, #tpu.memory_space<vmem>>, %arg4: memref<1x1x256xf32, #tpu.memory_space<vmem>>, %arg5: memref<1x16x256xbf16, #tpu.memory_space<vmem>>) attributes {dimension_semantics = [#tpu.dimension_semantics<parallel>, #tpu.dimension_semantics<parallel>], iteration_bounds = array<i64: 2, 1>, scalar_prefetch = 0 : i64, scratch_operands = 0 : i64, tpu.core_type = #tpu.core_type<tc>, window_params = [{transform_indices = @transform_0, window_bounds = array<i64: 1, 16, 1152>}, {transform_indices = @transform_1, window_bounds = array<i64: 1, 1152, 256>}, {transform_indices = @transform_2, window_bounds = array<i64: 1, 1, 256>}, {transform_indices = @transform_3, window_bounds = array<i64: 1, 16, 256>}]} {
    %c0 = arith.constant 0 : index
    %c0_0 = arith.constant 0 : index
    %c0_1 = arith.constant 0 : index
    %0 = vector.load %arg2[%c0, %c0_0, %c0_1] : memref<1x16x1152xbf16, #tpu.memory_space<vmem>>, vector<1x16x1152xbf16>
    %1 = vector.shape_cast %0 : vector<1x16x1152xbf16> to vector<16x1152xbf16>
    %c0_2 = arith.constant 0 : index
    %c0_3 = arith.constant 0 : index
    %c0_4 = arith.constant 0 : index
    %2 = vector.load %arg3[%c0_2, %c0_3, %c0_4] : memref<1x1152x256xbf16, #tpu.memory_space<vmem>>, vector<1x1152x256xbf16>
    %3 = vector.shape_cast %2 : vector<1x1152x256xbf16> to vector<1152x256xbf16>
    %cst = arith.constant dense<0.000000e+00> : vector<16x256xf32>
    %4 = tpu.matmul %1, %3, %cst {dimension_numbers = #tpu.dot_dimension_numbers<[1], [0], [0], [1], [0, 0, 1, 1], [], []>} : vector<16x1152xbf16>, vector<1152x256xbf16>, vector<16x256xf32> -> vector<16x256xf32>
    %c0_5 = arith.constant 0 : index
    %c0_6 = arith.constant 0 : index
    %c0_7 = arith.constant 0 : index
    %5 = vector.load %arg4[%c0_5, %c0_6, %c0_7] : memref<1x1x256xf32, #tpu.memory_space<vmem>>, vector<1x1x256xf32>
    %6 = vector.shape_cast %5 : vector<1x1x256xf32> to vector<1x256xf32>
    %7 = vector.broadcast %6 : vector<1x256xf32> to vector<16x256xf32>
    %8 = arith.addf %4, %7 : vector<16x256xf32>
    %cst_8 = arith.constant 0.000000e+00 : f32
    %9 = vector.broadcast %cst_8 : f32 to vector<16x256xf32>
    %10 = arith.maximumf %8, %9 : vector<16x256xf32>
    %11 = arith.truncf %10 : vector<16x256xf32> to vector<16x256xbf16>
    %c0_9 = arith.constant 0 : index
    %c0_10 = arith.constant 0 : index
    %c0_11 = arith.constant 0 : index
    %12 = vector.load %arg5[%c0_9, %c0_10, %c0_11] : memref<1x16x256xbf16, #tpu.memory_space<vmem>>, vector<1x16x256xbf16>
    %13 = vector.shape_cast %12 : vector<1x16x256xbf16> to vector<16x256xbf16>
    %14 = vector.shape_cast %11 : vector<16x256xbf16> to vector<1x16x256xbf16>
    tpu.vector_store %arg5[%c0_9, %c0_10, %c0_11], %14 {strides = array<i32>} : memref<1x16x256xbf16, #tpu.memory_space<vmem>>, vector<1x16x256xbf16>,
    return
  }
  func.func @transform_0(%arg0: i32, %arg1: i32) -> (i32, i32, i32) {
    %c0_i32 = arith.constant 0 : i32
    %c0_i32_0 = arith.constant 0 : i32
    return %arg0, %arg1, %c0_i32 : i32, i32, i32
  }
  func.func @transform_1(%arg0: i32, %arg1: i32) -> (i32, i32, i32) {
    %c0_i32 = arith.constant 0 : i32
    %c0_i32_0 = arith.constant 0 : i32
    %c0_i32_1 = arith.constant 0 : i32
    return %arg0, %c0_i32, %c0_i32_0 : i32, i32, i32
  }
  func.func @transform_2(%arg0: i32, %arg1: i32) -> (i32, i32, i32) {
    %c0_i32 = arith.constant 0 : i32
    %c0_i32_0 = arith.constant 0 : i32
    %c0_i32_1 = arith.constant 0 : i32
    return %arg0, %c0_i32, %c0_i32_0 : i32, i32, i32
  }
  func.func @transform_3(%arg0: i32, %arg1: i32) -> (i32, i32, i32) {
    %c0_i32 = arith.constant 0 : i32
    %c0_i32_0 = arith.constant 0 : i32
    return %arg0, %arg1, %c0_i32 : i32, i32, i32
  }
}

module attributes {stable_mosaic.version = 11 : i64} {
  func.func @_fc_head_kernel(%arg0: i32, %arg1: memref<8x512xbf16, #tpu.memory_space<vmem>>, %arg2: memref<512x512xbf16, #tpu.memory_space<vmem>>, %arg3: memref<1x512xf32, #tpu.memory_space<vmem>>, %arg4: memref<512x128xbf16, #tpu.memory_space<vmem>>, %arg5: memref<1x128xf32, #tpu.memory_space<vmem>>, %arg6: memref<8x128xf32, #tpu.memory_space<vmem>>) attributes {dimension_semantics = [#tpu.dimension_semantics<arbitrary>], iteration_bounds = array<i64: 1>, scalar_prefetch = 0 : i64, scratch_operands = 0 : i64, tpu.core_type = #tpu.core_type<tc>, window_params = [{pipeline_mode = #tpu.pipeline_mode<synchronous>, transform_indices = @transform_0, window_bounds = array<i64: 8, 512>}, {pipeline_mode = #tpu.pipeline_mode<synchronous>, transform_indices = @transform_1, window_bounds = array<i64: 512, 512>}, {pipeline_mode = #tpu.pipeline_mode<synchronous>, transform_indices = @transform_2, window_bounds = array<i64: 1, 512>}, {pipeline_mode = #tpu.pipeline_mode<synchronous>, transform_indices = @transform_3, window_bounds = array<i64: 512, 128>}, {pipeline_mode = #tpu.pipeline_mode<synchronous>, transform_indices = @transform_4, window_bounds = array<i64: 1, 128>}, {pipeline_mode = #tpu.pipeline_mode<synchronous>, transform_indices = @transform_5, window_bounds = array<i64: 8, 128>}]} {
    %c0 = arith.constant 0 : index
    %c0_0 = arith.constant 0 : index
    %0 = vector.load %arg1[%c0, %c0_0] : memref<8x512xbf16, #tpu.memory_space<vmem>>, vector<8x512xbf16>
    %c0_1 = arith.constant 0 : index
    %c0_2 = arith.constant 0 : index
    %1 = vector.load %arg2[%c0_1, %c0_2] : memref<512x512xbf16, #tpu.memory_space<vmem>>, vector<512x512xbf16>
    %cst = arith.constant dense<0.000000e+00> : vector<8x512xf32>
    %2 = tpu.matmul %0, %1, %cst {dimension_numbers = #tpu.dot_dimension_numbers<[1], [0], [0], [1], [0, 0, 1, 1], [], []>} : vector<8x512xbf16>, vector<512x512xbf16>, vector<8x512xf32> -> vector<8x512xf32>
    %c0_3 = arith.constant 0 : index
    %c0_4 = arith.constant 0 : index
    %3 = vector.load %arg3[%c0_3, %c0_4] : memref<1x512xf32, #tpu.memory_space<vmem>>, vector<1x512xf32>
    %4 = vector.broadcast %3 : vector<1x512xf32> to vector<8x512xf32>
    %5 = arith.addf %2, %4 : vector<8x512xf32>
    %cst_5 = arith.constant 0.000000e+00 : f32
    %6 = vector.broadcast %cst_5 : f32 to vector<8x512xf32>
    %7 = arith.maximumf %5, %6 : vector<8x512xf32>
    %8 = arith.truncf %7 : vector<8x512xf32> to vector<8x512xbf16>
    %c0_6 = arith.constant 0 : index
    %c0_7 = arith.constant 0 : index
    %9 = vector.load %arg4[%c0_6, %c0_7] : memref<512x128xbf16, #tpu.memory_space<vmem>>, vector<512x128xbf16>
    %cst_8 = arith.constant dense<0.000000e+00> : vector<8x128xf32>
    %10 = tpu.matmul %8, %9, %cst_8 {dimension_numbers = #tpu.dot_dimension_numbers<[1], [0], [0], [1], [0, 0, 1, 1], [], []>} : vector<8x512xbf16>, vector<512x128xbf16>, vector<8x128xf32> -> vector<8x128xf32>
    %c0_9 = arith.constant 0 : index
    %c0_10 = arith.constant 0 : index
    %11 = vector.load %arg5[%c0_9, %c0_10] : memref<1x128xf32, #tpu.memory_space<vmem>>, vector<1x128xf32>
    %12 = vector.broadcast %11 : vector<1x128xf32> to vector<8x128xf32>
    %13 = arith.addf %10, %12 : vector<8x128xf32>
    %c0_11 = arith.constant 0 : index
    %c0_12 = arith.constant 0 : index
    %14 = vector.load %arg6[%c0_11, %c0_12] : memref<8x128xf32, #tpu.memory_space<vmem>>, vector<8x128xf32>
    tpu.vector_store %arg6[%c0_11, %c0_12], %13 {strides = array<i32>} : memref<8x128xf32, #tpu.memory_space<vmem>>, vector<8x128xf32>,
    return
  }
  func.func @transform_0(%arg0: i32) -> (i32, i32) {
    %c0_i32 = arith.constant 0 : i32
    %c0_i32_0 = arith.constant 0 : i32
    %c0_i32_1 = arith.constant 0 : i32
    return %c0_i32, %c0_i32_0 : i32, i32
  }
  func.func @transform_1(%arg0: i32) -> (i32, i32) {
    %c0_i32 = arith.constant 0 : i32
    %c0_i32_0 = arith.constant 0 : i32
    %c0_i32_1 = arith.constant 0 : i32
    return %c0_i32, %c0_i32_0 : i32, i32
  }
  func.func @transform_2(%arg0: i32) -> (i32, i32) {
    %c0_i32 = arith.constant 0 : i32
    %c0_i32_0 = arith.constant 0 : i32
    %c0_i32_1 = arith.constant 0 : i32
    return %c0_i32, %c0_i32_0 : i32, i32
  }
  func.func @transform_3(%arg0: i32) -> (i32, i32) {
    %c0_i32 = arith.constant 0 : i32
    %c0_i32_0 = arith.constant 0 : i32
    %c0_i32_1 = arith.constant 0 : i32
    return %c0_i32, %c0_i32_0 : i32, i32
  }
  func.func @transform_4(%arg0: i32) -> (i32, i32) {
    %c0_i32 = arith.constant 0 : i32
    %c0_i32_0 = arith.constant 0 : i32
    %c0_i32_1 = arith.constant 0 : i32
    return %c0_i32, %c0_i32_0 : i32, i32
  }
  func.func @transform_5(%arg0: i32) -> (i32, i32) {
    %c0_i32 = arith.constant 0 : i32
    %c0_i32_0 = arith.constant 0 : i32
    %c0_i32_1 = arith.constant 0 : i32
    return %c0_i32, %c0_i32_0 : i32, i32
  }
}

</mosaic_0001>

<bundles_post_ra>
// kernel: classifier_forward.5
= control target key start
LH: loop header
LB: loop body
LE: loop exit
PB: predicated region body
PF: predicated region fallthrough
CT: control target
= control target key end

     0   :  { %s1988_s12 = smov 0   ;;  %s1990_s13 = smov 0   ;;  %s2202_s0 = inlined_call_operand.vmem [shape: bf16[2,512,27], index: 0, kind: input, shape index: {}]   ;;  %s2203_s1 = inlined_call_operand.vmem [shape: bf16[2,27,128], index: 1, kind: input, shape index: {}]   ;;  %s2204_s2 = inlined_call_operand.vmem [shape: f32[2,1,128], index: 2, kind: input, shape index: {}]   ;;  %s2205_s3 = inlined_call_operand.vmem [shape: bf16[2,512,128], index: 3, kind: output, shape index: {}]  }
   0x1   :  { %s1992_s14 = smov 0  }
   0x2 LB: > { %s25_s15 = sadd.s32 1, %s1961_s13  ;;  %p1380_p0 = scmp.ge.s32.totalorder %s1965_s14, 1  ;;  %s1965_s14 = sphi %s1992_s14, %s13_s14   ;;  %s1961_s13 = sphi %s1990_s13, %s2207_s13   ;;  %s1957_s12 = sphi %s1988_s12, %s2206_s12  }
   0x3   : > { %p27_p1 = scmp.ge.s32.totalorder %s25_s15, 2  ;;  %p176_p2 = scmp.lt.s32.totalorder %s1965_s14, 3 }
   0x5   : > { %s2209_s15 = smov (%p27_p1, %s25_s15), 0  ;;  %p177_p3 = pnand %p1380_p0, %p176_p2 }
   0x6   : > { %p217_p4 = scmp.lt.s32.totalorder (!%p177_p3), %s1957_s12, 1 }
   0x7   : > { %180 = sbr.rel (%p177_p3) target bundleno = 288 (0x120), region = 32 }
   0xc   : > { %vm588_vm0 = vcmask 1044480   ;;  %s2211_s12 = smov (!%p217_p4, %s1957_s12), 1  ;;  %vm589_vm1 = vcmask 1045504   ;;  %v1967_v0 = vmov 65535   ;;  %vm491_vm2 = vcmask 220160  }
   0xd   : > { %v590_v1 = vsel %vm588_vm0, 4294967295, %v1967_v0  ;;  %s1520_s16 = sshll.u32 %s2211_s12, 8  ;;  %s1521_s17 = sshll.u32 %s2211_s12, 4 }
   0xe   : > { %s230_s20 = scalar_lea.vmem %s2203_s1, %s1521_s17  ;;  %v591_v2 = vsel %vm589_vm1, %v590_v1, 0  ;;  %s2018_s23 = scalar_lea.vmem %s2202_s0, %s1520_s16 }
   0xf   : > { %v1909_v3 = vld [vmem:[%s230_s20 + $0x8] sm:$0x3f]   ;;  %v1910_v5 = vld [vmem:[%s230_s20] sm:$0xff]   ;;  %v1915_v10 = vld [vmem:[%s2018_s23 + $0x10] sm:$0xff]   ;;  %s233_s26 = scalar_lea.vmem %s2204_s2, %s2211_s12  ;;  %s2103_s29 = scalar_lea.vmem %s2205_s3, %s1520_s16 }
  0x10   : > { %v593_v4 = vand.u32 %v1909_v3, %v591_v2  ;;  %v1911_v6 = vld [vmem:[%s2018_s23] sm:$0xff]   ;;  %v1913_v8 = vld [vmem:[%s2018_s23 + $0x8] sm:$0xff]   ;;  %v1916_v11 = vld [vmem:[%s2018_s23 + $0x90] sm:$0xff]  }
  0x11   : > { %v1912_v7 = vld [vmem:[%s2018_s23 + $0x80] sm:$0xff]   ;;  %1816 = vmatprep.mubr.msk.bf16.mxu0 %vm491_vm2, %v1911_v6  ;;  %v1914_v9 = vld [vmem:[%s2018_s23 + $0x88] sm:$0xff]   ;;  %v1917_v12 = vld [vmem:[%s2018_s23 + $0x18] sm:$0xff]  }
  0x12   : > { %1812 = vmatprep.subr.bf16.mxu0 %v593_v4  ;;  %1880 = vmatprep.subr.bf16.mxu1 %v593_v4  ;;  %v1918_v13 = vld [vmem:[%s2018_s23 + $0x98] sm:$0xff]   ;;  %v1919_v14 = vld [vmem:[%s2018_s23 + $0x20] sm:$0xff]   ;;  %v1921_v16 = vld [vmem:[%s2018_s23 + $0x28] sm:$0xff]  }
  0x13   : > { %1813 = vmatpush3.bf16.msra.mxu0 %v593_v4  ;;  %1882 = vmatpush3.bf16.msra.mxu1 %v593_v4  ;;  %v1920_v15 = vld [vmem:[%s2018_s23 + $0xa0] sm:$0xff]   ;;  %v1922_v17 = vld [vmem:[%s2018_s23 + $0xa8] sm:$0xff]   ;;  %v1923_v18 = vld [vmem:[%s2018_s23 + $0x30] sm:$0xff]  }
  0x14   : > { %1814 = vmatprep.subr.bf16.mxu0 %v1910_v5  ;;  %1881 = vmatprep.subr.bf16.mxu1 %v1910_v5  ;;  %v1924_v19 = vld [vmem:[%s2018_s23 + $0xb0] sm:$0xff]   ;;  %v1925_v20 = vld [vmem:[%s2018_s23 + $0x38] sm:$0xff]   ;;  %v1927_v22 = vld [vmem:[%s2018_s23 + $0x40] sm:$0xff]  }
  0x15   : > { %1848 = vmatprep.mubr.msk.bf16.mxu1 %vm491_vm2, %v1912_v7  ;;  %v1926_v21 = vld [vmem:[%s2018_s23 + $0xb8] sm:$0xff]   ;;  %v1928_v23 = vld [vmem:[%s2018_s23 + $0xc0] sm:$0xff]   ;;  %v1929_v24 = vld [vmem:[%s2018_s23 + $0x48] sm:$0xff]  }
  0x16   : > { %v1930_v25 = vld [vmem:[%s2018_s23 + $0xc8] sm:$0xff]   ;;  %v1931_v26 = vld [vmem:[%s2018_s23 + $0x50] sm:$0xff]   ;;  %v1933_v28 = vld [vmem:[%s2018_s23 + $0x58] sm:$0xff]  }
  0x17   : > { %1815 = vmatpush3.bf16.msra.mxu0 %v1910_v5  ;;  %1883 = vmatpush3.bf16.msra.mxu1 %v1910_v5  ;;  %v1932_v27 = vld [vmem:[%s2018_s23 + $0xd0] sm:$0xff]   ;;  %v1934_v29 = vld [vmem:[%s2018_s23 + $0xd8] sm:$0xff]   ;;  %v1935_v30 = vld [vmem:[%s2018_s23 + $0x60] sm:$0xff]  }
  0x18   : > { %v1936_v31 = vld [vmem:[%s2018_s23 + $0xe0] sm:$0xff]   ;;  %v1937_v32 = vld [vmem:[%s2018_s23 + $0x68] sm:$0xff]   ;;  %v1939_v34 = vld [vmem:[%s2018_s23 + $0x70] sm:$0xff]  }
  0x19   : > { %v1938_v33 = vld [vmem:[%s2018_s23 + $0xe8] sm:$0xff]   ;;  %v1940_v35 = vld [vmem:[%s2018_s23 + $0xf0] sm:$0xff]   ;;  %v1941_v36 = vld [vmem:[%s2018_s23 + $0x78] sm:$0xff]  }
  0x1a   : > { %1817 = vmatmul.mubr.msk.bf16.vlgmr.msra.gmra.mxu0 %vm491_vm2, %v1913_v8  ;;  %1849 = vmatmul.mubr.msk.bf16.vlgmr.msra.gmra.mxu1 %vm491_vm2, %v1914_v9  ;;  %v1942_v37 = vld [vmem:[%s2018_s23 + $0xf8] sm:$0xff]   ;;  %v2088_v38 = vld [vmem:[%s233_s26] ss:$0 sm:$0xff] }
  0x1b   : > { %1820 = vmatprep.mubr.msk.bf16.mxu0 %vm491_vm2, %v1915_v10  ;;  %1852 = vmatprep.mubr.msk.bf16.mxu1 %vm491_vm2, %v1916_v11 }
  0x22   : > { %1821 = vmatmul.mubr.msk.bf16.gmra.mxu0 %vm491_vm2, %v1917_v12  ;;  %1853 = vmatmul.mubr.msk.bf16.gmra.mxu1 %vm491_vm2, %v1918_v13 }
  0x23   : > { %1824 = vmatprep.mubr.msk.bf16.mxu0 %vm491_vm2, %v1919_v14  ;;  %1856 = vmatprep.mubr.msk.bf16.mxu1 %vm491_vm2, %v1920_v15 }
  0x2a   : > { %1825 = vmatmul.mubr.msk.bf16.gmra.mxu0 %vm491_vm2, %v1921_v16  ;;  %1857 = vmatmul.mubr.msk.bf16.gmra.mxu1 %vm491_vm2, %v1922_v17 }
  0x2b   : > { %1828 = vmatprep.mubr.msk.bf16.mxu0 %vm491_vm2, %v1923_v18  ;;  %1860 = vmatprep.mubr.msk.bf16.mxu1 %vm491_vm2, %v1924_v19 }
  0x32   : > { %1829 = vmatmul.mubr.msk.bf16.gmra.mxu0 %vm491_vm2, %v1925_v20  ;;  %1861 = vmatmul.mubr.msk.bf16.gmra.mxu1 %vm491_vm2, %v1926_v21 }
  0x33   : > { %1832 = vmatprep.mubr.msk.bf16.mxu0 %vm491_vm2, %v1927_v22  ;;  %1864 = vmatprep.mubr.msk.bf16.mxu1 %vm491_vm2, %v1928_v23 }
  0x3a   : > { %1833 = vmatmul.mubr.msk.bf16.gmra.mxu0 %vm491_vm2, %v1929_v24  ;;  %1865 = vmatmul.mubr.msk.bf16.gmra.mxu1 %vm491_vm2, %v1930_v25 }
  0x3b   : > { %1836 = vmatprep.mubr.msk.bf16.mxu0 %vm491_vm2, %v1931_v26  ;;  %1868 = vmatprep.mubr.msk.bf16.mxu1 %vm491_vm2, %v1932_v27 }
  0x42   : > { %1837 = vmatmul.mubr.msk.bf16.gmra.mxu0 %vm491_vm2, %v1933_v28  ;;  %1869 = vmatmul.mubr.msk.bf16.gmra.mxu1 %vm491_vm2, %v1934_v29 }
  0x43   : > { %1840 = vmatprep.mubr.msk.bf16.mxu0 %vm491_vm2, %v1935_v30  ;;  %1872 = vmatprep.mubr.msk.bf16.mxu1 %vm491_vm2, %v1936_v31 }
  0x4a   : > { %1841 = vmatmul.mubr.msk.bf16.gmra.mxu0 %vm491_vm2, %v1937_v32  ;;  %1873 = vmatmul.mubr.msk.bf16.gmra.mxu1 %vm491_vm2, %v1938_v33 }
  0x4b   : > { %1844 = vmatprep.mubr.msk.bf16.mxu0 %vm491_vm2, %v1939_v34  ;;  %1876 = vmatprep.mubr.msk.bf16.mxu1 %vm491_vm2, %v1940_v35 }
  0x52   : > { %1845 = vmatmul.mubr.msk.bf16.gmra.mxu0 %vm491_vm2, %v1941_v36  ;;  %1877 = vmatmul.mubr.msk.bf16.gmra.mxu1 %vm491_vm2, %v1942_v37 }
  0xda   : > { %v1818_v39 = vpop.f32.mrf.mxu0  ;;  %v1850_v40 = vpop.f32.mrf.mxu1 }
  0xdb   : > { %v638_v41 = vadd.f32 %v1818_v39, %v2088_v38  ;;  %v766_v42 = vadd.f32 %v1850_v40, %v2088_v38 }
  0xdc   : > { %v629_v43 = vpop.f32.mrf.mxu0  ;;  %v757_v44 = vpop.f32.mrf.mxu1 }
  0xdd   : > { %v630_v45 = vadd.f32 %v2088_v38, %v629_v43  ;;  %v758_v46 = vadd.f32 %v2088_v38, %v757_v44  ;;  %v886_v51 = vmax.f32 %v638_v41, 0.0  ;;  %v918_v52 = vmax.f32 %v766_v42, 0.0 }
  0xde   : > { %v1819_v47 = vpop.f32.mrf.mxu0  ;;  %v1851_v48 = vpop.f32.mrf.mxu1 }
  0xdf   : > { %v641_v49 = vadd.f32 %v1819_v47, %v2088_v38  ;;  %v769_v50 = vadd.f32 %v1851_v48, %v2088_v38  ;;  %v884_v59 = vmax.f32 %v630_v45, 0.0  ;;  %v916_v60 = vmax.f32 %v758_v46, 0.0 }
  0xe0   : > { %v632_v53 = vpop.f32.mrf.mxu0  ;;  %v760_v54 = vpop.f32.mrf.mxu1 }
  0xe1   : > { %v887_v55 = vmax.f32 %v641_v49, 0.0  ;;  %v919_v56 = vmax.f32 %v769_v50, 0.0  ;;  %v633_v57 = vadd.f32 %v2088_v38, %v632_v53  ;;  %v761_v58 = vadd.f32 %v2088_v38, %v760_v54 }
  0xe2   : > { %v1822_v61 = vpop.f32.mrf.mxu0  ;;  %v1854_v62 = vpop.f32.mrf.mxu1 }
  0xe3   : > { %v1595_v63 = vpack.c.bf16 %v887_v55, %v886_v51  ;;  %v1675_v0 = vpack.c.bf16 %v919_v56, %v918_v52  ;;  %v885_v1 = vmax.f32 %v633_v57, 0.0  ;;  %v917_v2 = vmax.f32 %v761_v58, 0.0 }
  0xe4   : > { %v654_v3 = vadd.f32 %v1822_v61, %v2088_v38  ;;  %v782_v4 = vadd.f32 %v1854_v62, %v2088_v38  ;;  %v645_v5 = vpop.f32.mrf.mxu0  ;;  %v773_v6 = vpop.f32.mrf.mxu1 }
  0xe5   : > { %1747 = vst [vmem:[%s2103_s29 + $0x8] sm:$0xff] %v1595_v63   ;;  %1763 = vst [vmem:[%s2103_s29 + $0x88] sm:$0xff] %v1675_v0   ;;  %v1590_v7 = vpack.c.bf16 %v885_v1, %v884_v59  ;;  %v1670_v8 = vpack.c.bf16 %v917_v2, %v916_v60  ;;  %v646_v9 = vadd.f32 %v2088_v38, %v645_v5 }
  0xe6   : > { %v774_v10 = vadd.f32 %v2088_v38, %v773_v6  ;;  %v1823_v11 = vpop.f32.mrf.mxu0  ;;  %v1855_v12 = vpop.f32.mrf.mxu1  ;;  %v890_v15 = vmax.f32 %v654_v3, 0.0  ;;  %v922_v16 = vmax.f32 %v782_v4, 0.0 }
  0xe7   : > { %1591 = vst [vmem:[%s2103_s29] sm:$0xff] %v1590_v7   ;;  %1762 = vst [vmem:[%s2103_s29 + $0x80] sm:$0xff] %v1670_v8   ;;  %v657_v13 = vadd.f32 %v1823_v11, %v2088_v38  ;;  %v785_v14 = vadd.f32 %v1855_v12, %v2088_v38  ;;  %v888_v23 = vmax.f32 %v646_v9, 0.0 }
  0xe8   : > { %v648_v17 = vpop.f32.mrf.mxu0  ;;  %v776_v18 = vpop.f32.mrf.mxu1  ;;  %v920_v24 = vmax.f32 %v774_v10, 0.0 }
  0xe9   : > { %v891_v19 = vmax.f32 %v657_v13, 0.0  ;;  %v923_v20 = vmax.f32 %v785_v14, 0.0  ;;  %v649_v21 = vadd.f32 %v2088_v38, %v648_v17  ;;  %v777_v22 = vadd.f32 %v2088_v38, %v776_v18 }
  0xea   : > { %v1826_v25 = vpop.f32.mrf.mxu0  ;;  %v1858_v26 = vpop.f32.mrf.mxu1 }
  0xeb   : > { %v1605_v27 = vpack.c.bf16 %v891_v19, %v890_v15  ;;  %v1685_v28 = vpack.c.bf16 %v923_v20, %v922_v16  ;;  %v889_v29 = vmax.f32 %v649_v21, 0.0  ;;  %v921_v30 = vmax.f32 %v777_v22, 0.0 }
  0xec   : > { %v670_v31 = vadd.f32 %v1826_v25, %v2088_v38  ;;  %v798_v32 = vadd.f32 %v1858_v26, %v2088_v38  ;;  %v661_v33 = vpop.f32.mrf.mxu0  ;;  %v789_v34 = vpop.f32.mrf.mxu1 }
  0xed   : > { %1749 = vst [vmem:[%s2103_s29 + $0x18] sm:$0xff] %v1605_v27   ;;  %1765 = vst [vmem:[%s2103_s29 + $0x98] sm:$0xff] %v1685_v28   ;;  %v1600_v35 = vpack.c.bf16 %v889_v29, %v888_v23  ;;  %v1680_v36 = vpack.c.bf16 %v921_v30, %v920_v24  ;;  %v662_v37 = vadd.f32 %v2088_v38, %v661_v33 }
  0xee   : > { %v790_v39 = vadd.f32 %v2088_v38, %v789_v34  ;;  %v1827_v40 = vpop.f32.mrf.mxu0  ;;  %v1859_v41 = vpop.f32.mrf.mxu1  ;;  %v894_v44 = vmax.f32 %v670_v31, 0.0  ;;  %v926_v45 = vmax.f32 %v798_v32, 0.0 }
  0xef   : > { %1748 = vst [vmem:[%s2103_s29 + $0x10] sm:$0xff] %v1600_v35   ;;  %1764 = vst [vmem:[%s2103_s29 + $0x90] sm:$0xff] %v1680_v36   ;;  %v673_v42 = vadd.f32 %v1827_v40, %v2088_v38  ;;  %v801_v43 = vadd.f32 %v1859_v41, %v2088_v38  ;;  %v892_v52 = vmax.f32 %v662_v37, 0.0 }
  0xf0   : > { %v664_v46 = vpop.f32.mrf.mxu0  ;;  %v792_v47 = vpop.f32.mrf.mxu1  ;;  %v924_v53 = vmax.f32 %v790_v39, 0.0 }
  0xf1   : > { %v895_v48 = vmax.f32 %v673_v42, 0.0  ;;  %v927_v49 = vmax.f32 %v801_v43, 0.0  ;;  %v665_v50 = vadd.f32 %v2088_v38, %v664_v46  ;;  %v793_v51 = vadd.f32 %v2088_v38, %v792_v47 }
  0xf2   : > { %v1830_v54 = vpop.f32.mrf.mxu0  ;;  %v1862_v55 = vpop.f32.mrf.mxu1 }
  0xf3   : > { %v1615_v56 = vpack.c.bf16 %v895_v48, %v894_v44  ;;  %v1695_v57 = vpack.c.bf16 %v927_v49, %v926_v45  ;;  %v893_v58 = vmax.f32 %v665_v50, 0.0  ;;  %v925_v59 = vmax.f32 %v793_v51, 0.0 }
  0xf4   : > { %v686_v60 = vadd.f32 %v1830_v54, %v2088_v38  ;;  %v814_v61 = vadd.f32 %v1862_v55, %v2088_v38  ;;  %v677_v62 = vpop.f32.mrf.mxu0  ;;  %v805_v63 = vpop.f32.mrf.mxu1 }
  0xf5   : > { %1751 = vst [vmem:[%s2103_s29 + $0x28] sm:$0xff] %v1615_v56   ;;  %1767 = vst [vmem:[%s2103_s29 + $0xa8] sm:$0xff] %v1695_v57   ;;  %v1610_v0 = vpack.c.bf16 %v893_v58, %v892_v52  ;;  %v1690_v1 = vpack.c.bf16 %v925_v59, %v924_v53  ;;  %v678_v2 = vadd.f32 %v2088_v38, %v677_v62 }
  0xf6   : > { %v806_v3 = vadd.f32 %v2088_v38, %v805_v63  ;;  %v1831_v4 = vpop.f32.mrf.mxu0  ;;  %v1863_v5 = vpop.f32.mrf.mxu1  ;;  %v898_v8 = vmax.f32 %v686_v60, 0.0  ;;  %v930_v9 = vmax.f32 %v814_v61, 0.0 }
  0xf7   : > { %1750 = vst [vmem:[%s2103_s29 + $0x20] sm:$0xff] %v1610_v0   ;;  %1766 = vst [vmem:[%s2103_s29 + $0xa0] sm:$0xff] %v1690_v1   ;;  %v689_v6 = vadd.f32 %v1831_v4, %v2088_v38  ;;  %v817_v7 = vadd.f32 %v1863_v5, %v2088_v38  ;;  %v896_v16 = vmax.f32 %v678_v2, 0.0 }
  0xf8   : > { %v680_v10 = vpop.f32.mrf.mxu0  ;;  %v808_v11 = vpop.f32.mrf.mxu1  ;;  %v928_v17 = vmax.f32 %v806_v3, 0.0 }
  0xf9   : > { %v899_v12 = vmax.f32 %v689_v6, 0.0  ;;  %v931_v13 = vmax.f32 %v817_v7, 0.0  ;;  %v681_v14 = vadd.f32 %v2088_v38, %v680_v10  ;;  %v809_v15 = vadd.f32 %v2088_v38, %v808_v11 }
  0xfa   : > { %v1834_v18 = vpop.f32.mrf.mxu0  ;;  %v1866_v19 = vpop.f32.mrf.mxu1 }
  0xfb   : > { %v1625_v20 = vpack.c.bf16 %v899_v12, %v898_v8  ;;  %v1705_v21 = vpack.c.bf16 %v931_v13, %v930_v9  ;;  %v897_v22 = vmax.f32 %v681_v14, 0.0  ;;  %v929_v23 = vmax.f32 %v809_v15, 0.0 }
  0xfc   : > { %v702_v24 = vadd.f32 %v1834_v18, %v2088_v38  ;;  %v830_v25 = vadd.f32 %v1866_v19, %v2088_v38  ;;  %v693_v26 = vpop.f32.mrf.mxu0  ;;  %v821_v27 = vpop.f32.mrf.mxu1 }
  0xfd   : > { %1753 = vst [vmem:[%s2103_s29 + $0x38] sm:$0xff] %v1625_v20   ;;  %1769 = vst [vmem:[%s2103_s29 + $0xb8] sm:$0xff] %v1705_v21   ;;  %v1620_v28 = vpack.c.bf16 %v897_v22, %v896_v16  ;;  %v1700_v29 = vpack.c.bf16 %v929_v23, %v928_v17  ;;  %v694_v30 = vadd.f32 %v2088_v38, %v693_v26 }
  0xfe   : > { %v822_v31 = vadd.f32 %v2088_v38, %v821_v27  ;;  %v1835_v32 = vpop.f32.mrf.mxu0  ;;  %v1867_v33 = vpop.f32.mrf.mxu1  ;;  %v902_v36 = vmax.f32 %v702_v24, 0.0  ;;  %v934_v37 = vmax.f32 %v830_v25, 0.0 }
  0xff   : > { %1752 = vst [vmem:[%s2103_s29 + $0x30] sm:$0xff] %v1620_v28   ;;  %1768 = vst [vmem:[%s2103_s29 + $0xb0] sm:$0xff] %v1700_v29   ;;  %v705_v34 = vadd.f32 %v1835_v32, %v2088_v38  ;;  %v833_v35 = vadd.f32 %v1867_v33, %v2088_v38  ;;  %v900_v45 = vmax.f32 %v694_v30, 0.0 }
 0x100   : > { %v696_v39 = vpop.f32.mrf.mxu0  ;;  %v824_v40 = vpop.f32.mrf.mxu1  ;;  %v932_v46 = vmax.f32 %v822_v31, 0.0 }
 0x101   : > { %v903_v41 = vmax.f32 %v705_v34, 0.0  ;;  %v935_v42 = vmax.f32 %v833_v35, 0.0  ;;  %v697_v43 = vadd.f32 %v2088_v38, %v696_v39  ;;  %v825_v44 = vadd.f32 %v2088_v38, %v824_v40 }
 0x102   : > { %v1838_v47 = vpop.f32.mrf.mxu0  ;;  %v1870_v48 = vpop.f32.mrf.mxu1 }
 0x103   : > { %v1635_v49 = vpack.c.bf16 %v903_v41, %v902_v36  ;;  %v1715_v50 = vpack.c.bf16 %v935_v42, %v934_v37  ;;  %v901_v51 = vmax.f32 %v697_v43, 0.0  ;;  %v933_v52 = vmax.f32 %v825_v44, 0.0 }
 0x104   : > { %v718_v53 = vadd.f32 %v1838_v47, %v2088_v38  ;;  %v846_v54 = vadd.f32 %v1870_v48, %v2088_v38  ;;  %v709_v55 = vpop.f32.mrf.mxu0  ;;  %v837_v56 = vpop.f32.mrf.mxu1 }
 0x105   : > { %1755 = vst [vmem:[%s2103_s29 + $0x48] sm:$0xff] %v1635_v49   ;;  %1771 = vst [vmem:[%s2103_s29 + $0xc8] sm:$0xff] %v1715_v50   ;;  %v1630_v57 = vpack.c.bf16 %v901_v51, %v900_v45  ;;  %v1710_v58 = vpack.c.bf16 %v933_v52, %v932_v46  ;;  %v710_v59 = vadd.f32 %v2088_v38, %v709_v55 }
 0x106   : > { %v838_v60 = vadd.f32 %v2088_v38, %v837_v56  ;;  %v1839_v61 = vpop.f32.mrf.mxu0  ;;  %v1871_v62 = vpop.f32.mrf.mxu1  ;;  %v906_v1 = vmax.f32 %v718_v53, 0.0  ;;  %v938_v2 = vmax.f32 %v846_v54, 0.0 }
 0x107   : > { %1754 = vst [vmem:[%s2103_s29 + $0x40] sm:$0xff] %v1630_v57   ;;  %1770 = vst [vmem:[%s2103_s29 + $0xc0] sm:$0xff] %v1710_v58   ;;  %v721_v63 = vadd.f32 %v1839_v61, %v2088_v38  ;;  %v849_v0 = vadd.f32 %v1871_v62, %v2088_v38  ;;  %v904_v9 = vmax.f32 %v710_v59, 0.0 }
 0x108   : > { %v712_v3 = vpop.f32.mrf.mxu0  ;;  %v840_v4 = vpop.f32.mrf.mxu1  ;;  %v936_v10 = vmax.f32 %v838_v60, 0.0 }
 0x109   : > { %v907_v5 = vmax.f32 %v721_v63, 0.0  ;;  %v939_v6 = vmax.f32 %v849_v0, 0.0  ;;  %v713_v7 = vadd.f32 %v2088_v38, %v712_v3  ;;  %v841_v8 = vadd.f32 %v2088_v38, %v840_v4 }
 0x10a   : > { %v1842_v11 = vpop.f32.mrf.mxu0  ;;  %v1874_v12 = vpop.f32.mrf.mxu1 }
 0x10b   : > { %v1645_v13 = vpack.c.bf16 %v907_v5, %v906_v1  ;;  %v1725_v14 = vpack.c.bf16 %v939_v6, %v938_v2  ;;  %v905_v15 = vmax.f32 %v713_v7, 0.0  ;;  %v937_v16 = vmax.f32 %v841_v8, 0.0 }
 0x10c   : > { %v734_v17 = vadd.f32 %v1842_v11, %v2088_v38  ;;  %v862_v18 = vadd.f32 %v1874_v12, %v2088_v38  ;;  %v725_v19 = vpop.f32.mrf.mxu0  ;;  %v853_v20 = vpop.f32.mrf.mxu1 }
 0x10d   : > { %1757 = vst [vmem:[%s2103_s29 + $0x58] sm:$0xff] %v1645_v13   ;;  %1773 = vst [vmem:[%s2103_s29 + $0xd8] sm:$0xff] %v1725_v14   ;;  %v1640_v21 = vpack.c.bf16 %v905_v15, %v904_v9  ;;  %v1720_v22 = vpack.c.bf16 %v937_v16, %v936_v10  ;;  %v726_v23 = vadd.f32 %v2088_v38, %v725_v19 }
 0x10e   : > { %v854_v24 = vadd.f32 %v2088_v38, %v853_v20  ;;  %v1843_v25 = vpop.f32.mrf.mxu0  ;;  %v1875_v26 = vpop.f32.mrf.mxu1  ;;  %v910_v29 = vmax.f32 %v734_v17, 0.0  ;;  %v942_v30 = vmax.f32 %v862_v18, 0.0 }
 0x10f   : > { %1756 = vst [vmem:[%s2103_s29 + $0x50] sm:$0xff] %v1640_v21   ;;  %1772 = vst [vmem:[%s2103_s29 + $0xd0] sm:$0xff] %v1720_v22   ;;  %v737_v27 = vadd.f32 %v1843_v25, %v2088_v38  ;;  %v865_v28 = vadd.f32 %v1875_v26, %v2088_v38  ;;  %v908_v37 = vmax.f32 %v726_v23, 0.0 }
 0x110   : > { %v728_v31 = vpop.f32.mrf.mxu0  ;;  %v856_v32 = vpop.f32.mrf.mxu1  ;;  %v940_v39 = vmax.f32 %v854_v24, 0.0 }
 0x111   : > { %v911_v33 = vmax.f32 %v737_v27, 0.0  ;;  %v943_v34 = vmax.f32 %v865_v28, 0.0  ;;  %v729_v35 = vadd.f32 %v2088_v38, %v728_v31  ;;  %v857_v36 = vadd.f32 %v2088_v38, %v856_v32 }
 0x112   : > { %v1846_v40 = vpop.f32.mrf.mxu0  ;;  %v1878_v41 = vpop.f32.mrf.mxu1 }
 0x113   : > { %v1655_v42 = vpack.c.bf16 %v911_v33, %v910_v29  ;;  %v1735_v43 = vpack.c.bf16 %v943_v34, %v942_v30  ;;  %v909_v44 = vmax.f32 %v729_v35, 0.0  ;;  %v941_v45 = vmax.f32 %v857_v36, 0.0 }
 0x114   : > { %v750_v46 = vadd.f32 %v1846_v40, %v2088_v38  ;;  %v878_v47 = vadd.f32 %v1878_v41, %v2088_v38  ;;  %v741_v48 = vpop.f32.mrf.mxu0  ;;  %v869_v49 = vpop.f32.mrf.mxu1 }
 0x115   : > { %1759 = vst [vmem:[%s2103_s29 + $0x68] sm:$0xff] %v1655_v42   ;;  %1775 = vst [vmem:[%s2103_s29 + $0xe8] sm:$0xff] %v1735_v43   ;;  %v1650_v50 = vpack.c.bf16 %v909_v44, %v908_v37  ;;  %v1730_v51 = vpack.c.bf16 %v941_v45, %v940_v39  ;;  %v742_v52 = vadd.f32 %v2088_v38, %v741_v48 }
 0x116   : > { %v870_v53 = vadd.f32 %v2088_v38, %v869_v49  ;;  %v1847_v54 = vpop.f32.mrf.mxu0  ;;  %v1879_v55 = vpop.f32.mrf.mxu1  ;;  %v914_v58 = vmax.f32 %v750_v46, 0.0  ;;  %v946_v59 = vmax.f32 %v878_v47, 0.0 }
 0x117   : > { %1758 = vst [vmem:[%s2103_s29 + $0x60] sm:$0xff] %v1650_v50   ;;  %1774 = vst [vmem:[%s2103_s29 + $0xe0] sm:$0xff] %v1730_v51   ;;  %v753_v56 = vadd.f32 %v1847_v54, %v2088_v38  ;;  %v881_v57 = vadd.f32 %v1879_v55, %v2088_v38  ;;  %v912_v2 = vmax.f32 %v742_v52, 0.0 }
 0x118   : > { %v744_v60 = vpop.f32.mrf.mxu0  ;;  %v872_v61 = vpop.f32.mrf.mxu1  ;;  %v944_v3 = vmax.f32 %v870_v53, 0.0 }
 0x119   : > { %v915_v62 = vmax.f32 %v753_v56, 0.0  ;;  %v947_v63 = vmax.f32 %v881_v57, 0.0  ;;  %v745_v0 = vadd.f32 %v2088_v38, %v744_v60  ;;  %v873_v1 = vadd.f32 %v2088_v38, %v872_v61 }
 0x11b   : > { %v1665_v4 = vpack.c.bf16 %v915_v62, %v914_v58  ;;  %v1745_v5 = vpack.c.bf16 %v947_v63, %v946_v59  ;;  %v913_v6 = vmax.f32 %v745_v0, 0.0  ;;  %v945_v7 = vmax.f32 %v873_v1, 0.0 }
 0x11d   : > { %1761 = vst [vmem:[%s2103_s29 + $0x78] sm:$0xff] %v1665_v4   ;;  %1777 = vst [vmem:[%s2103_s29 + $0xf8] sm:$0xff] %v1745_v5   ;;  %v1660_v8 = vpack.c.bf16 %v913_v6, %v912_v2  ;;  %v1740_v9 = vpack.c.bf16 %v945_v7, %v944_v3 }
 0x11f   : > { %1760 = vst [vmem:[%s2103_s29 + $0x70] sm:$0xff] %v1660_v8   ;;  %1776 = vst [vmem:[%s2103_s29 + $0xf0] sm:$0xff] %v1740_v9  }
 0x120 PF: > { %s13_s14 = sadd.s32 1, %s1965_s14   ;;  %s2206_s12 = smov %s1961_s13 }
 0x121   : > { %p10_p5 = scmp.ge.s32.totalorder %s13_s14, 4   ;;  %s2207_s13 = smov %s2209_s15 }
 0x123   :  { %12 = sbr.rel (!%p10_p5) target bundleno = 2 (0x2), region = 68 }

// kernel: classifier_forward.6
= control target key start
LH: loop header
LB: loop body
LE: loop exit
PB: predicated region body
PF: predicated region fallthrough
CT: control target
= control target key end

     0   :  { %s1824_s12 = smov 0   ;;  %s1826_s13 = smov 0   ;;  %s2039_s0 = inlined_call_operand.vmem [shape: bf16[2,128,576], index: 0, kind: input, shape index: {}]   ;;  %s2040_s1 = inlined_call_operand.vmem [shape: bf16[2,576,128], index: 1, kind: input, shape index: {}]   ;;  %s2041_s2 = inlined_call_operand.vmem [shape: f32[2,1,128], index: 2, kind: input, shape index: {}]   ;;  %s2042_s3 = inlined_call_operand.vmem [shape: bf16[2,128,128], index: 3, kind: output, shape index: {}]  }
   0x1   :  { %s1828_s14 = smov 0  }
   0x2 LB: > { %s25_s15 = sadd.s32 1, %s1798_s13  ;;  %p1318_p0 = scmp.ge.s32.totalorder %s1802_s14, 1  ;;  %s1802_s14 = sphi %s1828_s14, %s13_s14   ;;  %s1798_s13 = sphi %s1826_s13, %s2052_s13   ;;  %s1794_s12 = sphi %s1824_s12, %s2051_s12  }
   0x3   : > { %p27_p1 = scmp.ge.s32.totalorder %s25_s15, 2  ;;  %p177_p2 = scmp.lt.s32.totalorder %s1802_s14, 3 }
   0x5   : > { %s2054_s15 = smov (%p27_p1, %s25_s15), 0  ;;  %p178_p3 = pnand %p1318_p0, %p177_p2 }
   0x7   : > { %181 = sbr.rel (%p178_p3) target bundleno = 331 (0x14b), region = 32 }
   0xc   : > { %p219_p4 = scmp.lt.s32.totalorder %s1794_s12, 1  ;;  %vm791_vm0 = vcmask 523264  }
   0xe   : > { %s2056_s12 = smov (!%p219_p4, %s1794_s12), 1 }
   0xf   : > { %s1663_s16 = smul.u32 288, %s2056_s12  ;;  %s236_s26 = scalar_lea.vmem %s2041_s2, %s2056_s12 }
  0x10   : > { %s1662_s20 = smul.u32 320, %s2056_s12  ;;  %s1426_s27 = sshll.u32 %s2056_s12, 6 }
  0x11   : > { %s1848_s19 = scalar_lea.vmem %s2040_s1, %s1663_s16  ;;  %s2014_s30 = scalar_lea.vmem %s2042_s3, %s1426_s27 }
  0x12   : > { %v1688_v0 = vld [vmem:[%s1848_s19 + $0x78] sm:$0xff]   ;;  %v1692_v4 = vld [vmem:[%s1848_s19 + $0x70] sm:$0xff]   ;;  %v1696_v8 = vld [vmem:[%s1848_s19 + $0x68] sm:$0xff]   ;;  %s1884_s23 = scalar_lea.vmem %s2039_s0, %s1662_s20 }
  0x13   : > { %v1689_v1 = vld [vmem:[%s1848_s19 + $0xf8] sm:$0xff]   ;;  %1490 = vmatprep.subr.bf16.mxu0 %v1688_v0  ;;  %v1693_v5 = vld [vmem:[%s1848_s19 + $0xf0] sm:$0xff]   ;;  %v1697_v9 = vld [vmem:[%s1848_s19 + $0xe8] sm:$0xff]  }
  0x14   : > { %v1690_v2 = vld [vmem:[%s1848_s19 + $0x38] sm:$0xff]   ;;  %1554 = vmatprep.subr.bf16.mxu1 %v1689_v1  ;;  %v1694_v6 = vld [vmem:[%s1848_s19 + $0x30] sm:$0xff]   ;;  %v1698_v10 = vld [vmem:[%s1848_s19 + $0x28] sm:$0xff]  }
  0x15   : > { %v1691_v3 = vld [vmem:[%s1848_s19 + $0xb8] sm:$0xff]   ;;  %1491 = vmatpush3.bf16.msra.mxu0 %v1690_v2  ;;  %v1695_v7 = vld [vmem:[%s1848_s19 + $0xb0] sm:$0xff]   ;;  %v1699_v11 = vld [vmem:[%s1848_s19 + $0xa8] sm:$0xff]  }
  0x16   : > { %1555 = vmatpush3.bf16.msra.mxu1 %v1691_v3  ;;  %1492 = vmatprep.subr.bf16.mxu0 %v1692_v4  ;;  %v1700_v12 = vld [vmem:[%s1848_s19 + $0x60] sm:$0xff]   ;;  %v1704_v16 = vld [vmem:[%s1848_s19 + $0x58] sm:$0xff]   ;;  %v1708_v20 = vld [vmem:[%s1848_s19 + $0x50] sm:$0xff]  }
  0x17   : > { %1556 = vmatprep.subr.bf16.mxu1 %v1693_v5  ;;  %v1701_v13 = vld [vmem:[%s1848_s19 + $0xe0] sm:$0xff]   ;;  %v1705_v17 = vld [vmem:[%s1848_s19 + $0xd8] sm:$0xff]   ;;  %v1709_v21 = vld [vmem:[%s1848_s19 + $0xd0] sm:$0xff]  }
  0x18   : > { %v1702_v14 = vld [vmem:[%s1848_s19 + $0x20] sm:$0xff]   ;;  %v1706_v18 = vld [vmem:[%s1848_s19 + $0x18] sm:$0xff]   ;;  %v1710_v22 = vld [vmem:[%s1848_s19 + $0x10] sm:$0xff]  }
  0x19   : > { %1493 = vmatpush3.bf16.msra.mxu0 %v1694_v6  ;;  %v1703_v15 = vld [vmem:[%s1848_s19 + $0xa0] sm:$0xff]   ;;  %v1707_v19 = vld [vmem:[%s1848_s19 + $0x98] sm:$0xff]   ;;  %v1711_v23 = vld [vmem:[%s1848_s19 + $0x90] sm:$0xff]  }
  0x1a   : > { %1557 = vmatpush3.bf16.msra.mxu1 %v1695_v7  ;;  %1494 = vmatprep.subr.bf16.mxu0 %v1696_v8  ;;  %v1712_v24 = vld [vmem:[%s1848_s19 + $0x48] sm:$0xff]   ;;  %v1716_v28 = vld [vmem:[%s1848_s19 + $0x40] sm:$0xff]   ;;  %v1726_v36 = vld [vmem:[%s1848_s19 + $0x118] sm:$0xff]  }
  0x1b   : > { %1558 = vmatprep.subr.bf16.mxu1 %v1697_v9  ;;  %v1713_v25 = vld [vmem:[%s1848_s19 + $0xc8] sm:$0xff]   ;;  %v1717_v29 = vld [vmem:[%s1848_s19 + $0xc0] sm:$0xff]   ;;  %v1739_v42 = vld [vmem:[%s1848_s19 + $0x110] sm:$0xff]  }
  0x1c   : > { %v1714_v26 = vld [vmem:[%s1848_s19 + $0x8] sm:$0xff]   ;;  %v1718_v30 = vld [vmem:[%s1848_s19] sm:$0xff]   ;;  %v1735_v43 = vld [vmem:[%s1884_s23 + $0x5c] ss:$20 sps:$4 sm:$0xff]  }
  0x1d   : > { %1495 = vmatpush3.bf16.msra.mxu0 %v1698_v10  ;;  %v1715_v27 = vld [vmem:[%s1848_s19 + $0x88] sm:$0xff]   ;;  %v1719_v31 = vld [vmem:[%s1848_s19 + $0x80] sm:$0xff]   ;;  %v1740_v47 = vld [vmem:[%s1884_s23 + $0x7c] ss:$20 sps:$4 sm:$0xff]  }
  0x1e   : > { %1559 = vmatpush3.bf16.msra.mxu1 %v1699_v11  ;;  %1496 = vmatprep.subr.bf16.mxu0 %v1700_v12  ;;  %v1720_v32 = vld [vmem:[%s1884_s23] ss:$20 sps:$4 sm:$0xff]   ;;  %v1722_v33 = vld [vmem:[%s1884_s23 + $0x4] ss:$20 sps:$4 sm:$0xff]   ;;  %v1723_v34 = vld [vmem:[%s1884_s23 + $0x8] ss:$20 sps:$4 sm:$0xff]  }
  0x1f   : > { %1560 = vmatprep.subr.bf16.mxu1 %v1701_v13  ;;  %v1725_v35 = vld [vmem:[%s1884_s23 + $0xc] ss:$20 sps:$4 sm:$0xff]   ;;  %848 = vmatprep.mubr.bf16.mxu0 %v1722_v33  ;;  %v1729_v38 = vld [vmem:[%s1884_s23 + $0x34] ss:$20 sps:$4 sm:$0xff]   ;;  %v1732_v40 = vld [vmem:[%s1884_s23 + $0x30] ss:$20 sps:$4 sm:$0xff]  }
  0x20   : > { %945 = vmatprep.mubr.bf16.mxu1 %v1725_v35  ;;  %v1727_v37 = vld [vmem:[%s1884_s23 + $0x2c] ss:$20 sps:$4 sm:$0xff]   ;;  %v1731_v39 = vld [vmem:[%s1884_s23 + $0x28] ss:$20 sps:$4 sm:$0xff]   ;;  %v1737_v44 = vld [vmem:[%s1884_s23 + $0x50] ss:$20 sps:$4 sm:$0xff]  }
  0x21   : > { %1497 = vmatpush3.bf16.msra.mxu0 %v1702_v14  ;;  %v1733_v41 = vld [vmem:[%s1884_s23 + $0x54] ss:$20 sps:$4 sm:$0xff]   ;;  %v1738_v45 = vld [vmem:[%s1884_s23 + $0x58] ss:$20 sps:$4 sm:$0xff]   ;;  %v1765_v49 = vld [vmem:[%s1848_s19 + $0x100] sm:$0xff]  }
  0x22   : > { %1561 = vmatpush3.bf16.msra.mxu1 %v1703_v15  ;;  %1498 = vmatprep.subr.bf16.mxu0 %v1704_v16  ;;  %v1752_v46 = vld [vmem:[%s1848_s19 + $0x108] sm:$0xff]   ;;  %v1742_v48 = vld [vmem:[%s1884_s23 + $0x84] ss:$20 sps:$4 sm:$0xff]   ;;  %v1745_v51 = vld [vmem:[%s1884_s23 + $0x80] ss:$20 sps:$4 sm:$0xff]  }
  0x23   : > { %1562 = vmatprep.subr.bf16.mxu1 %v1705_v17  ;;  %v1744_v50 = vld [vmem:[%s1884_s23 + $0x78] ss:$20 sps:$4 sm:$0xff]   ;;  %v1750_v54 = vld [vmem:[%s1884_s23 + $0xa0] ss:$20 sps:$4 sm:$0xff]   ;;  %v1751_v55 = vld [vmem:[%s1884_s23 + $0xa8] ss:$20 sps:$4 sm:$0xff]  }
  0x24   : > { %v1746_v52 = vld [vmem:[%s1884_s23 + $0xa4] ss:$20 sps:$4 sm:$0xff]   ;;  %v1748_v53 = vld [vmem:[%s1884_s23 + $0xac] ss:$20 sps:$4 sm:$0xff]   ;;  %v1755_v57 = vld [vmem:[%s1884_s23 + $0xd4] ss:$20 sps:$4 sm:$0xff]  }
  0x25   : > { %1499 = vmatpush3.bf16.msra.mxu0 %v1706_v18  ;;  %v1753_v56 = vld [vmem:[%s1884_s23 + $0xcc] ss:$20 sps:$4 sm:$0xff]   ;;  %v1757_v58 = vld [vmem:[%s1884_s23 + $0xc8] ss:$20 sps:$4 sm:$0xff]   ;;  %v1758_v59 = vld [vmem:[%s1884_s23 + $0xd0] ss:$20 sps:$4 sm:$0xff]  }
  0x26   : > { %1563 = vmatpush3.bf16.msra.mxu1 %v1707_v19  ;;  %1500 = vmatprep.subr.bf16.mxu0 %v1708_v20  ;;  %v1759_v60 = vld [vmem:[%s1884_s23 + $0xf4] ss:$20 sps:$4 sm:$0xff]   ;;  %v1761_v61 = vld [vmem:[%s1884_s23 + $0xfc] ss:$20 sps:$4 sm:$0xff]   ;;  %v1764_v63 = vld [vmem:[%s1884_s23 + $0xf8] ss:$20 sps:$4 sm:$0xff]  }
  0x27   : > { %1564 = vmatprep.subr.bf16.mxu1 %v1709_v21  ;;  %v1763_v62 = vld [vmem:[%s1884_s23 + $0xf0] ss:$20 sps:$4 sm:$0xff]   ;;  %v1770_v2 = vld [vmem:[%s1884_s23 + $0x118] ss:$20 sps:$4 sm:$0xff]   ;;  %v1771_v3 = vld [vmem:[%s1884_s23 + $0x120] ss:$20 sps:$4 sm:$0xff]  }
  0x28   : > { %v1766_v0 = vld [vmem:[%s1884_s23 + $0x11c] ss:$20 sps:$4 sm:$0xff]   ;;  %v1768_v1 = vld [vmem:[%s1884_s23 + $0x124] ss:$20 sps:$4 sm:$0xff]   ;;  %v1776_v8 = vld [vmem:[%s1884_s23 + $0x60] ss:$20 sps:$4 sm:$0xff]  }
  0x29   : > { %1501 = vmatpush3.bf16.msra.mxu0 %v1710_v22  ;;  %v1772_v4 = vld [vmem:[%s1884_s23 + $0x10] ss:$20 sps:$4 sm:$0xff]   ;;  %v1774_v6 = vld [vmem:[%s1884_s23 + $0x38] ss:$20 sps:$4 sm:$0xff]   ;;  %v1777_v9 = vld [vmem:[%s1884_s23 + $0x100] ss:$20 sps:$4 sm:$0xff]  }
  0x2a   : > { %1565 = vmatpush3.bf16.msra.mxu1 %v1711_v23  ;;  %1502 = vmatprep.subr.bf16.mxu0 %v1712_v24  ;;  %v1773_v5 = vld [vmem:[%s1884_s23 + $0xb0] ss:$20 sps:$4 sm:$0xff]   ;;  %v1775_v7 = vld [vmem:[%s1884_s23 + $0xd8] ss:$20 sps:$4 sm:$0xff]   ;;  %v1778_v10 = vld [vmem:[%s1884_s23 + $0x88] ss:$20 sps:$4 sm:$0xff]  }
  0x2b   : > { %1566 = vmatprep.subr.bf16.mxu1 %v1713_v25  ;;  %v1779_v11 = vld [vmem:[%s1884_s23 + $0x128] ss:$20 sps:$4 sm:$0xff]   ;;  %v1944_v14 = vld [vmem:[%s236_s26] ss:$0 sm:$0xff] }
  0x2d   : > { %1503 = vmatpush3.bf16.msra.mxu0 %v1714_v26 }
  0x2e   : > { %1567 = vmatpush3.bf16.msra.mxu1 %v1715_v27  ;;  %1504 = vmatprep.subr.bf16.mxu0 %v1716_v28 }
  0x2f   : > { %1568 = vmatprep.subr.bf16.mxu1 %v1717_v29 }
  0x31   : > { %1505 = vmatpush3.bf16.msra.mxu0 %v1718_v30 }
  0x32   : > { %1569 = vmatpush3.bf16.msra.mxu1 %v1719_v31  ;;  %1630 = vmatprep.subr.bf16.mxu0 %v1726_v36 }
  0x33   : > { %1654 = vmatprep.subr.bf16.mxu1 %v1726_v36 }
  0x34   : > { %849 = vmatmul.mubr.bf16.vlgmr.msra.gmra.mxu0 %v1720_v32 }
  0x35   : > { %946 = vmatmul.mubr.bf16.vlgmr.msra.gmra.mxu1 %v1723_v34  ;;  %1631 = vmatpush3.bf16.msra.mxu0 %v1726_v36 }
  0x36   : > { %1658 = vmatpush3.bf16.msra.mxu1 %v1726_v36  ;;  %856 = vmatprep.mubr.bf16.mxu0 %v1727_v37 }
  0x37   : > { %953 = vmatprep.mubr.bf16.mxu1 %v1729_v38  ;;  %1632 = vmatprep.subr.bf16.mxu0 %v1739_v42 }
  0x38   : > { %1655 = vmatprep.subr.bf16.mxu1 %v1739_v42 }
  0x39   : > { %1633 = vmatpush3.bf16.msra.mxu0 %v1739_v42 }
  0x3a   : > { %1659 = vmatpush3.bf16.msra.mxu1 %v1739_v42  ;;  %1634 = vmatprep.subr.bf16.mxu0 %v1752_v46 }
  0x3b   : > { %1656 = vmatprep.subr.bf16.mxu1 %v1752_v46 }
  0x3c   : > { %857 = vmatmul.mubr.bf16.gmra.mxu0 %v1731_v39 }
  0x3d   : > { %954 = vmatmul.mubr.bf16.gmra.mxu1 %v1732_v40  ;;  %864 = vmatprep.mubr.bf16.mxu0 %v1733_v41 }
  0x3e   : > { %961 = vmatprep.mubr.bf16.mxu1 %v1735_v43  ;;  %1635 = vmatpush3.bf16.msra.mxu0 %v1752_v46 }
  0x3f   : > { %1660 = vmatpush3.bf16.msra.mxu1 %v1752_v46  ;;  %1636 = vmatprep.subr.bf16.mxu0 %v1765_v49 }
  0x40   : > { %1657 = vmatprep.subr.bf16.mxu1 %v1765_v49 }
  0x42   : > { %1637 = vmatpush3.bf16.msra.mxu0 %v1765_v49 }
  0x43   : > { %1661 = vmatpush3.bf16.msra.mxu1 %v1765_v49 }
  0x44   : > { %865 = vmatmul.mubr.bf16.gmra.mxu0 %v1737_v44 }
  0x45   : > { %962 = vmatmul.mubr.bf16.gmra.mxu1 %v1738_v45  ;;  %872 = vmatprep.mubr.bf16.mxu0 %v1740_v47 }
  0x46   : > { %969 = vmatprep.mubr.bf16.mxu1 %v1742_v48 }
  0x4c   : > { %873 = vmatmul.mubr.bf16.gmra.mxu0 %v1744_v50 }
  0x4d   : > { %970 = vmatmul.mubr.bf16.gmra.mxu1 %v1745_v51  ;;  %880 = vmatprep.mubr.bf16.mxu0 %v1746_v52 }
  0x4e   : > { %977 = vmatprep.mubr.bf16.mxu1 %v1748_v53 }
  0x54   : > { %881 = vmatmul.mubr.bf16.gmra.mxu0 %v1750_v54 }
  0x55   : > { %978 = vmatmul.mubr.bf16.gmra.mxu1 %v1751_v55  ;;  %888 = vmatprep.mubr.bf16.mxu0 %v1753_v56 }
  0x56   : > { %985 = vmatprep.mubr.bf16.mxu1 %v1755_v57 }
  0x5c   : > { %889 = vmatmul.mubr.bf16.gmra.mxu0 %v1757_v58 }
  0x5d   : > { %986 = vmatmul.mubr.bf16.gmra.mxu1 %v1758_v59  ;;  %896 = vmatprep.mubr.bf16.mxu0 %v1759_v60 }
  0x5e   : > { %993 = vmatprep.mubr.bf16.mxu1 %v1761_v61 }
  0x64   : > { %897 = vmatmul.mubr.bf16.gmra.mxu0 %v1763_v62 }
  0x65   : > { %994 = vmatmul.mubr.bf16.gmra.mxu1 %v1764_v63  ;;  %904 = vmatprep.mubr.bf16.mxu0 %v1766_v0 }
  0x66   : > { %1001 = vmatprep.mubr.bf16.mxu1 %v1768_v1 }
  0x6c   : > { %905 = vmatmul.mubr.bf16.gmra.mxu0 %v1770_v2 }
  0x6d   : > { %1002 = vmatmul.mubr.bf16.gmra.mxu1 %v1771_v3  ;;  %1638 = vmatprep.mubr.msk.bf16.mxu0 %vm791_vm0, %v1772_v4 }
  0x6e   : > { %1646 = vmatprep.mubr.msk.bf16.mxu1 %vm791_vm0, %v1773_v5 }
  0x74   : > { %1639 = vmatmul.mubr.msk.bf16.vlgmr.msra.gmra.mxu0 %vm791_vm0, %v1774_v6 }
  0x75   : > { %1647 = vmatmul.mubr.msk.bf16.vlgmr.msra.gmra.mxu1 %vm791_vm0, %v1775_v7  ;;  %1642 = vmatprep.mubr.msk.bf16.mxu0 %vm791_vm0, %v1776_v8 }
  0x76   : > { %1650 = vmatprep.mubr.msk.bf16.mxu1 %vm791_vm0, %v1777_v9 }
  0x7c   : > { %1643 = vmatmul.mubr.msk.bf16.gmra.mxu0 %vm791_vm0, %v1778_v10 }
  0x7d   : > { %1651 = vmatmul.mubr.msk.bf16.gmra.mxu1 %vm791_vm0, %v1779_v11 }
  0xf4   : > { %v1506_v12 = vpop.f32.mrf.mxu0 }
  0xf5   : > { %v1570_v13 = vpop.f32.mrf.mxu1 }
  0xf6   : > { %v1507_v15 = vpop.f32.mrf.mxu0 }
  0xf7   : > { %v1508_v16 = vadd.f32 %v1507_v15, %v1506_v12  ;;  %v1571_v17 = vpop.f32.mrf.mxu1 }
  0xf8   : > { %v1509_v18 = vpop.f32.mrf.mxu0  ;;  %v1572_v20 = vadd.f32 %v1571_v17, %v1570_v13 }
  0xf9   : > { %v851_v19 = vadd.f32 %v1508_v16, %v1944_v14  ;;  %v1947_v21 = vpop.f32.mrf.mxu1 }
  0xfa   : > { %v1510_v22 = vpop.f32.mrf.mxu0 }
  0xfb   : > { %v1949_v23 = vpop.f32.mrf.mxu1  ;;  %v1951_v24 = vadd.f32 %v1572_v20, %v851_v19  ;;  %v1511_v6 = vadd.f32 %v1510_v22, %v1509_v18 }
  0xfc   : > { %v1512_v25 = vpop.f32.mrf.mxu0 }
  0xfd   : > { %2043 = vst [vmem:[#allocation2_spill] sm:$0xff] %v1951_v24  ;;  %v1576_v26 = vpop.f32.mrf.mxu1  ;;  %v854_v15 = vadd.f32 %v1511_v6, %v1944_v14 }
  0xfe   : > { %v1513_v27 = vpop.f32.mrf.mxu0 }
  0xff   : > { %v1577_v28 = vpop.f32.mrf.mxu1  ;;  %v1514_v8 = vadd.f32 %v1513_v27, %v1512_v25  ;;  %v1575_v25 = vadd.f32 %v1949_v23, %v1947_v21 }
 0x100   : > { %v1515_v29 = vpop.f32.mrf.mxu0  ;;  %v1578_v27 = vadd.f32 %v1577_v28, %v1576_v26 }
 0x101   : > { %v1579_v30 = vpop.f32.mrf.mxu1  ;;  %v859_v19 = vadd.f32 %v1514_v8, %v1944_v14 }
 0x102   : > { %v1516_v31 = vpop.f32.mrf.mxu0 }
 0x103   : > { %v1580_v32 = vpop.f32.mrf.mxu1  ;;  %v1517_v9 = vadd.f32 %v1516_v31, %v1515_v29 }
 0x104   : > { %v1518_v33 = vpop.f32.mrf.mxu0  ;;  %v1581_v29 = vadd.f32 %v1580_v32, %v1579_v30 }
 0x105   : > { %v1582_v34 = vpop.f32.mrf.mxu1  ;;  %v862_v20 = vadd.f32 %v1517_v9, %v1944_v14  ;;  %v951_v9 = vadd.f32 %v1575_v25, %v854_v15 }
 0x106   : > { %v1519_v35 = vpop.f32.mrf.mxu0 }
 0x107   : > { %v1583_v36 = vpop.f32.mrf.mxu1  ;;  %v1520_v10 = vadd.f32 %v1519_v35, %v1518_v33  ;;  %v959_v24 = vadd.f32 %v1581_v29, %v862_v20 }
 0x108   : > { %v1521_v37 = vpop.f32.mrf.mxu0  ;;  %v1584_v35 = vadd.f32 %v1583_v36, %v1582_v34 }
 0x109   : > { %v1953_v38 = vpop.f32.mrf.mxu1  ;;  %v867_v18 = vadd.f32 %v1520_v10, %v1944_v14  ;;  %v956_v10 = vadd.f32 %v1578_v27, %v859_v19 }
 0x10a   : > { %v1522_v39 = vpop.f32.mrf.mxu0 }
 0x10b   : > { %v1955_v40 = vpop.f32.mrf.mxu1  ;;  %v1523_v6 = vadd.f32 %v1522_v39, %v1521_v37  ;;  %v1985_v21 = vadd.f32 %v1584_v35, %v867_v18 }
 0x10c   : > { %v1524_v41 = vpop.f32.mrf.mxu0  ;;  %v1989_v23 = vadd.f32 %v1955_v40, %v1953_v38 }
 0x10d   : > { %v1957_v42 = vpop.f32.mrf.mxu1  ;;  %v1994_v34 = vadd.f32 %v1523_v6, %v1944_v14 }
 0x10e   : > { %v1525_v43 = vpop.f32.mrf.mxu0 }
 0x10f   : > { %v1589_v44 = vpop.f32.mrf.mxu1  ;;  %v1526_v16 = vadd.f32 %v1525_v43, %v1524_v41 }
 0x110   : > { %v1527_v45 = vpop.f32.mrf.mxu0  ;;  %v1590_v26 = vadd.f32 %v1589_v44, %v1957_v42 }
 0x111   : > { %v1959_v46 = vpop.f32.mrf.mxu1  ;;  %v875_v8 = vadd.f32 %v1526_v16, %v1944_v14 }
 0x112   : > { %v1528_v47 = vpop.f32.mrf.mxu0 }
 0x113   : > { %v1961_v48 = vpop.f32.mrf.mxu1  ;;  %v1529_v28 = vadd.f32 %v1528_v47, %v1527_v45 }
 0x114   : > { %v1530_v49 = vpop.f32.mrf.mxu0 }
 0x115   : > { %v1963_v50 = vpop.f32.mrf.mxu1 }
 0x116   : > { %v1531_v51 = vpop.f32.mrf.mxu0 }
 0x117   : > { %v1595_v52 = vpop.f32.mrf.mxu1  ;;  %v1532_v31 = vadd.f32 %v1531_v51, %v1530_v49 }
 0x118   : > { %v1533_v53 = vpop.f32.mrf.mxu0  ;;  %v1596_v51 = vadd.f32 %v1595_v52, %v1963_v50 }
 0x119   : > { %v1597_v54 = vpop.f32.mrf.mxu1  ;;  %v883_v30 = vadd.f32 %v1532_v31, %v1944_v14 }
 0x11a   : > { %v1534_v55 = vpop.f32.mrf.mxu0 }
 0x11b   : > { %v1598_v56 = vpop.f32.mrf.mxu1  ;;  %v1535_v41 = vadd.f32 %v1534_v55, %v1533_v53  ;;  %v972_v55 = vadd.f32 %v1590_v26, %v875_v8  ;;  %v980_v15 = vadd.f32 %v1596_v51, %v883_v30 }
 0x11c   : > { %v1536_v57 = vpop.f32.mrf.mxu0  ;;  %v1599_v53 = vadd.f32 %v1598_v56, %v1597_v54 }
 0x11d   : > { %v1600_v58 = vpop.f32.mrf.mxu1  ;;  %v886_v36 = vadd.f32 %v1535_v41, %v1944_v14 }
 0x11e   : > { %v1537_v59 = vpop.f32.mrf.mxu0 }
 0x11f   : > { %v1601_v60 = vpop.f32.mrf.mxu1  ;;  %v1538_v22 = vadd.f32 %v1537_v59, %v1536_v57  ;;  %v983_v56 = vadd.f32 %v1599_v53, %v886_v36 }
 0x120   : > { %v1539_v61 = vpop.f32.mrf.mxu0  ;;  %v1602_v37 = vadd.f32 %v1601_v60, %v1600_v58  ;;  %v1593_v58 = vadd.f32 %v1961_v48, %v1959_v46 }
 0x121   : > { %v1603_v62 = vpop.f32.mrf.mxu1  ;;  %v891_v57 = vadd.f32 %v1538_v22, %v1944_v14 }
 0x122   : > { %v1540_v63 = vpop.f32.mrf.mxu0 }
 0x123   : > { %v1604_v0 = vpop.f32.mrf.mxu1  ;;  %v1541_v43 = vadd.f32 %v1540_v63, %v1539_v61  ;;  %v988_v47 = vadd.f32 %v1602_v37, %v891_v57  ;;  %v878_v63 = vadd.f32 %v1529_v28, %v1944_v14 }
 0x124   : > { %v1542_v1 = vpop.f32.mrf.mxu0  ;;  %v1605_v42 = vadd.f32 %v1604_v0, %v1603_v62 }
 0x125   : > { %v1965_v2 = vpop.f32.mrf.mxu1  ;;  %v894_v39 = vadd.f32 %v1541_v43, %v1944_v14  ;;  %v975_v37 = vadd.f32 %v1593_v58, %v878_v63 }
 0x126   : > { %v1543_v3 = vpop.f32.mrf.mxu0 }
 0x127   : > { %v1967_v4 = vpop.f32.mrf.mxu1  ;;  %v1544_v44 = vadd.f32 %v1543_v3, %v1542_v1  ;;  %v991_v54 = vadd.f32 %v1605_v42, %v894_v39  ;;  %v2047_v1 = vld [vmem:[#allocation2_spill] sm:$0xff] }
 0x128   : > { %v1545_v5 = vpop.f32.mrf.mxu0  ;;  %v1608_v62 = vadd.f32 %v1967_v4, %v1965_v2 }
 0x129   : > { %v1969_v7 = vpop.f32.mrf.mxu1  ;;  %v899_v46 = vadd.f32 %v1544_v44, %v1944_v14 }
 0x12a   : > { %2044 = vst [vmem:[#allocation3_spill] sm:$0xff] %v1969_v7  ;;  %v1546_v11 = vpop.f32.mrf.mxu0 }
 0x12b   : > { %v1971_v12 = vpop.f32.mrf.mxu1  ;;  %v1547_v45 = vadd.f32 %v1546_v11, %v1545_v5  ;;  %v996_v30 = vadd.f32 %v1608_v62, %v899_v46 }
 0x12c   : > { %2045 = vst [vmem:[#allocation4_spill] sm:$0xff] %v1971_v12  ;;  %v1548_v13 = vpop.f32.mrf.mxu0 }
 0x12d   : > { %v1974_v17 = vpop.f32.mrf.mxu1  ;;  %v902_v48 = vadd.f32 %v1547_v45, %v1944_v14  ;;  %v967_v45 = vadd.f32 %v1989_v23, %v1994_v34 }
 0x12e   : > { %2046 = vst [vmem:[#allocation5_spill] sm:$0xff] %v1974_v17  ;;  %v1549_v7 = vpop.f32.mrf.mxu0 }
 0x12f   : > { %v1613_v33 = vpop.f32.mrf.mxu1  ;;  %v1550_v38 = vadd.f32 %v1549_v7, %v1548_v13 }
 0x130   : > { %v1551_v12 = vpop.f32.mrf.mxu0 }
 0x131   : > { %v1982_v17 = vpop.f32.mrf.mxu1  ;;  %v907_v0 = vadd.f32 %v1550_v38, %v1944_v14  ;;  %v2049_v39 = vld [vmem:[#allocation3_spill] sm:$0xff] }
 0x132   : > { %v1552_v59 = vpop.f32.mrf.mxu0 }
 0x133   : > { %v1616_v32 = vpop.f32.mrf.mxu1  ;;  %v1553_v19 = vadd.f32 %v1552_v59, %v1551_v12 }
 0x134   : > { %v1640_v49 = vpop.f32.mrf.mxu0 }
 0x135   : > { %v1648_v40 = vpop.f32.mrf.mxu1  ;;  %v1053_v60 = vadd.f32 %v1640_v49, %v956_v10  ;;  %v2048_v20 = vld [vmem:[#allocation5_spill] sm:$0xff]  ;;  %v910_v4 = vadd.f32 %v1553_v19, %v1944_v14  ;;  %v2050_v49 = vld [vmem:[#allocation4_spill] sm:$0xff] }
 0x136   : > { %v1044_v61 = vpop.f32.mrf.mxu0  ;;  %v1085_v50 = vadd.f32 %v1648_v40, %v988_v47  ;;  %v1614_v18 = vadd.f32 %v1613_v33, %v2048_v20  ;;  %v1611_v51 = vadd.f32 %v2050_v49, %v2049_v39 }
 0x137   : > { %v1076_v16 = vpop.f32.mrf.mxu1  ;;  %v1045_v3 = vadd.f32 %v1044_v61, %v2047_v1  ;;  %v1109_v22 = vmax.f32 %v1053_v60, 0.0 }
 0x138   : > { %v1641_v52 = vpop.f32.mrf.mxu0  ;;  %v1077_v11 = vadd.f32 %v1076_v16, %v980_v15  ;;  %v1117_v29 = vmax.f32 %v1085_v50, 0.0  ;;  %v1004_v43 = vadd.f32 %v1614_v18, %v907_v0  ;;  %v999_v63 = vadd.f32 %v1611_v51, %v902_v48 }
 0x139   : > { %v1056_v5 = vadd.f32 %v1641_v52, %v959_v24  ;;  %v1649_v7 = vpop.f32.mrf.mxu1  ;;  %v1107_v6 = vmax.f32 %v1045_v3, 0.0 }
 0x13a   : > { %v1088_v12 = vadd.f32 %v1649_v7, %v991_v54  ;;  %v1047_v13 = vpop.f32.mrf.mxu0  ;;  %v1115_v57 = vmax.f32 %v1077_v11, 0.0 }
 0x13b   : > { %v1110_v25 = vmax.f32 %v1056_v5, 0.0  ;;  %v1048_v27 = vadd.f32 %v1047_v13, %v951_v9  ;;  %v1079_v2 = vpop.f32.mrf.mxu1  ;;  %v1617_v9 = vadd.f32 %v1616_v32, %v1982_v17 }
 0x13c   : > { %v1118_v24 = vmax.f32 %v1088_v12, 0.0  ;;  %v1080_v31 = vadd.f32 %v1079_v2, %v983_v56  ;;  %v1644_v35 = vpop.f32.mrf.mxu0 }
 0x13d   : > { %v1451_v41 = vpack.c.bf16 %v1110_v25, %v1109_v22  ;;  %v1108_v33 = vmax.f32 %v1048_v27, 0.0  ;;  %v1652_v8 = vpop.f32.mrf.mxu1  ;;  %v1069_v28 = vadd.f32 %v1644_v35, %v972_v55  ;;  %v1007_v17 = vadd.f32 %v1617_v9, %v910_v4 }
 0x13e   : > { %v1471_v14 = vpack.c.bf16 %v1118_v24, %v1117_v29  ;;  %v1116_v59 = vmax.f32 %v1080_v31, 0.0  ;;  %v1060_v10 = vpop.f32.mrf.mxu0  ;;  %v1101_v38 = vadd.f32 %v1652_v8, %v1004_v43 }
 0x13f   : > { %1483 = vst [vmem:[%s2014_s30 + $0x8] sm:$0xff] %v1451_v41   ;;  %v1446_v26 = vpack.c.bf16 %v1108_v33, %v1107_v6  ;;  %v1092_v36 = vpop.f32.mrf.mxu1  ;;  %v1061_v32 = vadd.f32 %v1060_v10, %v1985_v21  ;;  %v1113_v58 = vmax.f32 %v1069_v28, 0.0 }
 0x140   : > { %1487 = vst [vmem:[%s2014_s30 + $0x28] sm:$0xff] %v1471_v14   ;;  %v1466_v53 = vpack.c.bf16 %v1116_v59, %v1115_v57  ;;  %v1645_v40 = vpop.f32.mrf.mxu0  ;;  %v1093_v55 = vadd.f32 %v1092_v36, %v996_v30  ;;  %v1121_v19 = vmax.f32 %v1101_v38, 0.0 }
 0x141   : > { %1447 = vst [vmem:[%s2014_s30] sm:$0xff] %v1446_v26   ;;  %v1072_v42 = vadd.f32 %v1645_v40, %v975_v37  ;;  %v1653_v44 = vpop.f32.mrf.mxu1  ;;  %v1111_v52 = vmax.f32 %v1061_v32, 0.0 }
 0x142   : > { %1486 = vst [vmem:[%s2014_s30 + $0x20] sm:$0xff] %v1466_v53   ;;  %v1104_v47 = vadd.f32 %v1653_v44, %v1007_v17  ;;  %v1063_v61 = vpop.f32.mrf.mxu0  ;;  %v1119_v23 = vmax.f32 %v1093_v55, 0.0 }
 0x143   : > { %v1114_v60 = vmax.f32 %v1072_v42, 0.0  ;;  %v1064_v15 = vadd.f32 %v1063_v61, %v967_v45  ;;  %v1095_v16 = vpop.f32.mrf.mxu1 }
 0x144   : > { %v1122_v21 = vmax.f32 %v1104_v47, 0.0  ;;  %v1096_v50 = vadd.f32 %v1095_v16, %v999_v63 }
 0x145   : > { %v1461_v54 = vpack.c.bf16 %v1114_v60, %v1113_v58  ;;  %v1112_v56 = vmax.f32 %v1064_v15, 0.0 }
 0x146   : > { %v1481_v34 = vpack.c.bf16 %v1122_v21, %v1121_v19  ;;  %v1120_v62 = vmax.f32 %v1096_v50, 0.0 }
 0x147   : > { %1485 = vst [vmem:[%s2014_s30 + $0x18] sm:$0xff] %v1461_v54   ;;  %v1456_v0 = vpack.c.bf16 %v1112_v56, %v1111_v52 }
 0x148   : > { %1489 = vst [vmem:[%s2014_s30 + $0x38] sm:$0xff] %v1481_v34   ;;  %v1476_v1 = vpack.c.bf16 %v1120_v62, %v1119_v23 }
 0x149   : > { %1484 = vst [vmem:[%s2014_s30 + $0x10] sm:$0xff] %v1456_v0  }
 0x14a   : > { %1488 = vst [vmem:[%s2014_s30 + $0x30] sm:$0xff] %v1476_v1  }
 0x14b PF: > { %s13_s14 = sadd.s32 1, %s1802_s14   ;;  %s2051_s12 = smov %s1798_s13 }
 0x14c   : > { %p10_p5 = scmp.ge.s32.totalorder %s13_s14, 4   ;;  %s2052_s13 = smov %s2054_s15 }
 0x14e   :  { %12 = sbr.rel (!%p10_p5) target bundleno = 2 (0x2), region = 68 }

// kernel: classifier_forward.7
= control target key start
LH: loop header
LB: loop body
LE: loop exit
PB: predicated region body
PF: predicated region fallthrough
CT: control target
= control target key end

     0   :  { %s1755_s12 = smov 0   ;;  %s1757_s13 = smov 0   ;;  %s1894_s0 = inlined_call_operand.vmem [shape: bf16[2,32,1152], index: 0, kind: input, shape index: {}]   ;;  %s1895_s1 = inlined_call_operand.vmem [shape: bf16[2,1152,128], index: 1, kind: input, shape index: {}]   ;;  %s1896_s2 = inlined_call_operand.vmem [shape: f32[2,1,128], index: 2, kind: input, shape index: {}]   ;;  %s1897_s3 = inlined_call_operand.vmem [shape: bf16[2,32,128], index: 3, kind: output, shape index: {}]  }
   0x1   :  { %s1759_s14 = smov 0  }
   0x2 LB: > { %s25_s15 = sadd.s32 1, %s1729_s13  ;;  %p1327_p0 = scmp.ge.s32.totalorder %s1733_s14, 1  ;;  %s1733_s14 = sphi %s1759_s14, %s13_s14   ;;  %s1729_s13 = sphi %s1757_s13, %s1899_s13   ;;  %s1725_s12 = sphi %s1755_s12, %s1898_s12  }
   0x3   : > { %p27_p1 = scmp.ge.s32.totalorder %s25_s15, 2  ;;  %p177_p2 = scmp.lt.s32.totalorder %s1733_s14, 3 }
   0x5   : > { %s1901_s15 = smov (%p27_p1, %s25_s15), 0  ;;  %p178_p3 = pnand %p1327_p0, %p177_p2 }
   0x6   : > { %p219_p4 = scmp.lt.s32.totalorder (!%p178_p3), %s1725_s12, 1 }
   0x7   : > { %181 = sbr.rel (%p178_p3) target bundleno = 319 (0x13f), region = 32 }
   0xc   : > { %s1903_s12 = smov (!%p219_p4, %s1725_s12), 1 }
   0xd   : > { %s1588_s16 = smul.u32 576, %s1903_s12  ;;  %s236_s26 = scalar_lea.vmem %s1896_s2, %s1903_s12 }
   0xe   : > { %s1587_s20 = smul.u32 144, %s1903_s12  ;;  %s1429_s27 = sshll.u32 %s1903_s12, 4 }
   0xf   : > { %s1779_s19 = scalar_lea.vmem %s1895_s1, %s1588_s16  ;;  %s245_s30 = scalar_lea.vmem %s1897_s3, %s1429_s27 }
  0x10   : > { %v1613_v0 = vld [vmem:[%s1779_s19 + $0x78] sm:$0xff]   ;;  %v1617_v4 = vld [vmem:[%s1779_s19 + $0x70] sm:$0xff]   ;;  %v1621_v8 = vld [vmem:[%s1779_s19 + $0x68] sm:$0xff]   ;;  %s1814_s23 = scalar_lea.vmem %s1894_s0, %s1587_s20 }
  0x11   : > { %v1614_v1 = vld [vmem:[%s1779_s19 + $0x38] sm:$0xff]   ;;  %1445 = vmatprep.subr.bf16.mxu0 %v1613_v0  ;;  %v1618_v5 = vld [vmem:[%s1779_s19 + $0x30] sm:$0xff]   ;;  %v1622_v9 = vld [vmem:[%s1779_s19 + $0x28] sm:$0xff]  }
  0x12   : > { %v1615_v2 = vld [vmem:[%s1779_s19 + $0xf8] sm:$0xff]   ;;  %1446 = vmatpush3.bf16.msra.mxu0 %v1614_v1  ;;  %v1619_v6 = vld [vmem:[%s1779_s19 + $0xf0] sm:$0xff]   ;;  %v1623_v10 = vld [vmem:[%s1779_s19 + $0xe8] sm:$0xff]  }
  0x13   : > { %v1616_v3 = vld [vmem:[%s1779_s19 + $0xb8] sm:$0xff]   ;;  %1473 = vmatprep.subr.bf16.mxu1 %v1615_v2  ;;  %1447 = vmatprep.subr.bf16.mxu0 %v1617_v4  ;;  %v1620_v7 = vld [vmem:[%s1779_s19 + $0xb0] sm:$0xff]   ;;  %v1624_v11 = vld [vmem:[%s1779_s19 + $0xa8] sm:$0xff]  }
  0x14   : > { %1474 = vmatpush3.bf16.msra.mxu1 %v1616_v3  ;;  %v1625_v12 = vld [vmem:[%s1779_s19 + $0x60] sm:$0xff]   ;;  %v1629_v16 = vld [vmem:[%s1779_s19 + $0x58] sm:$0xff]   ;;  %v1633_v20 = vld [vmem:[%s1779_s19 + $0x50] sm:$0xff]  }
  0x15   : > { %1475 = vmatprep.subr.bf16.mxu1 %v1619_v6  ;;  %v1626_v13 = vld [vmem:[%s1779_s19 + $0x20] sm:$0xff]   ;;  %v1630_v17 = vld [vmem:[%s1779_s19 + $0x18] sm:$0xff]   ;;  %v1634_v21 = vld [vmem:[%s1779_s19 + $0x10] sm:$0xff]  }
  0x16   : > { %1448 = vmatpush3.bf16.msra.mxu0 %v1618_v5  ;;  %v1627_v14 = vld [vmem:[%s1779_s19 + $0xe0] sm:$0xff]   ;;  %v1631_v18 = vld [vmem:[%s1779_s19 + $0xd8] sm:$0xff]   ;;  %v1635_v22 = vld [vmem:[%s1779_s19 + $0xd0] sm:$0xff]  }
  0x17   : > { %1449 = vmatprep.subr.bf16.mxu0 %v1621_v8  ;;  %v1628_v15 = vld [vmem:[%s1779_s19 + $0xa0] sm:$0xff]   ;;  %v1632_v19 = vld [vmem:[%s1779_s19 + $0x98] sm:$0xff]   ;;  %v1636_v23 = vld [vmem:[%s1779_s19 + $0x90] sm:$0xff]  }
  0x18   : > { %1476 = vmatpush3.bf16.msra.mxu1 %v1620_v7  ;;  %v1637_v24 = vld [vmem:[%s1779_s19 + $0x48] sm:$0xff]   ;;  %v1641_v28 = vld [vmem:[%s1779_s19 + $0x40] sm:$0xff]   ;;  %v1648_v34 = vld [vmem:[%s1779_s19 + $0x178] sm:$0xff]  }
  0x19   : > { %1477 = vmatprep.subr.bf16.mxu1 %v1623_v10  ;;  %v1638_v25 = vld [vmem:[%s1779_s19 + $0x8] sm:$0xff]   ;;  %v1642_v29 = vld [vmem:[%s1779_s19] sm:$0xff]   ;;  %v1652_v37 = vld [vmem:[%s1779_s19 + $0x138] sm:$0xff]  }
  0x1a   : > { %1450 = vmatpush3.bf16.msra.mxu0 %v1622_v9  ;;  %v1639_v26 = vld [vmem:[%s1779_s19 + $0xc8] sm:$0xff]   ;;  %v1643_v30 = vld [vmem:[%s1779_s19 + $0xc0] sm:$0xff]   ;;  %v1653_v38 = vld [vmem:[%s1779_s19 + $0x1f8] sm:$0xff]  }
  0x1b   : > { %1451 = vmatprep.subr.bf16.mxu0 %v1625_v12  ;;  %v1640_v27 = vld [vmem:[%s1779_s19 + $0x88] sm:$0xff]   ;;  %v1644_v31 = vld [vmem:[%s1814_s23] ss:$36 sps:$4 sm:$0xff]   ;;  %v1654_v39 = vld [vmem:[%s1779_s19 + $0x1b8] sm:$0xff]  }
  0x1c   : > { %1478 = vmatpush3.bf16.msra.mxu1 %v1624_v11  ;;  %v1646_v32 = vld [vmem:[%s1814_s23 + $0x4] ss:$36 sps:$4 sm:$0xff]   ;;  %v1651_v36 = vld [vmem:[%s1814_s23 + $0xc] ss:$36 sps:$4 sm:$0xff]   ;;  %v1667_v52 = vld [vmem:[%s1779_s19 + $0x158] sm:$0xff]  }
  0x1d   : > { %1479 = vmatprep.subr.bf16.mxu1 %v1627_v14  ;;  %v1647_v33 = vld [vmem:[%s1779_s19 + $0x80] sm:$0xff]   ;;  %975 = vmatprep.mubr.bf16.mxu0 %v1646_v32  ;;  %v1649_v35 = vld [vmem:[%s1814_s23 + $0x8] ss:$36 sps:$4 sm:$0xff]   ;;  %v1655_v40 = vld [vmem:[%s1779_s19 + $0x170] sm:$0xff]  }
  0x1e   : > { %1452 = vmatpush3.bf16.msra.mxu0 %v1626_v13  ;;  %1024 = vmatprep.mubr.bf16.mxu1 %v1651_v36  ;;  %v1656_v41 = vld [vmem:[%s1779_s19 + $0x130] sm:$0xff]   ;;  %v1659_v44 = vld [vmem:[%s1779_s19 + $0x168] sm:$0xff]   ;;  %v1663_v48 = vld [vmem:[%s1779_s19 + $0x160] sm:$0xff]  }
  0x1f   : > { %1453 = vmatprep.subr.bf16.mxu0 %v1629_v16  ;;  %v1657_v42 = vld [vmem:[%s1779_s19 + $0x1f0] sm:$0xff]   ;;  %v1660_v45 = vld [vmem:[%s1779_s19 + $0x128] sm:$0xff]   ;;  %v1664_v49 = vld [vmem:[%s1779_s19 + $0x120] sm:$0xff]  }
  0x20   : > { %1480 = vmatpush3.bf16.msra.mxu1 %v1628_v15  ;;  %v1658_v43 = vld [vmem:[%s1779_s19 + $0x1b0] sm:$0xff]   ;;  %v1661_v46 = vld [vmem:[%s1779_s19 + $0x1e8] sm:$0xff]   ;;  %v1665_v50 = vld [vmem:[%s1779_s19 + $0x1e0] sm:$0xff]  }
  0x21   : > { %1481 = vmatprep.subr.bf16.mxu1 %v1631_v18  ;;  %v1662_v47 = vld [vmem:[%s1779_s19 + $0x1a8] sm:$0xff]   ;;  %v1666_v51 = vld [vmem:[%s1779_s19 + $0x1a0] sm:$0xff]   ;;  %v1668_v53 = vld [vmem:[%s1779_s19 + $0x118] sm:$0xff]  }
  0x22   : > { %1454 = vmatpush3.bf16.msra.mxu0 %v1630_v17  ;;  %v1669_v54 = vld [vmem:[%s1814_s23 + $0x4c] ss:$36 sps:$4 sm:$0xff]   ;;  %v1671_v55 = vld [vmem:[%s1779_s19 + $0x1d8] sm:$0xff]   ;;  %v1685_v4 = vld [vmem:[%s1779_s19 + $0x140] sm:$0xff]  }
  0x23   : > { %1455 = vmatprep.subr.bf16.mxu0 %v1633_v20  ;;  %v1672_v56 = vld [vmem:[%s1814_s23 + $0x48] ss:$36 sps:$4 sm:$0xff]   ;;  %v1673_v57 = vld [vmem:[%s1779_s19 + $0x198] sm:$0xff]   ;;  %v1676_v59 = vld [vmem:[%s1779_s19 + $0x150] sm:$0xff]  }
  0x24   : > { %1482 = vmatpush3.bf16.msra.mxu1 %v1632_v19  ;;  %v1674_v58 = vld [vmem:[%s1814_s23 + $0x54] ss:$36 sps:$4 sm:$0xff]   ;;  %v1681_v0 = vld [vmem:[%s1779_s19 + $0x148] sm:$0xff]   ;;  %v1686_v5 = vld [vmem:[%s1779_s19 + $0x100] sm:$0xff]  }
  0x25   : > { %1483 = vmatprep.subr.bf16.mxu1 %v1635_v22  ;;  %v1677_v60 = vld [vmem:[%s1814_s23 + $0x50] ss:$36 sps:$4 sm:$0xff]   ;;  %v1682_v1 = vld [vmem:[%s1779_s19 + $0x108] sm:$0xff]   ;;  %v1687_v6 = vld [vmem:[%s1779_s19 + $0x1c0] sm:$0xff]  }
  0x26   : > { %1456 = vmatpush3.bf16.msra.mxu0 %v1634_v21  ;;  %v1678_v61 = vld [vmem:[%s1779_s19 + $0x110] sm:$0xff]   ;;  %v1683_v2 = vld [vmem:[%s1779_s19 + $0x1c8] sm:$0xff]   ;;  %v1691_v9 = vld [vmem:[%s1779_s19 + $0x180] sm:$0xff]  }
  0x27   : > { %1457 = vmatprep.subr.bf16.mxu0 %v1637_v24  ;;  %v1679_v62 = vld [vmem:[%s1779_s19 + $0x1d0] sm:$0xff]   ;;  %v1684_v3 = vld [vmem:[%s1779_s19 + $0x188] sm:$0xff]   ;;  %v1692_v10 = vld [vmem:[%s1779_s19 + $0x238] sm:$0xff]  }
  0x28   : > { %1484 = vmatpush3.bf16.msra.mxu1 %v1636_v23  ;;  %v1680_v63 = vld [vmem:[%s1779_s19 + $0x190] sm:$0xff]   ;;  %v1693_v11 = vld [vmem:[%s1814_s23 + $0x18] ss:$36 sps:$4 sm:$0xff]   ;;  %v1700_v16 = vld [vmem:[%s1779_s19 + $0x228] sm:$0xff]  }
  0x29   : > { %1485 = vmatprep.subr.bf16.mxu1 %v1639_v26  ;;  %v1688_v7 = vld [vmem:[%s1814_s23 + $0x10] ss:$36 sps:$4 sm:$0xff]   ;;  %v1695_v12 = vld [vmem:[%s1814_s23 + $0x1c] ss:$36 sps:$4 sm:$0xff]   ;;  %v1701_v17 = vld [vmem:[%s1814_s23 + $0x64] ss:$36 sps:$4 sm:$0xff]  }
  0x2a   : > { %1458 = vmatpush3.bf16.msra.mxu0 %v1638_v25  ;;  %v1690_v8 = vld [vmem:[%s1814_s23 + $0x14] ss:$36 sps:$4 sm:$0xff]   ;;  %v1697_v14 = vld [vmem:[%s1814_s23 + $0x5c] ss:$36 sps:$4 sm:$0xff]   ;;  %v1707_v23 = vld [vmem:[%s1779_s19 + $0x208] sm:$0xff]  }
  0x2b   : > { %1459 = vmatprep.subr.bf16.mxu0 %v1641_v28  ;;  %v1696_v13 = vld [vmem:[%s1779_s19 + $0x230] sm:$0xff]   ;;  %v1699_v15 = vld [vmem:[%s1814_s23 + $0x58] ss:$36 sps:$4 sm:$0xff]   ;;  %v1703_v18 = vld [vmem:[%s1814_s23 + $0x60] ss:$36 sps:$4 sm:$0xff]  }
  0x2c   : > { %1486 = vmatpush3.bf16.msra.mxu1 %v1640_v27  ;;  %v1704_v19 = vld [vmem:[%s1779_s19 + $0x220] sm:$0xff]   ;;  %v1705_v20 = vld [vmem:[%s1779_s19 + $0x218] sm:$0xff]   ;;  %v1706_v22 = vld [vmem:[%s1779_s19 + $0x210] sm:$0xff]  }
  0x2d   : > { %1487 = vmatprep.subr.bf16.mxu1 %v1643_v30  ;;  %v1709_v21 = vld [vmem:[%s1814_s23 + $0x20] ss:$36 sps:$4 sm:$0xff]   ;;  %v1710_v25 = vld [vmem:[%s1814_s23 + $0x68] ss:$36 sps:$4 sm:$0xff]  }
  0x2e   : > { %1460 = vmatpush3.bf16.msra.mxu0 %v1642_v29  ;;  %v1708_v24 = vld [vmem:[%s1779_s19 + $0x200] sm:$0xff]  }
  0x2f   : > { %1501 = vmatprep.subr.bf16.mxu0 %v1648_v34 }
  0x30   : > { %1488 = vmatpush3.bf16.msra.mxu1 %v1647_v33 }
  0x31   : > { %976 = vmatmul.mubr.bf16.vlgmr.msra.gmra.mxu0 %v1644_v31  ;;  %1529 = vmatprep.subr.bf16.mxu1 %v1653_v38 }
  0x32   : > { %1502 = vmatpush3.bf16.msra.mxu0 %v1652_v37  ;;  %983 = vmatprep.mubr.bf16.mxu0 %v1669_v54 }
  0x33   : > { %1025 = vmatmul.mubr.bf16.vlgmr.msra.gmra.mxu1 %v1649_v35  ;;  %1503 = vmatprep.subr.bf16.mxu0 %v1655_v40 }
  0x34   : > { %1530 = vmatpush3.bf16.msra.mxu1 %v1654_v39  ;;  %1032 = vmatprep.mubr.bf16.mxu1 %v1674_v58 }
  0x35   : > { %1531 = vmatprep.subr.bf16.mxu1 %v1657_v42 }
  0x36   : > { %1504 = vmatpush3.bf16.msra.mxu0 %v1656_v41 }
  0x37   : > { %1505 = vmatprep.subr.bf16.mxu0 %v1659_v44 }
  0x38   : > { %1532 = vmatpush3.bf16.msra.mxu1 %v1658_v43 }
  0x39   : > { %1533 = vmatprep.subr.bf16.mxu1 %v1661_v46  ;;  %984 = vmatmul.mubr.bf16.gmra.mxu0 %v1672_v56 }
  0x3a   : > { %1506 = vmatpush3.bf16.msra.mxu0 %v1660_v45  ;;  %1073 = vmatprep.mubr.bf16.mxu0 %v1690_v8 }
  0x3b   : > { %1507 = vmatprep.subr.bf16.mxu0 %v1663_v48  ;;  %1033 = vmatmul.mubr.bf16.gmra.mxu1 %v1677_v60 }
  0x3c   : > { %1534 = vmatpush3.bf16.msra.mxu1 %v1662_v47  ;;  %1122 = vmatprep.mubr.bf16.mxu1 %v1695_v12 }
  0x3d   : > { %1535 = vmatprep.subr.bf16.mxu1 %v1665_v50 }
  0x3e   : > { %1508 = vmatpush3.bf16.msra.mxu0 %v1664_v49 }
  0x3f   : > { %1509 = vmatprep.subr.bf16.mxu0 %v1667_v52 }
  0x40   : > { %1536 = vmatpush3.bf16.msra.mxu1 %v1666_v51 }
  0x41   : > { %1537 = vmatprep.subr.bf16.mxu1 %v1671_v55 }
  0x42   : > { %1510 = vmatpush3.bf16.msra.mxu0 %v1668_v53 }
  0x43   : > { %1511 = vmatprep.subr.bf16.mxu0 %v1676_v59 }
  0x44   : > { %1538 = vmatpush3.bf16.msra.mxu1 %v1673_v57  ;;  %v1332_v57 = vld [vmem:[%s236_s26] ss:$0 sm:$0xff] }
  0x45   : > { %1539 = vmatprep.subr.bf16.mxu1 %v1679_v62 }
  0x46   : > { %1512 = vmatpush3.bf16.msra.mxu0 %v1678_v61 }
  0x47   : > { %1513 = vmatprep.subr.bf16.mxu0 %v1681_v0 }
  0x48   : > { %1540 = vmatpush3.bf16.msra.mxu1 %v1680_v63 }
  0x49   : > { %1541 = vmatprep.subr.bf16.mxu1 %v1683_v2 }
  0x4a   : > { %1514 = vmatpush3.bf16.msra.mxu0 %v1682_v1 }
  0x4b   : > { %1515 = vmatprep.subr.bf16.mxu0 %v1685_v4 }
  0x4c   : > { %1542 = vmatpush3.bf16.msra.mxu1 %v1684_v3 }
  0x4d   : > { %1543 = vmatprep.subr.bf16.mxu1 %v1687_v6 }
  0x4e   : > { %1516 = vmatpush3.bf16.msra.mxu0 %v1686_v5 }
  0x4f   : > { %1567 = vmatprep.subr.bf16.mxu0 %v1692_v10 }
  0x50   : > { %1544 = vmatpush3.bf16.msra.mxu1 %v1691_v9 }
  0x51   : > { %1074 = vmatmul.mubr.bf16.vlgmr.msra.gmra.mxu0 %v1688_v7 }
  0x52   : > { %1568 = vmatpush3.bf16.msra.mxu0 %v1692_v10  ;;  %1081 = vmatprep.mubr.bf16.mxu0 %v1697_v14 }
  0x53   : > { %1123 = vmatmul.mubr.bf16.vlgmr.msra.gmra.mxu1 %v1693_v11  ;;  %1569 = vmatprep.subr.bf16.mxu0 %v1696_v13 }
  0x54   : > { %1130 = vmatprep.mubr.bf16.mxu1 %v1701_v17 }
  0x56   : > { %1570 = vmatpush3.bf16.msra.mxu0 %v1696_v13 }
  0x57   : > { %1571 = vmatprep.subr.bf16.mxu0 %v1700_v16 }
  0x59   : > { %1082 = vmatmul.mubr.bf16.gmra.mxu0 %v1699_v15 }
  0x5a   : > { %1572 = vmatpush3.bf16.msra.mxu0 %v1700_v16  ;;  %1583 = vmatprep.mubr.bf16.mxu0 %v1709_v21 }
  0x5b   : > { %1131 = vmatmul.mubr.bf16.gmra.mxu1 %v1703_v18  ;;  %1573 = vmatprep.subr.bf16.mxu0 %v1704_v19 }
  0x5e   : > { %1574 = vmatpush3.bf16.msra.mxu0 %v1704_v19 }
  0x5f   : > { %1575 = vmatprep.subr.bf16.mxu0 %v1705_v20 }
  0x62   : > { %1576 = vmatpush3.bf16.msra.mxu0 %v1705_v20 }
  0x63   : > { %1577 = vmatprep.subr.bf16.mxu0 %v1706_v22 }
  0x66   : > { %1578 = vmatpush3.bf16.msra.mxu0 %v1706_v22 }
  0x67   : > { %1579 = vmatprep.subr.bf16.mxu0 %v1707_v23 }
  0x6a   : > { %1580 = vmatpush3.bf16.msra.mxu0 %v1707_v23 }
  0x6b   : > { %1581 = vmatprep.subr.bf16.mxu0 %v1708_v24 }
  0x6e   : > { %1582 = vmatpush3.bf16.msra.mxu0 %v1708_v24 }
  0x71   : > { %1584 = vmatmul.mubr.bf16.vlgmr.msra.gmra.mxu0 %v1710_v25 }
  0xf1   : > { %v1461_v26 = vpop.f32.mrf.mxu0 }
  0xf3   : > { %v1489_v27 = vpop.f32.mrf.mxu1  ;;  %v1462_v28 = vpop.f32.mrf.mxu0 }
  0xf4   : > { %v1463_v54 = vadd.f32 %v1462_v28, %v1461_v26 }
  0xf5   : > { %v1490_v29 = vpop.f32.mrf.mxu1  ;;  %v1464_v30 = vpop.f32.mrf.mxu0 }
  0xf6   : > { %v978_v62 = vadd.f32 %v1463_v54, %v1332_v57  ;;  %v1491_v63 = vadd.f32 %v1490_v29, %v1489_v27 }
  0xf7   : > { %v1492_v31 = vpop.f32.mrf.mxu1  ;;  %v1465_v32 = vpop.f32.mrf.mxu0 }
  0xf8   : > { %v1466_v59 = vadd.f32 %v1465_v32, %v1464_v30  ;;  %v1027_v10 = vadd.f32 %v1491_v63, %v978_v62 }
  0xf9   : > { %v1467_v33 = vpop.f32.mrf.mxu0  ;;  %v1493_v34 = vpop.f32.mrf.mxu1 }
  0xfa   : > { %v981_v5 = vadd.f32 %v1466_v59, %v1332_v57  ;;  %v1494_v6 = vadd.f32 %v1493_v34, %v1492_v31 }
  0xfb   : > { %v1495_v35 = vpop.f32.mrf.mxu1  ;;  %v1468_v36 = vpop.f32.mrf.mxu0 }
  0xfc   : > { %v1469_v53 = vadd.f32 %v1468_v36, %v1467_v33  ;;  %v1030_v16 = vadd.f32 %v1494_v6, %v981_v5 }
  0xfd   : > { %v1496_v37 = vpop.f32.mrf.mxu1  ;;  %v1470_v38 = vpop.f32.mrf.mxu0 }
  0xfe   : > { %v986_v60 = vadd.f32 %v1469_v53, %v1332_v57  ;;  %v1497_v61 = vadd.f32 %v1496_v37, %v1495_v35 }
  0xff   : > { %v1498_v39 = vpop.f32.mrf.mxu1  ;;  %v1471_v40 = vpop.f32.mrf.mxu0 }
 0x100   : > { %v1472_v58 = vadd.f32 %v1471_v40, %v1470_v38  ;;  %v1035_v7 = vadd.f32 %v1497_v61, %v986_v60 }
 0x101   : > { %v1499_v42 = vpop.f32.mrf.mxu1 }
 0x102   : > { %v989_v2 = vadd.f32 %v1472_v58, %v1332_v57  ;;  %v1500_v3 = vadd.f32 %v1499_v42, %v1498_v39 }
 0x104   : > { %v1038_v12 = vadd.f32 %v1500_v3, %v989_v2 }
 0x111   : > { %v1517_v41 = vpop.f32.mrf.mxu0 }
 0x113   : > { %v1518_v43 = vpop.f32.mrf.mxu0  ;;  %v1545_v44 = vpop.f32.mrf.mxu1 }
 0x114   : > { %v1519_v8 = vadd.f32 %v1518_v43, %v1517_v41 }
 0x115   : > { %v1520_v45 = vpop.f32.mrf.mxu0  ;;  %v1546_v46 = vpop.f32.mrf.mxu1 }
 0x116   : > { %v1076_v17 = vadd.f32 %v1519_v8, %v1027_v10  ;;  %v1547_v18 = vadd.f32 %v1546_v46, %v1545_v44 }
 0x117   : > { %v1521_v47 = vpop.f32.mrf.mxu0  ;;  %v1548_v48 = vpop.f32.mrf.mxu1 }
 0x118   : > { %v1522_v13 = vadd.f32 %v1521_v47, %v1520_v45  ;;  %v1125_v27 = vadd.f32 %v1547_v18, %v1076_v17 }
 0x119   : > { %v1523_v49 = vpop.f32.mrf.mxu0  ;;  %v1549_v50 = vpop.f32.mrf.mxu1 }
 0x11a   : > { %v1079_v22 = vadd.f32 %v1522_v13, %v1030_v16  ;;  %v1550_v23 = vadd.f32 %v1549_v50, %v1548_v48 }
 0x11b   : > { %v1524_v51 = vpop.f32.mrf.mxu0  ;;  %v1551_v52 = vpop.f32.mrf.mxu1 }
 0x11c   : > { %v1525_v4 = vadd.f32 %v1524_v51, %v1523_v49  ;;  %v1128_v32 = vadd.f32 %v1550_v23, %v1079_v22 }
 0x11d   : > { %v1526_v55 = vpop.f32.mrf.mxu0  ;;  %v1552_v56 = vpop.f32.mrf.mxu1 }
 0x11e   : > { %v1084_v14 = vadd.f32 %v1525_v4, %v1035_v7  ;;  %v1553_v15 = vadd.f32 %v1552_v56, %v1551_v52 }
 0x11f   : > { %v1527_v0 = vpop.f32.mrf.mxu0  ;;  %v1554_v1 = vpop.f32.mrf.mxu1 }
 0x120   : > { %v1528_v9 = vadd.f32 %v1527_v0, %v1526_v55  ;;  %v1133_v24 = vadd.f32 %v1553_v15, %v1084_v14 }
 0x121   : > { %v1555_v11 = vpop.f32.mrf.mxu1 }
 0x122   : > { %v1087_v19 = vadd.f32 %v1528_v9, %v1038_v12  ;;  %v1556_v20 = vadd.f32 %v1555_v11, %v1554_v1 }
 0x124   : > { %v1136_v28 = vadd.f32 %v1556_v20, %v1087_v19 }
 0x131   : > { %v1585_v21 = vpop.f32.mrf.mxu0 }
 0x132   : > { %v1182_v26 = vadd.f32 %v1585_v21, %v1133_v24 }
 0x133   : > { %v1173_v25 = vpop.f32.mrf.mxu0 }
 0x134   : > { %v1174_v30 = vadd.f32 %v1173_v25, %v1125_v27  ;;  %v1190_v34 = vmax.f32 %v1182_v26, 0.0 }
 0x135   : > { %v1586_v29 = vpop.f32.mrf.mxu0 }
 0x136   : > { %v1185_v31 = vadd.f32 %v1586_v29, %v1136_v28  ;;  %v1188_v37 = vmax.f32 %v1174_v30, 0.0 }
 0x137   : > { %v1176_v33 = vpop.f32.mrf.mxu0 }
 0x138   : > { %v1191_v35 = vmax.f32 %v1185_v31, 0.0  ;;  %v1177_v36 = vadd.f32 %v1176_v33, %v1128_v32 }
 0x13a   : > { %v1442_v38 = vpack.c.bf16 %v1191_v35, %v1190_v34  ;;  %v1189_v39 = vmax.f32 %v1177_v36, 0.0 }
 0x13c   : > { %1444 = vst [vmem:[%s245_s30 + $0x8] sm:$0xff] %v1442_v38   ;;  %v1437_v40 = vpack.c.bf16 %v1189_v39, %v1188_v37 }
 0x13e   : > { %1438 = vst [vmem:[%s245_s30] sm:$0xff] %v1437_v40  }
 0x13f PF: > { %s13_s14 = sadd.s32 1, %s1733_s14   ;;  %s1898_s12 = smov %s1729_s13 }
 0x140   : > { %p10_p5 = scmp.ge.s32.totalorder %s13_s14, 4   ;;  %s1899_s13 = smov %s1901_s15 }
 0x142   :  { %12 = sbr.rel (!%p10_p5) target bundleno = 2 (0x2), region = 68 }

// kernel: classifier_forward.8
= control target key start
LH: loop header
LB: loop body
LE: loop exit
PB: predicated region body
PF: predicated region fallthrough
CT: control target
= control target key end

     0   :  { %s2009_s12 = smov 0   ;;  %s2011_s13 = smov 0   ;;  %s2211_s0 = inlined_call_operand.vmem [shape: bf16[2,16,1152], index: 0, kind: input, shape index: {}]   ;;  %s2212_s1 = inlined_call_operand.vmem [shape: bf16[2,1152,256], index: 1, kind: input, shape index: {}]   ;;  %s2213_s2 = inlined_call_operand.vmem [shape: f32[2,1,256], index: 2, kind: input, shape index: {}]   ;;  %s2214_s3 = inlined_call_operand.vmem [shape: bf16[2,16,256], index: 3, kind: output, shape index: {}]  }
   0x1   :  { %s2013_s14 = smov 0  }
   0x2 LB: > { %s25_s15 = sadd.s32 1, %s1982_s13  ;;  %p1542_p0 = scmp.ge.s32.totalorder %s1986_s14, 1  ;;  %s1986_s14 = sphi %s2013_s14, %s13_s14   ;;  %s1982_s13 = sphi %s2011_s13, %s2216_s13   ;;  %s1978_s12 = sphi %s2009_s12, %s2215_s12  }
   0x3   : > { %p27_p1 = scmp.ge.s32.totalorder %s25_s15, 2  ;;  %p178_p2 = scmp.lt.s32.totalorder %s1986_s14, 3 }
   0x5   : > { %s2218_s15 = smov (%p27_p1, %s25_s15), 0  ;;  %p179_p3 = pnand %p1542_p0, %p178_p2 }
   0x6   : > { %p222_p4 = scmp.lt.s32.totalorder (!%p179_p3), %s1978_s12, 1 }
   0x7   : > { %182 = sbr.rel (%p179_p3) target bundleno = 383 (0x17f), region = 32 }
   0xc   : > { %s2220_s12 = smov (!%p222_p4, %s1978_s12), 1 }
   0xd   : > { %s1709_s16 = smul.u32 1152, %s2220_s12  ;;  %s1545_s24 = sshll.u32 %s2220_s12, 1 }
   0xe   : > { %s1708_s20 = smul.u32 72, %s2220_s12  ;;  %s240_s27 = scalar_lea.vmem %s2213_s2, %s1545_s24 }
   0xf   : > { %s2033_s19 = scalar_lea.vmem %s2212_s1, %s1709_s16  ;;  %s1705_s28 = sshll.u32 %s2220_s12, 4 }
  0x10   : > { %v1735_v0 = vld [vmem:[%s2033_s19 + $0x74] ss:$8 sps:$4 sm:$0xff]   ;;  %v1737_v1 = vld [vmem:[%s2033_s19 + $0x70] ss:$8 sps:$4 sm:$0xff]   ;;  %v1741_v4 = vld [vmem:[%s2033_s19 + $0x64] ss:$8 sps:$4 sm:$0xff]   ;;  %s2083_s23 = scalar_lea.vmem %s2211_s0, %s1708_s20  ;;  %s250_s4 = scalar_lea.vmem %s2214_s3, %s1705_s28 }
  0x11   : > { %1185 = vmatprep.subr.bf16.mxu0 %v1735_v0  ;;  %v1738_v2 = vld [vmem:[%s2033_s19 + $0x174] ss:$8 sps:$4 sm:$0xff]   ;;  %v1740_v3 = vld [vmem:[%s2033_s19 + $0x170] ss:$8 sps:$4 sm:$0xff]   ;;  %v1743_v5 = vld [vmem:[%s2033_s19 + $0x60] ss:$8 sps:$4 sm:$0xff]  }
  0x12   : > { %1186 = vmatpush1.bf16.msra.mxu0 %v1737_v1  ;;  %1228 = vmatprep.subr.bf16.mxu1 %v1738_v2  ;;  %v1744_v6 = vld [vmem:[%s2033_s19 + $0x164] ss:$8 sps:$4 sm:$0xff]   ;;  %v1746_v7 = vld [vmem:[%s2033_s19 + $0x160] ss:$8 sps:$4 sm:$0xff]   ;;  %v1747_v8 = vld [vmem:[%s2033_s19 + $0x54] ss:$8 sps:$4 sm:$0xff]  }
  0x13   : > { %1229 = vmatpush1.bf16.msra.mxu1 %v1740_v3  ;;  %1187 = vmatprep.subr.bf16.mxu0 %v1741_v4  ;;  %v1749_v9 = vld [vmem:[%s2033_s19 + $0x50] ss:$8 sps:$4 sm:$0xff]   ;;  %v1750_v10 = vld [vmem:[%s2033_s19 + $0x154] ss:$8 sps:$4 sm:$0xff]   ;;  %v1753_v11 = vld [vmem:[%s2033_s19 + $0x44] ss:$8 sps:$4 sm:$0xff]  }
  0x14   : > { %1230 = vmatprep.subr.bf16.mxu1 %v1744_v6  ;;  %v1752_v12 = vld [vmem:[%s2033_s19 + $0x150] ss:$8 sps:$4 sm:$0xff]   ;;  %v1756_v13 = vld [vmem:[%s2033_s19 + $0x144] ss:$8 sps:$4 sm:$0xff]   ;;  %v1755_v14 = vld [vmem:[%s2033_s19 + $0x40] ss:$8 sps:$4 sm:$0xff]  }
  0x15   : > { %v1759_v15 = vld [vmem:[%s2033_s19 + $0x34] ss:$8 sps:$4 sm:$0xff]   ;;  %v1758_v16 = vld [vmem:[%s2033_s19 + $0x140] ss:$8 sps:$4 sm:$0xff]   ;;  %v1761_v18 = vld [vmem:[%s2033_s19 + $0x30] ss:$8 sps:$4 sm:$0xff]  }
  0x16   : > { %1188 = vmatpush1.bf16.msra.mxu0 %v1743_v5  ;;  %v1762_v17 = vld [vmem:[%s2033_s19 + $0x134] ss:$8 sps:$4 sm:$0xff]   ;;  %v1765_v19 = vld [vmem:[%s2033_s19 + $0x24] ss:$8 sps:$4 sm:$0xff]   ;;  %v1764_v20 = vld [vmem:[%s2033_s19 + $0x130] ss:$8 sps:$4 sm:$0xff]  }
  0x17   : > { %1189 = vmatprep.subr.bf16.mxu0 %v1747_v8  ;;  %1231 = vmatpush1.bf16.msra.mxu1 %v1746_v7  ;;  %v1768_v21 = vld [vmem:[%s2033_s19 + $0x124] ss:$8 sps:$4 sm:$0xff]   ;;  %v1767_v22 = vld [vmem:[%s2033_s19 + $0x20] ss:$8 sps:$4 sm:$0xff]   ;;  %v1771_v23 = vld [vmem:[%s2033_s19 + $0x14] ss:$8 sps:$4 sm:$0xff]  }
  0x18   : > { %1232 = vmatprep.subr.bf16.mxu1 %v1750_v10  ;;  %v1770_v24 = vld [vmem:[%s2033_s19 + $0x120] ss:$8 sps:$4 sm:$0xff]   ;;  %v1774_v25 = vld [vmem:[%s2033_s19 + $0x114] ss:$8 sps:$4 sm:$0xff]   ;;  %v1773_v26 = vld [vmem:[%s2033_s19 + $0x10] ss:$8 sps:$4 sm:$0xff]  }
  0x19   : > { %v1777_v27 = vld [vmem:[%s2033_s19 + $0x4] ss:$8 sps:$4 sm:$0xff]   ;;  %v1776_v28 = vld [vmem:[%s2033_s19 + $0x110] ss:$8 sps:$4 sm:$0xff]   ;;  %v1779_v30 = vld [vmem:[%s2033_s19] ss:$8 sps:$4 sm:$0xff]  }
  0x1a   : > { %1190 = vmatpush1.bf16.msra.mxu0 %v1749_v9  ;;  %v1780_v29 = vld [vmem:[%s2033_s19 + $0x104] ss:$8 sps:$4 sm:$0xff]   ;;  %v1783_v31 = vld [vmem:[%s2033_s19 + $0xf4] ss:$8 sps:$4 sm:$0xff]   ;;  %v1782_v32 = vld [vmem:[%s2033_s19 + $0x100] ss:$8 sps:$4 sm:$0xff]  }
  0x1b   : > { %1191 = vmatprep.subr.bf16.mxu0 %v1753_v11  ;;  %1233 = vmatpush1.bf16.msra.mxu1 %v1752_v12  ;;  %v1786_v33 = vld [vmem:[%s2033_s19 + $0x1f4] ss:$8 sps:$4 sm:$0xff]   ;;  %v1785_v34 = vld [vmem:[%s2033_s19 + $0xf0] ss:$8 sps:$4 sm:$0xff]   ;;  %v1789_v35 = vld [vmem:[%s2033_s19 + $0xe4] ss:$8 sps:$4 sm:$0xff]  }
  0x1c   : > { %1234 = vmatprep.subr.bf16.mxu1 %v1756_v13  ;;  %v1788_v36 = vld [vmem:[%s2033_s19 + $0x1f0] ss:$8 sps:$4 sm:$0xff]   ;;  %v1792_v37 = vld [vmem:[%s2033_s19 + $0x1e4] ss:$8 sps:$4 sm:$0xff]   ;;  %v1791_v38 = vld [vmem:[%s2033_s19 + $0xe0] ss:$8 sps:$4 sm:$0xff]  }
  0x1d   : > { %v1795_v39 = vld [vmem:[%s2033_s19 + $0xd4] ss:$8 sps:$4 sm:$0xff]   ;;  %v1794_v40 = vld [vmem:[%s2033_s19 + $0x1e0] ss:$8 sps:$4 sm:$0xff]   ;;  %v1797_v42 = vld [vmem:[%s2033_s19 + $0xd0] ss:$8 sps:$4 sm:$0xff]  }
  0x1e   : > { %1192 = vmatpush1.bf16.msra.mxu0 %v1755_v14  ;;  %v1798_v41 = vld [vmem:[%s2033_s19 + $0x1d4] ss:$8 sps:$4 sm:$0xff]   ;;  %v1801_v43 = vld [vmem:[%s2033_s19 + $0xc4] ss:$8 sps:$4 sm:$0xff]   ;;  %v1800_v44 = vld [vmem:[%s2033_s19 + $0x1d0] ss:$8 sps:$4 sm:$0xff]  }
  0x1f   : > { %1193 = vmatprep.subr.bf16.mxu0 %v1759_v15  ;;  %1235 = vmatpush1.bf16.msra.mxu1 %v1758_v16  ;;  %v1804_v45 = vld [vmem:[%s2033_s19 + $0x1c4] ss:$8 sps:$4 sm:$0xff]   ;;  %v1803_v46 = vld [vmem:[%s2033_s19 + $0xc0] ss:$8 sps:$4 sm:$0xff]   ;;  %v1807_v48 = vld [vmem:[%s2033_s19 + $0xb4] ss:$8 sps:$4 sm:$0xff]  }
  0x20   : > { %1236 = vmatprep.subr.bf16.mxu1 %v1762_v17  ;;  %v1832_v47 = vld [vmem:[%s2083_s23 + $0x4] ss:$36 sps:$4 sm:$0xff]   ;;  %v1810_v50 = vld [vmem:[%s2033_s19 + $0x1b4] ss:$8 sps:$4 sm:$0xff]   ;;  %v1839_v51 = vld [vmem:[%s2083_s23 + $0xc] ss:$36 sps:$4 sm:$0xff]  }
  0x21   : > { %v1806_v49 = vld [vmem:[%s2033_s19 + $0x1c0] ss:$8 sps:$4 sm:$0xff]   ;;  %1217 = vmatprep.mubr.bf16.mxu0 %v1832_v47  ;;  %v1809_v52 = vld [vmem:[%s2033_s19 + $0xb0] ss:$8 sps:$4 sm:$0xff]   ;;  %v1813_v53 = vld [vmem:[%s2033_s19 + $0xa4] ss:$8 sps:$4 sm:$0xff]   ;;  %1260 = vmatprep.mubr.bf16.mxu1 %v1839_v51 }
  0x22   : > { %1194 = vmatpush1.bf16.msra.mxu0 %v1761_v18  ;;  %v1812_v54 = vld [vmem:[%s2033_s19 + $0x1b0] ss:$8 sps:$4 sm:$0xff]   ;;  %v1816_v55 = vld [vmem:[%s2033_s19 + $0x1a4] ss:$8 sps:$4 sm:$0xff]   ;;  %v1815_v56 = vld [vmem:[%s2033_s19 + $0xa0] ss:$8 sps:$4 sm:$0xff]  }
  0x23   : > { %1195 = vmatprep.subr.bf16.mxu0 %v1765_v19  ;;  %1237 = vmatpush1.bf16.msra.mxu1 %v1764_v20  ;;  %v1819_v57 = vld [vmem:[%s2033_s19 + $0x94] ss:$8 sps:$4 sm:$0xff]   ;;  %v1818_v58 = vld [vmem:[%s2033_s19 + $0x1a0] ss:$8 sps:$4 sm:$0xff]   ;;  %v1821_v60 = vld [vmem:[%s2033_s19 + $0x90] ss:$8 sps:$4 sm:$0xff]  }
  0x24   : > { %1238 = vmatprep.subr.bf16.mxu1 %v1768_v21  ;;  %v1822_v59 = vld [vmem:[%s2033_s19 + $0x194] ss:$8 sps:$4 sm:$0xff]   ;;  %v1825_v61 = vld [vmem:[%s2033_s19 + $0x84] ss:$8 sps:$4 sm:$0xff]   ;;  %v1824_v62 = vld [vmem:[%s2033_s19 + $0x190] ss:$8 sps:$4 sm:$0xff]  }
  0x25   : > { %v1828_v63 = vld [vmem:[%s2033_s19 + $0x184] ss:$8 sps:$4 sm:$0xff]   ;;  %v1827_v0 = vld [vmem:[%s2033_s19 + $0x80] ss:$8 sps:$4 sm:$0xff]   ;;  %v1836_v1 = vld [vmem:[%s2033_s19 + $0x274] ss:$8 sps:$4 sm:$0xff]  }
  0x26   : > { %1196 = vmatpush1.bf16.msra.mxu0 %v1767_v22  ;;  %v1833_v2 = vld [vmem:[%s2033_s19 + $0x180] ss:$8 sps:$4 sm:$0xff]   ;;  %v1842_v4 = vld [vmem:[%s2033_s19 + $0x374] ss:$8 sps:$4 sm:$0xff]   ;;  %v1834_v5 = vld [vmem:[%s2033_s19 + $0x270] ss:$8 sps:$4 sm:$0xff]  }
  0x27   : > { %1197 = vmatprep.subr.bf16.mxu0 %v1771_v23  ;;  %1239 = vmatpush1.bf16.msra.mxu1 %v1770_v24  ;;  %v1830_v3 = vld [vmem:[%s2083_s23] ss:$36 sps:$4 sm:$0xff]   ;;  %v1837_v6 = vld [vmem:[%s2083_s23 + $0x8] ss:$36 sps:$4 sm:$0xff]   ;;  %v1840_v8 = vld [vmem:[%s2033_s19 + $0x370] ss:$8 sps:$4 sm:$0xff]  }
  0x28   : > { %1240 = vmatprep.subr.bf16.mxu1 %v1774_v25  ;;  %v1845_v7 = vld [vmem:[%s2033_s19 + $0x264] ss:$8 sps:$4 sm:$0xff]   ;;  %v1843_v10 = vld [vmem:[%s2033_s19 + $0x260] ss:$8 sps:$4 sm:$0xff]   ;;  %v1851_v11 = vld [vmem:[%s2033_s19 + $0x254] ss:$8 sps:$4 sm:$0xff]  }
  0x29   : > { %v1848_v9 = vld [vmem:[%s2033_s19 + $0x364] ss:$8 sps:$4 sm:$0xff]   ;;  %v1846_v12 = vld [vmem:[%s2033_s19 + $0x360] ss:$8 sps:$4 sm:$0xff]   ;;  %v1854_v13 = vld [vmem:[%s2033_s19 + $0x354] ss:$8 sps:$4 sm:$0xff]  }
  0x2a   : > { %1198 = vmatpush1.bf16.msra.mxu0 %v1773_v26  ;;  %v1849_v14 = vld [vmem:[%s2033_s19 + $0x250] ss:$8 sps:$4 sm:$0xff]   ;;  %v1857_v15 = vld [vmem:[%s2033_s19 + $0x244] ss:$8 sps:$4 sm:$0xff]   ;;  %v1855_v18 = vld [vmem:[%s2033_s19 + $0x240] ss:$8 sps:$4 sm:$0xff]  }
  0x2b   : > { %1199 = vmatprep.subr.bf16.mxu0 %v1777_v27  ;;  %1241 = vmatpush1.bf16.msra.mxu1 %v1776_v28  ;;  %v1852_v16 = vld [vmem:[%s2033_s19 + $0x350] ss:$8 sps:$4 sm:$0xff]   ;;  %v1860_v17 = vld [vmem:[%s2033_s19 + $0x344] ss:$8 sps:$4 sm:$0xff]   ;;  %v1863_v19 = vld [vmem:[%s2033_s19 + $0x234] ss:$8 sps:$4 sm:$0xff]  }
  0x2c   : > { %1242 = vmatprep.subr.bf16.mxu1 %v1780_v29  ;;  %v1858_v20 = vld [vmem:[%s2033_s19 + $0x340] ss:$8 sps:$4 sm:$0xff]   ;;  %v1866_v21 = vld [vmem:[%s2033_s19 + $0x334] ss:$8 sps:$4 sm:$0xff]   ;;  %v1861_v22 = vld [vmem:[%s2033_s19 + $0x230] ss:$8 sps:$4 sm:$0xff]  }
  0x2d   : > { %v1869_v23 = vld [vmem:[%s2033_s19 + $0x224] ss:$8 sps:$4 sm:$0xff]   ;;  %v1864_v24 = vld [vmem:[%s2033_s19 + $0x330] ss:$8 sps:$4 sm:$0xff]   ;;  %v1867_v26 = vld [vmem:[%s2033_s19 + $0x220] ss:$8 sps:$4 sm:$0xff]  }
  0x2e   : > { %1200 = vmatpush1.bf16.msra.mxu0 %v1779_v30  ;;  %v1872_v25 = vld [vmem:[%s2033_s19 + $0x324] ss:$8 sps:$4 sm:$0xff]   ;;  %v1875_v27 = vld [vmem:[%s2033_s19 + $0x214] ss:$8 sps:$4 sm:$0xff]   ;;  %v1870_v28 = vld [vmem:[%s2033_s19 + $0x320] ss:$8 sps:$4 sm:$0xff]  }
  0x2f   : > { %1201 = vmatprep.subr.bf16.mxu0 %v1783_v31  ;;  %1243 = vmatpush1.bf16.msra.mxu1 %v1782_v32  ;;  %v1878_v29 = vld [vmem:[%s2033_s19 + $0x314] ss:$8 sps:$4 sm:$0xff]   ;;  %v1873_v30 = vld [vmem:[%s2033_s19 + $0x210] ss:$8 sps:$4 sm:$0xff]   ;;  %v1881_v32 = vld [vmem:[%s2033_s19 + $0x204] ss:$8 sps:$4 sm:$0xff]  }
  0x30   : > { %1244 = vmatprep.subr.bf16.mxu1 %v1786_v33  ;;  %v1876_v31 = vld [vmem:[%s2033_s19 + $0x310] ss:$8 sps:$4 sm:$0xff]   ;;  %v1902_v47 = vld [vmem:[%s2033_s19 + $0x3d4] ss:$8 sps:$4 sm:$0xff]   ;;  %v1908_v51 = vld [vmem:[%s2033_s19 + $0x3c4] ss:$8 sps:$4 sm:$0xff]  }
  0x31   : > { %v1935_v33 = vld [vmem:[%s2083_s23 + $0x14] ss:$36 sps:$4 sm:$0xff]  }
  0x32   : > { %1202 = vmatpush2.bf16.msra.mxu0 %v1785_v34  ;;  %v1884_v34 = vld [vmem:[%s2033_s19 + $0x304] ss:$8 sps:$4 sm:$0xff]  }
  0x33   : > { %1203 = vmatprep.subr.bf16.mxu0 %v1789_v35  ;;  %1245 = vmatpush2.bf16.msra.mxu1 %v1788_v36  ;;  %v1879_v35 = vld [vmem:[%s2033_s19 + $0x200] ss:$8 sps:$4 sm:$0xff]  }
  0x34   : > { %1246 = vmatprep.subr.bf16.mxu1 %v1792_v37  ;;  %v1941_v36 = vld [vmem:[%s2083_s23 + $0x1c] ss:$36 sps:$4 sm:$0xff]  }
  0x35   : > { %v1887_v37 = vld [vmem:[%s2033_s19 + $0x2f4] ss:$8 sps:$4 sm:$0xff]  }
  0x36   : > { %1204 = vmatpush2.bf16.msra.mxu0 %v1791_v38  ;;  %v1882_v38 = vld [vmem:[%s2033_s19 + $0x300] ss:$8 sps:$4 sm:$0xff]  }
  0x37   : > { %1205 = vmatprep.subr.bf16.mxu0 %v1795_v39  ;;  %1247 = vmatpush2.bf16.msra.mxu1 %v1794_v40  ;;  %v1890_v39 = vld [vmem:[%s2033_s19 + $0x3f4] ss:$8 sps:$4 sm:$0xff]   ;;  %v1885_v40 = vld [vmem:[%s2033_s19 + $0x2f0] ss:$8 sps:$4 sm:$0xff]  }
  0x38   : > { %1248 = vmatprep.subr.bf16.mxu1 %v1798_v41  ;;  %v1893_v41 = vld [vmem:[%s2033_s19 + $0x2e4] ss:$8 sps:$4 sm:$0xff]  }
  0x3a   : > { %1206 = vmatpush2.bf16.msra.mxu0 %v1797_v42  ;;  %v1888_v42 = vld [vmem:[%s2033_s19 + $0x3f0] ss:$8 sps:$4 sm:$0xff]  }
  0x3b   : > { %1207 = vmatprep.subr.bf16.mxu0 %v1801_v43  ;;  %1249 = vmatpush2.bf16.msra.mxu1 %v1800_v44  ;;  %v1896_v43 = vld [vmem:[%s2033_s19 + $0x3e4] ss:$8 sps:$4 sm:$0xff]   ;;  %v1891_v44 = vld [vmem:[%s2033_s19 + $0x2e0] ss:$8 sps:$4 sm:$0xff]  }
  0x3c   : > { %1250 = vmatprep.subr.bf16.mxu1 %v1804_v45  ;;  %v1899_v45 = vld [vmem:[%s2033_s19 + $0x2d4] ss:$8 sps:$4 sm:$0xff]  }
  0x3e   : > { %1208 = vmatpush2.bf16.msra.mxu0 %v1803_v46  ;;  %v1894_v46 = vld [vmem:[%s2033_s19 + $0x3e0] ss:$8 sps:$4 sm:$0xff]  }
  0x3f   : > { %1209 = vmatprep.subr.bf16.mxu0 %v1807_v48  ;;  %1251 = vmatpush2.bf16.msra.mxu1 %v1806_v49  ;;  %v1897_v48 = vld [vmem:[%s2033_s19 + $0x2d0] ss:$8 sps:$4 sm:$0xff]   ;;  %v1905_v49 = vld [vmem:[%s2033_s19 + $0x2c4] ss:$8 sps:$4 sm:$0xff]  }
  0x40   : > { %1252 = vmatprep.subr.bf16.mxu1 %v1810_v50  ;;  %v1900_v50 = vld [vmem:[%s2033_s19 + $0x3d0] ss:$8 sps:$4 sm:$0xff]  }
  0x42   : > { %1210 = vmatpush2.bf16.msra.mxu0 %v1809_v52  ;;  %v1903_v52 = vld [vmem:[%s2033_s19 + $0x2c0] ss:$8 sps:$4 sm:$0xff]  }
  0x43   : > { %1211 = vmatprep.subr.bf16.mxu0 %v1813_v53  ;;  %1253 = vmatpush2.bf16.msra.mxu1 %v1812_v54  ;;  %v1911_v53 = vld [vmem:[%s2033_s19 + $0x2b4] ss:$8 sps:$4 sm:$0xff]   ;;  %v1906_v54 = vld [vmem:[%s2033_s19 + $0x3c0] ss:$8 sps:$4 sm:$0xff]  }
  0x44   : > { %1254 = vmatprep.subr.bf16.mxu1 %v1816_v55  ;;  %v1914_v55 = vld [vmem:[%s2033_s19 + $0x3b4] ss:$8 sps:$4 sm:$0xff]  }
  0x46   : > { %1212 = vmatpush2.bf16.msra.mxu0 %v1815_v56  ;;  %v1909_v56 = vld [vmem:[%s2033_s19 + $0x2b0] ss:$8 sps:$4 sm:$0xff]  }
  0x47   : > { %1213 = vmatprep.subr.bf16.mxu0 %v1819_v57  ;;  %1255 = vmatpush2.bf16.msra.mxu1 %v1818_v58  ;;  %v1917_v57 = vld [vmem:[%s2033_s19 + $0x2a4] ss:$8 sps:$4 sm:$0xff]   ;;  %v1912_v58 = vld [vmem:[%s2033_s19 + $0x3b0] ss:$8 sps:$4 sm:$0xff]  }
  0x48   : > { %1256 = vmatprep.subr.bf16.mxu1 %v1822_v59  ;;  %v1920_v59 = vld [vmem:[%s2033_s19 + $0x3a4] ss:$8 sps:$4 sm:$0xff]  }
  0x4a   : > { %1214 = vmatpush2.bf16.msra.mxu0 %v1821_v60  ;;  %v1915_v60 = vld [vmem:[%s2033_s19 + $0x2a0] ss:$8 sps:$4 sm:$0xff]  }
  0x4b   : > { %1215 = vmatprep.subr.bf16.mxu0 %v1825_v61  ;;  %1257 = vmatpush2.bf16.msra.mxu1 %v1824_v62  ;;  %v1923_v61 = vld [vmem:[%s2033_s19 + $0x294] ss:$8 sps:$4 sm:$0xff]   ;;  %v1918_v62 = vld [vmem:[%s2033_s19 + $0x3a0] ss:$8 sps:$4 sm:$0xff]  }
  0x4c   : > { %1258 = vmatprep.subr.bf16.mxu1 %v1828_v63  ;;  %v1926_v63 = vld [vmem:[%s2033_s19 + $0x394] ss:$8 sps:$4 sm:$0xff]  }
  0x4e   : > { %1216 = vmatpush2.bf16.msra.mxu0 %v1827_v0  ;;  %v1921_v0 = vld [vmem:[%s2033_s19 + $0x290] ss:$8 sps:$4 sm:$0xff]  }
  0x4f   : > { %1271 = vmatprep.subr.bf16.mxu0 %v1836_v1  ;;  %1259 = vmatpush2.bf16.msra.mxu1 %v1833_v2  ;;  %v1929_v1 = vld [vmem:[%s2033_s19 + $0x284] ss:$8 sps:$4 sm:$0xff]   ;;  %v1924_v2 = vld [vmem:[%s2033_s19 + $0x390] ss:$8 sps:$4 sm:$0xff]  }
  0x50   : > { %1314 = vmatprep.subr.bf16.mxu1 %v1842_v4  ;;  %v1927_v4 = vld [vmem:[%s2033_s19 + $0x280] ss:$8 sps:$4 sm:$0xff]  }
  0x51   : > { %1218 = vmatmul.mubr.bf16.vlgmr.msra.gmra.mxu0 %v1830_v3  ;;  %v1932_v3 = vld [vmem:[%s2033_s19 + $0x384] ss:$8 sps:$4 sm:$0xff]  }
  0x52   : > { %1272 = vmatpush1.bf16.msra.mxu0 %v1834_v5  ;;  %1261 = vmatmul.mubr.bf16.vlgmr.msra.gmra.mxu1 %v1837_v6  ;;  %v1938_v5 = vld [vmem:[%s2033_s19 + $0x474] ss:$8 sps:$4 sm:$0xff]   ;;  %v1930_v6 = vld [vmem:[%s2033_s19 + $0x380] ss:$8 sps:$4 sm:$0xff]  }
  0x53   : > { %1273 = vmatprep.subr.bf16.mxu0 %v1845_v7  ;;  %1315 = vmatpush1.bf16.msra.mxu1 %v1840_v8  ;;  %v1933_v7 = vld [vmem:[%s2083_s23 + $0x10] ss:$36 sps:$4 sm:$0xff]  }
  0x54   : > { %1316 = vmatprep.subr.bf16.mxu1 %v1848_v9  ;;  %1303 = vmatprep.mubr.bf16.mxu0 %v1935_v33  ;;  %v1936_v8 = vld [vmem:[%s2033_s19 + $0x470] ss:$8 sps:$4 sm:$0xff]  }
  0x55   : > { %1346 = vmatprep.mubr.bf16.mxu1 %v1941_v36  ;;  %v1939_v9 = vld [vmem:[%s2083_s23 + $0x18] ss:$36 sps:$4 sm:$0xff]  }
  0x56   : > { %1274 = vmatpush1.bf16.msra.mxu0 %v1843_v10  ;;  %v1944_v10 = vld [vmem:[%s2033_s19 + $0x464] ss:$8 sps:$4 sm:$0xff]  }
  0x57   : > { %1275 = vmatprep.subr.bf16.mxu0 %v1851_v11  ;;  %1317 = vmatpush1.bf16.msra.mxu1 %v1846_v12  ;;  %v1942_v11 = vld [vmem:[%s2033_s19 + $0x460] ss:$8 sps:$4 sm:$0xff]   ;;  %v1988_v12 = vmov 0  }
  0x58   : > { %1318 = vmatprep.subr.bf16.mxu1 %v1854_v13  ;;  %v1947_v13 = vld [vmem:[%s2033_s19 + $0x454] ss:$8 sps:$4 sm:$0xff]  }
  0x5a   : > { %1276 = vmatpush1.bf16.msra.mxu0 %v1849_v14  ;;  %v1945_v14 = vld [vmem:[%s2033_s19 + $0x450] ss:$8 sps:$4 sm:$0xff]  }
  0x5b   : > { %1277 = vmatprep.subr.bf16.mxu0 %v1857_v15  ;;  %1319 = vmatpush1.bf16.msra.mxu1 %v1852_v16  ;;  %v1950_v15 = vld [vmem:[%s2033_s19 + $0x444] ss:$8 sps:$4 sm:$0xff]   ;;  %v1948_v16 = vld [vmem:[%s2033_s19 + $0x440] ss:$8 sps:$4 sm:$0xff]  }
  0x5c   : > { %1320 = vmatprep.subr.bf16.mxu1 %v1860_v17  ;;  %v1953_v17 = vld [vmem:[%s2033_s19 + $0x434] ss:$8 sps:$4 sm:$0xff]  }
  0x5e   : > { %1278 = vmatpush1.bf16.msra.mxu0 %v1855_v18  ;;  %v1951_v18 = vld [vmem:[%s2033_s19 + $0x430] ss:$8 sps:$4 sm:$0xff]  }
  0x5f   : > { %1279 = vmatprep.subr.bf16.mxu0 %v1863_v19  ;;  %1321 = vmatpush1.bf16.msra.mxu1 %v1858_v20  ;;  %v1956_v19 = vld [vmem:[%s2033_s19 + $0x424] ss:$8 sps:$4 sm:$0xff]   ;;  %v1954_v20 = vld [vmem:[%s2033_s19 + $0x420] ss:$8 sps:$4 sm:$0xff]  }
  0x60   : > { %1322 = vmatprep.subr.bf16.mxu1 %v1866_v21  ;;  %v1959_v21 = vld [vmem:[%s2033_s19 + $0x414] ss:$8 sps:$4 sm:$0xff]  }
  0x62   : > { %1280 = vmatpush1.bf16.msra.mxu0 %v1861_v22  ;;  %v1957_v22 = vld [vmem:[%s2033_s19 + $0x410] ss:$8 sps:$4 sm:$0xff]  }
  0x63   : > { %1281 = vmatprep.subr.bf16.mxu0 %v1869_v23  ;;  %1323 = vmatpush1.bf16.msra.mxu1 %v1864_v24  ;;  %v1962_v23 = vld [vmem:[%s2033_s19 + $0x404] ss:$8 sps:$4 sm:$0xff]   ;;  %v1960_v24 = vld [vmem:[%s2033_s19 + $0x400] ss:$8 sps:$4 sm:$0xff]  }
  0x64   : > { %1324 = vmatprep.subr.bf16.mxu1 %v1872_v25  ;;  %v1963_v25 = vld [vmem:[%s2083_s23 + $0x20] ss:$36 sps:$4 sm:$0xff]  }
  0x66   : > { %1282 = vmatpush1.bf16.msra.mxu0 %v1867_v26 }
  0x67   : > { %1283 = vmatprep.subr.bf16.mxu0 %v1875_v27  ;;  %1325 = vmatpush1.bf16.msra.mxu1 %v1870_v28  ;;  %v409_v27 = vlaneseq }
  0x68   : > { %1326 = vmatprep.subr.bf16.mxu1 %v1878_v29 }
  0x6a   : > { %1284 = vmatpush1.bf16.msra.mxu0 %v1873_v30  ;;  %v410_v30 = vshrl.u32 %v409_v27, 7 }
  0x6b   : > { %1285 = vmatprep.subr.bf16.mxu0 %v1881_v32  ;;  %1327 = vmatpush1.bf16.msra.mxu1 %v1876_v31 }
  0x6c   : > { %1328 = vmatprep.subr.bf16.mxu1 %v1884_v34  ;;  %v411_v33 = vsub.s32 0, %v410_v30  ;;  %v407_v34 = vld [vmem:[%s240_s27] sm:$0x3] }
  0x6e   : > { %1286 = vmatpush1.bf16.msra.mxu0 %v1879_v35  ;;  %v415_v35 = vsub.s32 1, %v410_v30 }
  0x6f   : > { %1287 = vmatprep.subr.bf16.mxu0 %v1887_v37  ;;  %1329 = vmatpush1.bf16.msra.mxu1 %v1882_v38  ;;  %v412_v38 = vrot.slane %v407_v34, %v411_v33 }
  0x70   : > { %1330 = vmatprep.subr.bf16.mxu1 %v1890_v39 }
  0x72   : > { %1288 = vmatpush2.bf16.msra.mxu0 %v1885_v40  ;;  %v416_v40 = vrot.slane %v407_v34, %v415_v35 }
  0x73   : > { %1289 = vmatprep.subr.bf16.mxu0 %v1893_v41  ;;  %1331 = vmatpush2.bf16.msra.mxu1 %v1888_v42 }
  0x74   : > { %1332 = vmatprep.subr.bf16.mxu1 %v1896_v43 }
  0x76   : > { %1290 = vmatpush2.bf16.msra.mxu0 %v1891_v44 }
  0x77   : > { %1291 = vmatprep.subr.bf16.mxu0 %v1899_v45  ;;  %1333 = vmatpush2.bf16.msra.mxu1 %v1894_v46 }
  0x78   : > { %1334 = vmatprep.subr.bf16.mxu1 %v1902_v47 }
  0x7a   : > { %1292 = vmatpush2.bf16.msra.mxu0 %v1897_v48 }
  0x7b   : > { %1293 = vmatprep.subr.bf16.mxu0 %v1905_v49  ;;  %1335 = vmatpush2.bf16.msra.mxu1 %v1900_v50 }
  0x7c   : > { %1336 = vmatprep.subr.bf16.mxu1 %v1908_v51 }
  0x7e   : > { %1294 = vmatpush2.bf16.msra.mxu0 %v1903_v52 }
  0x7f   : > { %1295 = vmatprep.subr.bf16.mxu0 %v1911_v53  ;;  %1337 = vmatpush2.bf16.msra.mxu1 %v1906_v54 }
  0x80   : > { %1338 = vmatprep.subr.bf16.mxu1 %v1914_v55 }
  0x82   : > { %1296 = vmatpush2.bf16.msra.mxu0 %v1909_v56 }
  0x83   : > { %1297 = vmatprep.subr.bf16.mxu0 %v1917_v57  ;;  %1339 = vmatpush2.bf16.msra.mxu1 %v1912_v58 }
  0x84   : > { %1340 = vmatprep.subr.bf16.mxu1 %v1920_v59 }
  0x86   : > { %1298 = vmatpush2.bf16.msra.mxu0 %v1915_v60 }
  0x87   : > { %1299 = vmatprep.subr.bf16.mxu0 %v1923_v61  ;;  %1341 = vmatpush2.bf16.msra.mxu1 %v1918_v62 }
  0x88   : > { %1342 = vmatprep.subr.bf16.mxu1 %v1926_v63 }
  0x8a   : > { %1300 = vmatpush2.bf16.msra.mxu0 %v1921_v0 }
  0x8b   : > { %1301 = vmatprep.subr.bf16.mxu0 %v1929_v1  ;;  %1343 = vmatpush2.bf16.msra.mxu1 %v1924_v2 }
  0x8c   : > { %1344 = vmatprep.subr.bf16.mxu1 %v1932_v3 }
  0x8e   : > { %1302 = vmatpush2.bf16.msra.mxu0 %v1927_v4 }
  0x8f   : > { %1357 = vmatprep.subr.bf16.mxu0 %v1938_v5  ;;  %1345 = vmatpush2.bf16.msra.mxu1 %v1930_v6 }
  0x91   : > { %1304 = vmatmul.mubr.bf16.vlgmr.msra.gmra.mxu0 %v1933_v7 }
  0x92   : > { %1358 = vmatpush1.bf16.msra.mxu0 %v1936_v8  ;;  %1389 = vmatprep.mubr.bf16.mxu0 %v1988_v12 }
  0x93   : > { %1347 = vmatmul.mubr.bf16.vlgmr.msra.gmra.mxu1 %v1939_v9  ;;  %1359 = vmatprep.subr.bf16.mxu0 %v1944_v10 }
  0x96   : > { %1360 = vmatpush1.bf16.msra.mxu0 %v1942_v11 }
  0x97   : > { %1361 = vmatprep.subr.bf16.mxu0 %v1947_v13 }
  0x9a   : > { %1362 = vmatpush1.bf16.msra.mxu0 %v1945_v14 }
  0x9b   : > { %1363 = vmatprep.subr.bf16.mxu0 %v1950_v15 }
  0x9e   : > { %1364 = vmatpush1.bf16.msra.mxu0 %v1948_v16 }
  0x9f   : > { %1365 = vmatprep.subr.bf16.mxu0 %v1953_v17 }
  0xa2   : > { %1366 = vmatpush1.bf16.msra.mxu0 %v1951_v18 }
  0xa3   : > { %1367 = vmatprep.subr.bf16.mxu0 %v1956_v19 }
  0xa6   : > { %1368 = vmatpush1.bf16.msra.mxu0 %v1954_v20 }
  0xa7   : > { %1369 = vmatprep.subr.bf16.mxu0 %v1959_v21 }
  0xaa   : > { %1370 = vmatpush1.bf16.msra.mxu0 %v1957_v22 }
  0xab   : > { %1371 = vmatprep.subr.bf16.mxu0 %v1962_v23 }
  0xae   : > { %1372 = vmatpush1.bf16.msra.mxu0 %v1960_v24 }
  0xb1   : > { %1390 = vmatmul.mubr.bf16.vlgmr.msra.gmra.mxu0 %v1963_v25 }
 0x111   : > { %v1219_v26 = vpop.f32.mrf.mxu0 }
 0x112   : > { %v1262_v29 = vpop.f32.mrf.mxu1  ;;  %v1220_v42 = vadd.f32 %v1219_v26, %v412_v38 }
 0x113   : > { %v1221_v28 = vpop.f32.mrf.mxu0 }
 0x114   : > { %v1264_v32 = vpop.f32.mrf.mxu1  ;;  %v1222_v45 = vadd.f32 %v1221_v28, %v416_v40  ;;  %v1263_v46 = vadd.f32 %v1262_v29, %v1220_v42 }
 0x115   : > { %v1223_v31 = vpop.f32.mrf.mxu0 }
 0x116   : > { %v1266_v37 = vpop.f32.mrf.mxu1  ;;  %v1224_v47 = vadd.f32 %v1223_v31, %v412_v38  ;;  %v1265_v50 = vadd.f32 %v1264_v32, %v1222_v45 }
 0x117   : > { %v1225_v36 = vpop.f32.mrf.mxu0 }
 0x118   : > { %v1268_v41 = vpop.f32.mrf.mxu1  ;;  %v1226_v51 = vadd.f32 %v1225_v36, %v416_v40  ;;  %v1267_v53 = vadd.f32 %v1266_v37, %v1224_v47 }
 0x11a   : > { %v1269_v57 = vadd.f32 %v1268_v41, %v1226_v51 }
 0x151   : > { %v1305_v39 = vpop.f32.mrf.mxu0 }
 0x152   : > { %v1306_v52 = vadd.f32 %v1305_v39, %v1263_v46 }
 0x153   : > { %v1307_v43 = vpop.f32.mrf.mxu0  ;;  %v1348_v44 = vpop.f32.mrf.mxu1 }
 0x154   : > { %v1308_v54 = vadd.f32 %v1307_v43, %v1265_v50  ;;  %v1349_v58 = vadd.f32 %v1348_v44, %v1306_v52 }
 0x155   : > { %v1309_v48 = vpop.f32.mrf.mxu0  ;;  %v1350_v49 = vpop.f32.mrf.mxu1 }
 0x156   : > { %v1310_v59 = vadd.f32 %v1309_v48, %v1267_v53  ;;  %v1351_v61 = vadd.f32 %v1350_v49, %v1308_v54 }
 0x157   : > { %v1311_v55 = vpop.f32.mrf.mxu0  ;;  %v1352_v56 = vpop.f32.mrf.mxu1 }
 0x158   : > { %v1312_v62 = vadd.f32 %v1311_v55, %v1269_v57  ;;  %v1353_v2 = vadd.f32 %v1352_v56, %v1310_v59 }
 0x159   : > { %v1354_v0 = vpop.f32.mrf.mxu1 }
 0x15a   : > { %v1355_v5 = vadd.f32 %v1354_v0, %v1312_v62 }
 0x171   : > { %v1391_v60 = vpop.f32.mrf.mxu0 }
 0x172   : > { %v1392_v63 = vadd.f32 %v1391_v60, %v1349_v58 }
 0x173   : > { %v1393_v1 = vpop.f32.mrf.mxu0 }
 0x174   : > { %v1394_v3 = vadd.f32 %v1393_v1, %v1351_v61  ;;  %v1400_v6 = vmax.f32 %v1392_v63, 0.0 }
 0x175   : > { %v1395_v4 = vpop.f32.mrf.mxu0 }
 0x176   : > { %v1401_v7 = vmax.f32 %v1394_v3, 0.0  ;;  %v1396_v8 = vadd.f32 %v1395_v4, %v1353_v2 }
 0x177   : > { %v1397_v9 = vpop.f32.mrf.mxu0 }
 0x178   : > { %v1706_v10 = vpack.c.bf16 %v1401_v7, %v1400_v6  ;;  %v1398_v11 = vadd.f32 %v1397_v9, %v1355_v5  ;;  %v1402_v12 = vmax.f32 %v1396_v8, 0.0 }
 0x17a   : > { %1416 = vst [vmem:[%s250_s4] sm:$0xff] %v1706_v10  ;;  %v1403_v13 = vmax.f32 %v1398_v11, 0.0 }
 0x17c   : > { %v1707_v14 = vpack.c.bf16 %v1403_v13, %v1402_v12 }
 0x17e   : > { %1417 = vst [vmem:[%s250_s4 + $0x8] sm:$0xff] %v1707_v14 }
 0x17f PF: > { %s13_s14 = sadd.s32 1, %s1986_s14   ;;  %s2215_s12 = smov %s1982_s13 }
 0x180   : > { %p10_p5 = scmp.ge.s32.totalorder %s13_s14, 4   ;;  %s2216_s13 = smov %s2218_s15 }
 0x182   :  { %12 = sbr.rel (!%p10_p5) target bundleno = 2 (0x2), region = 68 }

// kernel: classifier_forward.9
= control target key start
LH: loop header
LB: loop body
LE: loop exit
PB: predicated region body
PF: predicated region fallthrough
CT: control target
= control target key end

     0   :  { %s2321_s1 = inlined_call_operand.vmem [shape: bf16[512,512], index: 1, kind: input, shape index: {}]   ;;  %s2322_s0 = inlined_call_operand.vmem [shape: bf16[8,512], index: 0, kind: input, shape index: {}]   ;;  %s2323_s3 = inlined_call_operand.vmem [shape: bf16[512,128], index: 3, kind: input, shape index: {}]   ;;  %s2324_s2 = inlined_call_operand.vmem [shape: f32[1,512], index: 2, kind: input, shape index: {}]   ;;  %s2325_s4 = inlined_call_operand.vmem [shape: f32[1,128], index: 4, kind: input, shape index: {}]   ;;  %s2326_s5 = inlined_call_operand.vmem [shape: f32[8,128], index: 5, kind: output, shape index: {}]  }
   0x1   :  { %v1556_v0 = vld [vmem:[%s2321_s1 + $0xe4] ss:$16 sps:$4 sm:$0xff]   ;;  %v1560_v2 = vld [vmem:[%s2321_s1 + $0xe0] ss:$16 sps:$4 sm:$0xff]   ;;  %v22_v48 = vld [vmem:[%s2322_s0 + $0x8] sm:$0xff] }
   0x2   :  { %v1558_v1 = vld [vmem:[%s2321_s1 + $0x2e4] ss:$16 sps:$4 sm:$0xff]   ;;  %827 = vmatprep.subr.bf16.mxu0 %v1556_v0  ;;  %v1561_v3 = vld [vmem:[%s2321_s1 + $0x2e0] ss:$16 sps:$4 sm:$0xff]   ;;  %v1350_v51 = vcombine.high %v22_v48, %v22_v48 }
   0x3   :  { %868 = vmatprep.subr.bf16.mxu1 %v1558_v1  ;;  %v1562_v4 = vld [vmem:[%s2321_s1 + $0xc4] ss:$16 sps:$4 sm:$0xff]   ;;  %828 = vmatpush1.bf16.msra.mxu0 %v1560_v2  ;;  %v1566_v6 = vld [vmem:[%s2321_s1 + $0xc0] ss:$16 sps:$4 sm:$0xff]  }
   0x4   :  { %869 = vmatpush1.bf16.msra.mxu1 %v1561_v3  ;;  %v1564_v5 = vld [vmem:[%s2321_s1 + $0x2c4] ss:$16 sps:$4 sm:$0xff]   ;;  %829 = vmatprep.subr.bf16.mxu0 %v1562_v4  ;;  %v1567_v7 = vld [vmem:[%s2321_s1 + $0x2c0] ss:$16 sps:$4 sm:$0xff]   ;;  %v1658_v4 = vld [vmem:[%s2321_s1 + $0xec] ss:$16 sps:$4 sm:$0xff]  }
   0x5   :  { %870 = vmatprep.subr.bf16.mxu1 %v1564_v5  ;;  %v1568_v8 = vld [vmem:[%s2321_s1 + $0xa4] ss:$16 sps:$4 sm:$0xff]   ;;  %v1572_v10 = vld [vmem:[%s2321_s1 + $0xa0] ss:$16 sps:$4 sm:$0xff]   ;;  %900 = vmatprep.mubr.bf16.mxu1 %v1350_v51  ;;  %v1661_v5 = vld [vmem:[%s2321_s1 + $0x2ec] ss:$16 sps:$4 sm:$0xff]  }
   0x6   :  { %v1570_v9 = vld [vmem:[%s2321_s1 + $0x2a4] ss:$16 sps:$4 sm:$0xff]   ;;  %v1573_v11 = vld [vmem:[%s2321_s1 + $0x2a0] ss:$16 sps:$4 sm:$0xff]  }
   0x7   :  { %830 = vmatpush1.bf16.msra.mxu0 %v1566_v6  ;;  %v1574_v12 = vld [vmem:[%s2321_s1 + $0x84] ss:$16 sps:$4 sm:$0xff]   ;;  %v1578_v14 = vld [vmem:[%s2321_s1 + $0x80] ss:$16 sps:$4 sm:$0xff]  }
   0x8   :  { %871 = vmatpush1.bf16.msra.mxu1 %v1567_v7  ;;  %831 = vmatprep.subr.bf16.mxu0 %v1568_v8  ;;  %v1576_v13 = vld [vmem:[%s2321_s1 + $0x284] ss:$16 sps:$4 sm:$0xff]   ;;  %v1579_v15 = vld [vmem:[%s2321_s1 + $0x280] ss:$16 sps:$4 sm:$0xff]   ;;  %v2023_v7 = vcombine.low %v22_v48, %v22_v48  ;;  %v1656_v8 = vld [vmem:[%s2321_s1 + $0xe8] ss:$16 sps:$4 sm:$0xff]  }
   0x9   :  { %872 = vmatprep.subr.bf16.mxu1 %v1570_v9  ;;  %v1580_v16 = vld [vmem:[%s2321_s1 + $0x64] ss:$16 sps:$4 sm:$0xff]   ;;  %v1584_v18 = vld [vmem:[%s2321_s1 + $0x60] ss:$16 sps:$4 sm:$0xff]   ;;  %v1659_v9 = vld [vmem:[%s2321_s1 + $0x2e8] ss:$16 sps:$4 sm:$0xff]  }
   0xa   :  { %v1582_v17 = vld [vmem:[%s2321_s1 + $0x264] ss:$16 sps:$4 sm:$0xff]   ;;  %v1585_v19 = vld [vmem:[%s2321_s1 + $0x260] ss:$16 sps:$4 sm:$0xff]   ;;  %v1716_v48 = vld [vmem:[%s2321_s1 + $0x1a8] ss:$16 sps:$4 sm:$0xff]  }
   0xb   :  { %832 = vmatpush1.bf16.msra.mxu0 %v1572_v10  ;;  %v1586_v20 = vld [vmem:[%s2321_s1 + $0x44] ss:$16 sps:$4 sm:$0xff]   ;;  %v1590_v22 = vld [vmem:[%s2321_s1 + $0x40] ss:$16 sps:$4 sm:$0xff]   ;;  %v1664_v10 = vld [vmem:[%s2321_s1 + $0xcc] ss:$16 sps:$4 sm:$0xff]  }
   0xc   :  { %873 = vmatpush1.bf16.msra.mxu1 %v1573_v11  ;;  %833 = vmatprep.subr.bf16.mxu0 %v1574_v12  ;;  %v1588_v21 = vld [vmem:[%s2321_s1 + $0x244] ss:$16 sps:$4 sm:$0xff]   ;;  %v1591_v23 = vld [vmem:[%s2321_s1 + $0x240] ss:$16 sps:$4 sm:$0xff]   ;;  %v1667_v11 = vld [vmem:[%s2321_s1 + $0x2cc] ss:$16 sps:$4 sm:$0xff]  }
   0xd   :  { %874 = vmatprep.subr.bf16.mxu1 %v1576_v13  ;;  %v1592_v24 = vld [vmem:[%s2321_s1 + $0x24] ss:$16 sps:$4 sm:$0xff]   ;;  %v1596_v26 = vld [vmem:[%s2321_s1 + $0x20] ss:$16 sps:$4 sm:$0xff]   ;;  %v1662_v12 = vld [vmem:[%s2321_s1 + $0xc8] ss:$16 sps:$4 sm:$0xff]  }
   0xe   :  { %v1594_v25 = vld [vmem:[%s2321_s1 + $0x224] ss:$16 sps:$4 sm:$0xff]   ;;  %v1597_v27 = vld [vmem:[%s2321_s1 + $0x220] ss:$16 sps:$4 sm:$0xff]   ;;  %v1665_v13 = vld [vmem:[%s2321_s1 + $0x2c8] ss:$16 sps:$4 sm:$0xff]  }
   0xf   :  { %834 = vmatpush1.bf16.msra.mxu0 %v1578_v14  ;;  %v1598_v28 = vld [vmem:[%s2321_s1 + $0x4] ss:$16 sps:$4 sm:$0xff]   ;;  %v1602_v30 = vld [vmem:[%s2321_s1] ss:$16 sps:$4 sm:$0xff]   ;;  %v1670_v14 = vld [vmem:[%s2321_s1 + $0xac] ss:$16 sps:$4 sm:$0xff]  }
  0x10   :  { %875 = vmatpush1.bf16.msra.mxu1 %v1579_v15  ;;  %835 = vmatprep.subr.bf16.mxu0 %v1580_v16  ;;  %v1600_v29 = vld [vmem:[%s2321_s1 + $0x204] ss:$16 sps:$4 sm:$0xff]   ;;  %v1603_v31 = vld [vmem:[%s2321_s1 + $0x200] ss:$16 sps:$4 sm:$0xff]   ;;  %v1673_v15 = vld [vmem:[%s2321_s1 + $0x2ac] ss:$16 sps:$4 sm:$0xff]  }
  0x11   :  { %876 = vmatprep.subr.bf16.mxu1 %v1582_v17  ;;  %v1604_v32 = vld [vmem:[%s2321_s1 + $0x1e4] ss:$16 sps:$4 sm:$0xff]   ;;  %v1608_v34 = vld [vmem:[%s2321_s1 + $0x1e0] ss:$16 sps:$4 sm:$0xff]   ;;  %v1668_v16 = vld [vmem:[%s2321_s1 + $0xa8] ss:$16 sps:$4 sm:$0xff]  }
  0x12   :  { %v1606_v33 = vld [vmem:[%s2321_s1 + $0x3e4] ss:$16 sps:$4 sm:$0xff]   ;;  %v1609_v35 = vld [vmem:[%s2321_s1 + $0x3e0] ss:$16 sps:$4 sm:$0xff]   ;;  %v1671_v17 = vld [vmem:[%s2321_s1 + $0x2a8] ss:$16 sps:$4 sm:$0xff]  }
  0x13   :  { %836 = vmatpush1.bf16.msra.mxu0 %v1584_v18  ;;  %v1610_v36 = vld [vmem:[%s2321_s1 + $0x1c4] ss:$16 sps:$4 sm:$0xff]   ;;  %v1614_v38 = vld [vmem:[%s2321_s1 + $0x1c0] ss:$16 sps:$4 sm:$0xff]   ;;  %v1676_v18 = vld [vmem:[%s2321_s1 + $0x8c] ss:$16 sps:$4 sm:$0xff]  }
  0x14   :  { %877 = vmatpush1.bf16.msra.mxu1 %v1585_v19  ;;  %837 = vmatprep.subr.bf16.mxu0 %v1586_v20  ;;  %v1612_v37 = vld [vmem:[%s2321_s1 + $0x3c4] ss:$16 sps:$4 sm:$0xff]   ;;  %v1615_v39 = vld [vmem:[%s2321_s1 + $0x3c0] ss:$16 sps:$4 sm:$0xff]   ;;  %v1679_v19 = vld [vmem:[%s2321_s1 + $0x28c] ss:$16 sps:$4 sm:$0xff]  }
  0x15   :  { %878 = vmatprep.subr.bf16.mxu1 %v1588_v21  ;;  %v1616_v40 = vld [vmem:[%s2321_s1 + $0x1a4] ss:$16 sps:$4 sm:$0xff]   ;;  %v1620_v42 = vld [vmem:[%s2321_s1 + $0x1a0] ss:$16 sps:$4 sm:$0xff]   ;;  %v1674_v20 = vld [vmem:[%s2321_s1 + $0x88] ss:$16 sps:$4 sm:$0xff]  }
  0x16   :  { %v1618_v41 = vld [vmem:[%s2321_s1 + $0x3a4] ss:$16 sps:$4 sm:$0xff]   ;;  %v1621_v43 = vld [vmem:[%s2321_s1 + $0x3a0] ss:$16 sps:$4 sm:$0xff]   ;;  %v1677_v21 = vld [vmem:[%s2321_s1 + $0x288] ss:$16 sps:$4 sm:$0xff]  }
  0x17   :  { %838 = vmatpush1.bf16.msra.mxu0 %v1590_v22  ;;  %v1622_v44 = vld [vmem:[%s2321_s1 + $0x184] ss:$16 sps:$4 sm:$0xff]   ;;  %v1626_v49 = vld [vmem:[%s2321_s1 + $0x180] ss:$16 sps:$4 sm:$0xff]   ;;  %v1682_v22 = vld [vmem:[%s2321_s1 + $0x6c] ss:$16 sps:$4 sm:$0xff]  }
  0x18   :  { %879 = vmatpush1.bf16.msra.mxu1 %v1591_v23  ;;  %839 = vmatprep.subr.bf16.mxu0 %v1592_v24  ;;  %v1624_v45 = vld [vmem:[%s2321_s1 + $0x384] ss:$16 sps:$4 sm:$0xff]   ;;  %v1627_v50 = vld [vmem:[%s2321_s1 + $0x380] ss:$16 sps:$4 sm:$0xff]   ;;  %v1685_v23 = vld [vmem:[%s2321_s1 + $0x26c] ss:$16 sps:$4 sm:$0xff]  }
  0x19   :  { %880 = vmatprep.subr.bf16.mxu1 %v1594_v25  ;;  %v21_v46 = vld [vmem:[%s2322_s0] sm:$0xff]  ;;  %v1680_v24 = vld [vmem:[%s2321_s1 + $0x68] ss:$16 sps:$4 sm:$0xff]  }
  0x1a   :  { %v1955_v47 = vcombine.high %v21_v46, %v21_v46  ;;  %v1628_v52 = vld [vmem:[%s2321_s1 + $0x164] ss:$16 sps:$4 sm:$0xff]   ;;  %v1632_v54 = vld [vmem:[%s2321_s1 + $0x160] ss:$16 sps:$4 sm:$0xff]   ;;  %v2021_v6 = vcombine.low %v21_v46, %v21_v46  ;;  %v1683_v25 = vld [vmem:[%s2321_s1 + $0x268] ss:$16 sps:$4 sm:$0xff]  }
  0x1b   :  { %840 = vmatpush1.bf16.msra.mxu0 %v1596_v26  ;;  %v1630_v53 = vld [vmem:[%s2321_s1 + $0x364] ss:$16 sps:$4 sm:$0xff]   ;;  %v1633_v55 = vld [vmem:[%s2321_s1 + $0x360] ss:$16 sps:$4 sm:$0xff]   ;;  %v1688_v26 = vld [vmem:[%s2321_s1 + $0x4c] ss:$16 sps:$4 sm:$0xff]  }
  0x1c   :  { %881 = vmatpush1.bf16.msra.mxu1 %v1597_v27  ;;  %841 = vmatprep.subr.bf16.mxu0 %v1598_v28  ;;  %v1634_v56 = vld [vmem:[%s2321_s1 + $0x144] ss:$16 sps:$4 sm:$0xff]   ;;  %v1638_v58 = vld [vmem:[%s2321_s1 + $0x140] ss:$16 sps:$4 sm:$0xff]   ;;  %v1691_v27 = vld [vmem:[%s2321_s1 + $0x24c] ss:$16 sps:$4 sm:$0xff]  }
  0x1d   :  { %882 = vmatprep.subr.bf16.mxu1 %v1600_v29  ;;  %859 = vmatprep.mubr.bf16.mxu0 %v1955_v47  ;;  %v1636_v57 = vld [vmem:[%s2321_s1 + $0x344] ss:$16 sps:$4 sm:$0xff]   ;;  %v1639_v59 = vld [vmem:[%s2321_s1 + $0x340] ss:$16 sps:$4 sm:$0xff]   ;;  %v1686_v28 = vld [vmem:[%s2321_s1 + $0x48] ss:$16 sps:$4 sm:$0xff]  }
  0x1e   :  { %v1640_v60 = vld [vmem:[%s2321_s1 + $0x124] ss:$16 sps:$4 sm:$0xff]   ;;  %v1644_v62 = vld [vmem:[%s2321_s1 + $0x120] ss:$16 sps:$4 sm:$0xff]   ;;  %v1689_v29 = vld [vmem:[%s2321_s1 + $0x248] ss:$16 sps:$4 sm:$0xff]  }
  0x1f   :  { %842 = vmatpush1.bf16.msra.mxu0 %v1602_v30  ;;  %v1642_v61 = vld [vmem:[%s2321_s1 + $0x324] ss:$16 sps:$4 sm:$0xff]   ;;  %v1645_v63 = vld [vmem:[%s2321_s1 + $0x320] ss:$16 sps:$4 sm:$0xff]   ;;  %v1694_v30 = vld [vmem:[%s2321_s1 + $0x2c] ss:$16 sps:$4 sm:$0xff]  }
  0x20   :  { %883 = vmatpush1.bf16.msra.mxu1 %v1603_v31  ;;  %843 = vmatprep.subr.bf16.mxu0 %v1604_v32  ;;  %v1646_v0 = vld [vmem:[%s2321_s1 + $0x104] ss:$16 sps:$4 sm:$0xff]   ;;  %v1650_v2 = vld [vmem:[%s2321_s1 + $0x100] ss:$16 sps:$4 sm:$0xff]   ;;  %v1697_v31 = vld [vmem:[%s2321_s1 + $0x22c] ss:$16 sps:$4 sm:$0xff]  }
  0x21   :  { %884 = vmatprep.subr.bf16.mxu1 %v1606_v33  ;;  %v1648_v1 = vld [vmem:[%s2321_s1 + $0x304] ss:$16 sps:$4 sm:$0xff]   ;;  %v1651_v3 = vld [vmem:[%s2321_s1 + $0x300] ss:$16 sps:$4 sm:$0xff]   ;;  %v1692_v32 = vld [vmem:[%s2321_s1 + $0x28] ss:$16 sps:$4 sm:$0xff]  }
  0x22   :  { %v1695_v33 = vld [vmem:[%s2321_s1 + $0x228] ss:$16 sps:$4 sm:$0xff]   ;;  %v1718_v46 = vld [vmem:[%s2321_s1 + $0x1ac] ss:$16 sps:$4 sm:$0xff]  }
  0x23   :  { %844 = vmatpush2.bf16.msra.mxu0 %v1608_v34  ;;  %v1700_v34 = vld [vmem:[%s2321_s1 + $0xc] ss:$16 sps:$4 sm:$0xff]  }
  0x24   :  { %885 = vmatpush2.bf16.msra.mxu1 %v1609_v35  ;;  %845 = vmatprep.subr.bf16.mxu0 %v1610_v36  ;;  %v1703_v35 = vld [vmem:[%s2321_s1 + $0x20c] ss:$16 sps:$4 sm:$0xff]   ;;  %v1698_v36 = vld [vmem:[%s2321_s1 + $0x8] ss:$16 sps:$4 sm:$0xff]  }
  0x25   :  { %886 = vmatprep.subr.bf16.mxu1 %v1612_v37  ;;  %v1701_v37 = vld [vmem:[%s2321_s1 + $0x208] ss:$16 sps:$4 sm:$0xff]  }
  0x27   :  { %846 = vmatpush2.bf16.msra.mxu0 %v1614_v38  ;;  %v1706_v38 = vld [vmem:[%s2321_s1 + $0x1ec] ss:$16 sps:$4 sm:$0xff]  }
  0x28   :  { %887 = vmatpush2.bf16.msra.mxu1 %v1615_v39  ;;  %847 = vmatprep.subr.bf16.mxu0 %v1616_v40  ;;  %v1709_v39 = vld [vmem:[%s2321_s1 + $0x3ec] ss:$16 sps:$4 sm:$0xff]   ;;  %v1704_v40 = vld [vmem:[%s2321_s1 + $0x1e8] ss:$16 sps:$4 sm:$0xff]  }
  0x29   :  { %888 = vmatprep.subr.bf16.mxu1 %v1618_v41  ;;  %v1707_v41 = vld [vmem:[%s2321_s1 + $0x3e8] ss:$16 sps:$4 sm:$0xff]  }
  0x2b   :  { %848 = vmatpush2.bf16.msra.mxu0 %v1620_v42  ;;  %v1712_v42 = vld [vmem:[%s2321_s1 + $0x1cc] ss:$16 sps:$4 sm:$0xff]  }
  0x2c   :  { %889 = vmatpush2.bf16.msra.mxu1 %v1621_v43  ;;  %849 = vmatprep.subr.bf16.mxu0 %v1622_v44  ;;  %v1715_v43 = vld [vmem:[%s2321_s1 + $0x3cc] ss:$16 sps:$4 sm:$0xff]   ;;  %v1710_v44 = vld [vmem:[%s2321_s1 + $0x1c8] ss:$16 sps:$4 sm:$0xff]  }
  0x2d   :  { %890 = vmatprep.subr.bf16.mxu1 %v1624_v45  ;;  %v1713_v45 = vld [vmem:[%s2321_s1 + $0x3c8] ss:$16 sps:$4 sm:$0xff]  }
  0x2f   :  { %850 = vmatpush2.bf16.msra.mxu0 %v1626_v49  ;;  %v1719_v49 = vld [vmem:[%s2321_s1 + $0x3a8] ss:$16 sps:$4 sm:$0xff]  }
  0x30   :  { %891 = vmatpush2.bf16.msra.mxu1 %v1627_v50  ;;  %851 = vmatprep.subr.bf16.mxu0 %v1628_v52  ;;  %v1724_v50 = vld [vmem:[%s2321_s1 + $0x18c] ss:$16 sps:$4 sm:$0xff]   ;;  %v1722_v52 = vld [vmem:[%s2321_s1 + $0x188] ss:$16 sps:$4 sm:$0xff]  }
  0x31   :  { %892 = vmatprep.subr.bf16.mxu1 %v1630_v53  ;;  %v1725_v53 = vld [vmem:[%s2321_s1 + $0x388] ss:$16 sps:$4 sm:$0xff]  }
  0x33   :  { %852 = vmatpush2.bf16.msra.mxu0 %v1632_v54  ;;  %v1730_v54 = vld [vmem:[%s2321_s1 + $0x16c] ss:$16 sps:$4 sm:$0xff]  }
  0x34   :  { %893 = vmatpush2.bf16.msra.mxu1 %v1633_v55  ;;  %853 = vmatprep.subr.bf16.mxu0 %v1634_v56  ;;  %v1733_v55 = vld [vmem:[%s2321_s1 + $0x36c] ss:$16 sps:$4 sm:$0xff]   ;;  %v1728_v56 = vld [vmem:[%s2321_s1 + $0x168] ss:$16 sps:$4 sm:$0xff]  }
  0x35   :  { %894 = vmatprep.subr.bf16.mxu1 %v1636_v57  ;;  %v1731_v57 = vld [vmem:[%s2321_s1 + $0x368] ss:$16 sps:$4 sm:$0xff]  }
  0x37   :  { %854 = vmatpush2.bf16.msra.mxu0 %v1638_v58  ;;  %v1736_v58 = vld [vmem:[%s2321_s1 + $0x14c] ss:$16 sps:$4 sm:$0xff]  }
  0x38   :  { %895 = vmatpush2.bf16.msra.mxu1 %v1639_v59  ;;  %855 = vmatprep.subr.bf16.mxu0 %v1640_v60  ;;  %v1739_v59 = vld [vmem:[%s2321_s1 + $0x34c] ss:$16 sps:$4 sm:$0xff]   ;;  %v1734_v60 = vld [vmem:[%s2321_s1 + $0x148] ss:$16 sps:$4 sm:$0xff]  }
  0x39   :  { %896 = vmatprep.subr.bf16.mxu1 %v1642_v61  ;;  %v1737_v61 = vld [vmem:[%s2321_s1 + $0x348] ss:$16 sps:$4 sm:$0xff]  }
  0x3b   :  { %856 = vmatpush2.bf16.msra.mxu0 %v1644_v62  ;;  %v1742_v62 = vld [vmem:[%s2321_s1 + $0x12c] ss:$16 sps:$4 sm:$0xff]  }
  0x3c   :  { %897 = vmatpush2.bf16.msra.mxu1 %v1645_v63  ;;  %857 = vmatprep.subr.bf16.mxu0 %v1646_v0  ;;  %v1745_v63 = vld [vmem:[%s2321_s1 + $0x32c] ss:$16 sps:$4 sm:$0xff]   ;;  %v1740_v0 = vld [vmem:[%s2321_s1 + $0x128] ss:$16 sps:$4 sm:$0xff]  }
  0x3d   :  { %898 = vmatprep.subr.bf16.mxu1 %v1648_v1  ;;  %v1743_v1 = vld [vmem:[%s2321_s1 + $0x328] ss:$16 sps:$4 sm:$0xff]  }
  0x3f   :  { %858 = vmatpush2.bf16.msra.mxu0 %v1650_v2  ;;  %v1748_v2 = vld [vmem:[%s2321_s1 + $0x10c] ss:$16 sps:$4 sm:$0xff]  }
  0x40   :  { %899 = vmatpush2.bf16.msra.mxu1 %v1651_v3  ;;  %909 = vmatprep.subr.bf16.mxu0 %v1658_v4  ;;  %v1751_v3 = vld [vmem:[%s2321_s1 + $0x30c] ss:$16 sps:$4 sm:$0xff]   ;;  %v1746_v4 = vld [vmem:[%s2321_s1 + $0x108] ss:$16 sps:$4 sm:$0xff]  }
  0x41   :  { %950 = vmatprep.subr.bf16.mxu1 %v1661_v5  ;;  %v1749_v5 = vld [vmem:[%s2321_s1 + $0x308] ss:$16 sps:$4 sm:$0xff]  }
  0x42   :  { %860 = vmatmul.mubr.bf16.vlgmr.msra.gmra.mxu0 %v2021_v6 }
  0x43   :  { %901 = vmatmul.mubr.bf16.vlgmr.msra.gmra.mxu1 %v2023_v7  ;;  %910 = vmatpush1.bf16.msra.mxu0 %v1656_v8  ;;  %v1752_v8 = vld [vmem:[%s2323_s3 + $0x78] sm:$0xff]  }
  0x44   :  { %951 = vmatpush1.bf16.msra.mxu1 %v1659_v9  ;;  %911 = vmatprep.subr.bf16.mxu0 %v1664_v10  ;;  %v1753_v9 = vld [vmem:[%s2323_s3 + $0x38] sm:$0xff]   ;;  %v1754_v10 = vld [vmem:[%s2323_s3 + $0x70] sm:$0xff]  }
  0x45   :  { %952 = vmatprep.subr.bf16.mxu1 %v1667_v11  ;;  %941 = vmatprep.mubr.bf16.mxu0 %v1955_v47  ;;  %v1721_v47 = vld [vmem:[%s2321_s1 + $0x3ac] ss:$16 sps:$4 sm:$0xff]   ;;  %v1755_v11 = vld [vmem:[%s2323_s3 + $0x30] sm:$0xff]  }
  0x46   :  { %982 = vmatprep.mubr.bf16.mxu1 %v1350_v51  ;;  %v1727_v51 = vld [vmem:[%s2321_s1 + $0x38c] ss:$16 sps:$4 sm:$0xff]  }
  0x47   :  { %912 = vmatpush1.bf16.msra.mxu0 %v1662_v12  ;;  %v1756_v12 = vld [vmem:[%s2323_s3 + $0x68] sm:$0xff]  }
  0x48   :  { %953 = vmatpush1.bf16.msra.mxu1 %v1665_v13  ;;  %913 = vmatprep.subr.bf16.mxu0 %v1670_v14  ;;  %v1757_v13 = vld [vmem:[%s2323_s3 + $0x28] sm:$0xff]   ;;  %v1760_v14 = vld [vmem:[%s2323_s3 + $0x58] sm:$0xff]  }
  0x49   :  { %954 = vmatprep.subr.bf16.mxu1 %v1673_v15  ;;  %v1768_v15 = vld [vmem:[%s2323_s3 + $0xf8] sm:$0xff]  }
  0x4b   :  { %914 = vmatpush1.bf16.msra.mxu0 %v1668_v16  ;;  %v1769_v16 = vld [vmem:[%s2323_s3 + $0xb8] sm:$0xff]  }
  0x4c   :  { %955 = vmatpush1.bf16.msra.mxu1 %v1671_v17  ;;  %915 = vmatprep.subr.bf16.mxu0 %v1676_v18  ;;  %v1770_v17 = vld [vmem:[%s2323_s3 + $0xf0] sm:$0xff]   ;;  %v1761_v18 = vld [vmem:[%s2323_s3 + $0x18] sm:$0xff]  }
  0x4d   :  { %956 = vmatprep.subr.bf16.mxu1 %v1679_v19  ;;  %v1762_v19 = vld [vmem:[%s2323_s3 + $0x50] sm:$0xff]  }
  0x4f   :  { %916 = vmatpush1.bf16.msra.mxu0 %v1674_v20  ;;  %v1771_v20 = vld [vmem:[%s2323_s3 + $0xb0] sm:$0xff]  }
  0x50   :  { %957 = vmatpush1.bf16.msra.mxu1 %v1677_v21  ;;  %917 = vmatprep.subr.bf16.mxu0 %v1682_v22  ;;  %v1772_v21 = vld [vmem:[%s2323_s3 + $0xe8] sm:$0xff]   ;;  %v1763_v22 = vld [vmem:[%s2323_s3 + $0x10] sm:$0xff]  }
  0x51   :  { %958 = vmatprep.subr.bf16.mxu1 %v1685_v23  ;;  %v1764_v23 = vld [vmem:[%s2323_s3 + $0x48] sm:$0xff]  }
  0x53   :  { %918 = vmatpush1.bf16.msra.mxu0 %v1680_v24  ;;  %v1773_v24 = vld [vmem:[%s2323_s3 + $0xa8] sm:$0xff]  }
  0x54   :  { %959 = vmatpush1.bf16.msra.mxu1 %v1683_v25  ;;  %919 = vmatprep.subr.bf16.mxu0 %v1688_v26  ;;  %v1774_v25 = vld [vmem:[%s2323_s3 + $0xe0] sm:$0xff]   ;;  %v1765_v26 = vld [vmem:[%s2323_s3 + $0x8] sm:$0xff]  }
  0x55   :  { %960 = vmatprep.subr.bf16.mxu1 %v1691_v27  ;;  %v1766_v27 = vld [vmem:[%s2323_s3 + $0x40] sm:$0xff]  }
  0x57   :  { %920 = vmatpush1.bf16.msra.mxu0 %v1686_v28  ;;  %v1775_v28 = vld [vmem:[%s2323_s3 + $0xa0] sm:$0xff]  }
  0x58   :  { %961 = vmatpush1.bf16.msra.mxu1 %v1689_v29  ;;  %921 = vmatprep.subr.bf16.mxu0 %v1694_v30  ;;  %v1776_v29 = vld [vmem:[%s2323_s3 + $0xd8] sm:$0xff]   ;;  %v1767_v30 = vld [vmem:[%s2323_s3] sm:$0xff]  }
  0x59   :  { %962 = vmatprep.subr.bf16.mxu1 %v1697_v31  ;;  %v1777_v31 = vld [vmem:[%s2323_s3 + $0x98] sm:$0xff]  }
  0x5b   :  { %922 = vmatpush1.bf16.msra.mxu0 %v1692_v32  ;;  %v1778_v32 = vld [vmem:[%s2323_s3 + $0xd0] sm:$0xff]  }
  0x5c   :  { %963 = vmatpush1.bf16.msra.mxu1 %v1695_v33  ;;  %923 = vmatprep.subr.bf16.mxu0 %v1700_v34  ;;  %v1779_v33 = vld [vmem:[%s2323_s3 + $0x90] sm:$0xff]   ;;  %v1780_v34 = vld [vmem:[%s2323_s3 + $0xc8] sm:$0xff]  }
  0x5d   :  { %964 = vmatprep.subr.bf16.mxu1 %v1703_v35  ;;  %v1781_v35 = vld [vmem:[%s2323_s3 + $0x88] sm:$0xff]  }
  0x5f   :  { %924 = vmatpush1.bf16.msra.mxu0 %v1698_v36  ;;  %v1782_v36 = vld [vmem:[%s2323_s3 + $0xc0] sm:$0xff]  }
  0x60   :  { %965 = vmatpush1.bf16.msra.mxu1 %v1701_v37  ;;  %925 = vmatprep.subr.bf16.mxu0 %v1706_v38  ;;  %v1783_v37 = vld [vmem:[%s2323_s3 + $0x80] sm:$0xff]   ;;  %v153_v38 = vlaneseq }
  0x61   :  { %966 = vmatprep.subr.bf16.mxu1 %v1709_v39 }
  0x62   :  { %v154_v39 = vshrl.u32 %v153_v38, 7 }
  0x63   :  { %926 = vmatpush2.bf16.msra.mxu0 %v1704_v40 }
  0x64   :  { %967 = vmatpush2.bf16.msra.mxu1 %v1707_v41  ;;  %927 = vmatprep.subr.bf16.mxu0 %v1712_v42  ;;  %v155_v40 = vsub.s32 0, %v154_v39  ;;  %v151_v41 = vld [vmem:[%s2324_s2] sm:$0xf]  ;;  %v159_v42 = vsub.s32 1, %v154_v39 }
  0x65   :  { %968 = vmatprep.subr.bf16.mxu1 %v1715_v43 }
  0x66   :  { %v156_v43 = vrot.slane %v151_v41, %v155_v40 }
  0x67   :  { %928 = vmatpush2.bf16.msra.mxu0 %v1710_v44  ;;  %v160_v44 = vrot.slane %v151_v41, %v159_v42 }
  0x68   :  { %969 = vmatpush2.bf16.msra.mxu1 %v1713_v45  ;;  %929 = vmatprep.subr.bf16.mxu0 %v1718_v46 }
  0x69   :  { %970 = vmatprep.subr.bf16.mxu1 %v1721_v47 }
  0x6b   :  { %930 = vmatpush2.bf16.msra.mxu0 %v1716_v48 }
  0x6c   :  { %971 = vmatpush2.bf16.msra.mxu1 %v1719_v49  ;;  %931 = vmatprep.subr.bf16.mxu0 %v1724_v50 }
  0x6d   :  { %972 = vmatprep.subr.bf16.mxu1 %v1727_v51 }
  0x6f   :  { %932 = vmatpush2.bf16.msra.mxu0 %v1722_v52 }
  0x70   :  { %973 = vmatpush2.bf16.msra.mxu1 %v1725_v53  ;;  %933 = vmatprep.subr.bf16.mxu0 %v1730_v54 }
  0x71   :  { %974 = vmatprep.subr.bf16.mxu1 %v1733_v55 }
  0x73   :  { %934 = vmatpush2.bf16.msra.mxu0 %v1728_v56 }
  0x74   :  { %975 = vmatpush2.bf16.msra.mxu1 %v1731_v57  ;;  %935 = vmatprep.subr.bf16.mxu0 %v1736_v58 }
  0x75   :  { %976 = vmatprep.subr.bf16.mxu1 %v1739_v59 }
  0x77   :  { %936 = vmatpush2.bf16.msra.mxu0 %v1734_v60 }
  0x78   :  { %977 = vmatpush2.bf16.msra.mxu1 %v1737_v61  ;;  %937 = vmatprep.subr.bf16.mxu0 %v1742_v62  ;;  %v163_v61 = vsub.s32 2, %v154_v39  ;;  %v167_v62 = vsub.s32 3, %v154_v39 }
  0x79   :  { %978 = vmatprep.subr.bf16.mxu1 %v1745_v63 }
  0x7a   :  { %v164_v63 = vrot.slane %v151_v41, %v163_v61 }
  0x7b   :  { %938 = vmatpush2.bf16.msra.mxu0 %v1740_v0  ;;  %v168_v0 = vrot.slane %v151_v41, %v167_v62 }
  0x7c   :  { %979 = vmatpush2.bf16.msra.mxu1 %v1743_v1  ;;  %939 = vmatprep.subr.bf16.mxu0 %v1748_v2 }
  0x7d   :  { %980 = vmatprep.subr.bf16.mxu1 %v1751_v3 }
  0x7f   :  { %940 = vmatpush2.bf16.msra.mxu0 %v1746_v4 }
  0x80   :  { %981 = vmatpush2.bf16.msra.mxu1 %v1749_v5  ;;  %1512 = vmatprep.subr.bf16.mxu0 %v1752_v8 }
  0x81   :  { %1534 = vmatprep.subr.bf16.mxu1 %v1768_v15 }
  0x82   :  { %942 = vmatmul.mubr.bf16.vlgmr.msra.gmra.mxu0 %v2021_v6  ;;  %v1758_v6 = vld [vmem:[%s2323_s3 + $0x60] sm:$0xff]  }
  0x83   :  { %983 = vmatmul.mubr.bf16.vlgmr.msra.gmra.mxu1 %v2023_v7  ;;  %1513 = vmatpush3.bf16.msra.mxu0 %v1753_v9  ;;  %v1759_v7 = vld [vmem:[%s2323_s3 + $0x20] sm:$0xff]  }
  0x84   :  { %1514 = vmatprep.subr.bf16.mxu0 %v1754_v10  ;;  %1535 = vmatpush3.bf16.msra.mxu1 %v1769_v16 }
  0x85   :  { %1536 = vmatprep.subr.bf16.mxu1 %v1770_v17 }
  0x87   :  { %1515 = vmatpush3.bf16.msra.mxu0 %v1755_v11 }
  0x88   :  { %1516 = vmatprep.subr.bf16.mxu0 %v1756_v12  ;;  %1537 = vmatpush3.bf16.msra.mxu1 %v1771_v20 }
  0x89   :  { %1538 = vmatprep.subr.bf16.mxu1 %v1772_v21 }
  0x8b   :  { %1517 = vmatpush3.bf16.msra.mxu0 %v1757_v13 }
  0x8c   :  { %1518 = vmatprep.subr.bf16.mxu0 %v1758_v6  ;;  %1539 = vmatpush3.bf16.msra.mxu1 %v1773_v24 }
  0x8d   :  { %1540 = vmatprep.subr.bf16.mxu1 %v1774_v25 }
  0x8f   :  { %1519 = vmatpush3.bf16.msra.mxu0 %v1759_v7 }
  0x90   :  { %1520 = vmatprep.subr.bf16.mxu0 %v1760_v14  ;;  %1541 = vmatpush3.bf16.msra.mxu1 %v1775_v28 }
  0x91   :  { %1542 = vmatprep.subr.bf16.mxu1 %v1776_v29 }
  0x93   :  { %1521 = vmatpush3.bf16.msra.mxu0 %v1761_v18 }
  0x94   :  { %1522 = vmatprep.subr.bf16.mxu0 %v1762_v19  ;;  %1543 = vmatpush3.bf16.msra.mxu1 %v1777_v31 }
  0x95   :  { %1544 = vmatprep.subr.bf16.mxu1 %v1778_v32 }
  0x97   :  { %1523 = vmatpush3.bf16.msra.mxu0 %v1763_v22  ;;  %v1479_v22 = vld [vmem:[%s2325_s4] ss:$0 sm:$0xff] }
  0x98   :  { %1524 = vmatprep.subr.bf16.mxu0 %v1764_v23  ;;  %1545 = vmatpush3.bf16.msra.mxu1 %v1779_v33 }
  0x99   :  { %1546 = vmatprep.subr.bf16.mxu1 %v1780_v34 }
  0x9b   :  { %1525 = vmatpush3.bf16.msra.mxu0 %v1765_v26 }
  0x9c   :  { %1526 = vmatprep.subr.bf16.mxu0 %v1766_v27  ;;  %1547 = vmatpush3.bf16.msra.mxu1 %v1781_v35 }
  0x9d   :  { %1548 = vmatprep.subr.bf16.mxu1 %v1782_v36 }
  0x9f   :  { %1527 = vmatpush3.bf16.msra.mxu0 %v1767_v30 }
  0xa0   :  { %1549 = vmatpush3.bf16.msra.mxu1 %v1783_v37 }
 0x102   :  { %v861_v45 = vpop.f32.mrf.mxu0 }
 0x103   :  { %v902_v46 = vpop.f32.mrf.mxu1  ;;  %v862_v47 = vadd.f32 %v861_v45, %v156_v43 }
 0x104   :  { %v863_v48 = vpop.f32.mrf.mxu0 }
 0x105   :  { %v904_v49 = vpop.f32.mrf.mxu1  ;;  %v903_v50 = vadd.f32 %v902_v46, %v862_v47  ;;  %v864_v51 = vadd.f32 %v863_v48, %v160_v44 }
 0x106   :  { %v865_v52 = vpop.f32.mrf.mxu0 }
 0x107   :  { %v906_v53 = vpop.f32.mrf.mxu1  ;;  %v905_v54 = vadd.f32 %v904_v49, %v864_v51  ;;  %v991_v55 = vmax.f32 %v903_v50, 0.0 }
 0x108   :  { %v866_v56 = vpop.f32.mrf.mxu0 }
 0x109   :  { %v907_v57 = vpop.f32.mrf.mxu1  ;;  %v992_v58 = vmax.f32 %v905_v54, 0.0  ;;  %v995_v60 = vpack.c.bf16 %v991_v55, %v991_v55 }
 0x10b   :  { %v996_v59 = vpack.c.bf16 %v992_v58, %v992_v58 }
 0x10d   :  { %1294 = vmatprep.mubr.bf16.mxu0 %v996_v59 }
 0x10e   :  { %1295 = vmatmul.mubr.bf16.vlgmr.msra.gmra.mxu0 %v995_v60 }
 0x142   :  { %v943_v1 = vpop.f32.mrf.mxu0 }
 0x143   :  { %v984_v2 = vpop.f32.mrf.mxu1  ;;  %v944_v3 = vadd.f32 %v943_v1, %v164_v63 }
 0x144   :  { %v945_v4 = vpop.f32.mrf.mxu0 }
 0x145   :  { %v986_v5 = vpop.f32.mrf.mxu1  ;;  %v985_v8 = vadd.f32 %v984_v2, %v944_v3  ;;  %v946_v9 = vadd.f32 %v945_v4, %v168_v0 }
 0x146   :  { %v947_v10 = vpop.f32.mrf.mxu0 }
 0x147   :  { %v988_v11 = vpop.f32.mrf.mxu1  ;;  %v987_v12 = vadd.f32 %v986_v5, %v946_v9  ;;  %v993_v13 = vmax.f32 %v985_v8, 0.0 }
 0x148   :  { %v948_v6 = vpop.f32.mrf.mxu0 }
 0x149   :  { %v989_v7 = vpop.f32.mrf.mxu1  ;;  %v994_v14 = vmax.f32 %v987_v12, 0.0  ;;  %v997_v16 = vpack.c.bf16 %v993_v13, %v993_v13 }
 0x14b   :  { %v998_v15 = vpack.c.bf16 %v994_v14, %v994_v14 }
 0x14d   :  { %1334 = vmatprep.mubr.bf16.mxu1 %v998_v15 }
 0x14e   :  { %1335 = vmatmul.mubr.bf16.vlgmr.msra.gmra.mxu1 %v997_v16 }
 0x1ce   :  { %v1528_v17 = vpop.f32.mrf.mxu0 }
 0x1d0   :  { %v1529_v18 = vpop.f32.mrf.mxu0 }
 0x1d1   :  { %v1530_v21 = vadd.f32 %v1529_v18, %v1528_v17 }
 0x1d2   :  { %v1531_v19 = vpop.f32.mrf.mxu0 }
 0x1d3   :  { %v1297_v25 = vadd.f32 %v1530_v21, %v1479_v22 }
 0x1d4   :  { %v1532_v20 = vpop.f32.mrf.mxu0 }
 0x20e   :  { %v1550_v23 = vpop.f32.mrf.mxu1 }
 0x210   :  { %v1551_v24 = vpop.f32.mrf.mxu1 }
 0x211   :  { %v1552_v26 = vadd.f32 %v1551_v24, %v1550_v23 }
 0x212   :  { %v1553_v27 = vpop.f32.mrf.mxu1 }
 0x213   :  { %v1337_v28 = vadd.f32 %v1552_v26, %v1297_v25 }
 0x214   :  { %v1554_v29 = vpop.f32.mrf.mxu1 }
 0x215   :  { %1342 = vst [vmem:[%s2326_s5] sm:$0xff] %v1337_v28 }

</bundles_post_ra>
